<compile_context>
chip_gen: v5e
topology: v5e:2x2
jax: 0.10.0
libtpu: 0.0.40
codegen_flags: <defaults>
</compile_context>

<pallas_src>
import functools

import jax
import jax.numpy as jnp
from jax import lax
from jax.experimental import pallas as pl
from jax.experimental.pallas import tpu as pltpu  # noqa: F401 (TPU backend)


# ----------------------------------------------------------------------------
# Fused kernel: attention + BatchNormPoint branches + adapter MLP tail
# ----------------------------------------------------------------------------
def _adapter_fused_kernel(
    x_ref,                     # (B*V, F)   raw features
    res_ref,                   # (B, D)     raw features, lane-dense residual
    bn_g_ref, bn_b_ref,        # (1, F)     attention BatchNormPoint gamma/beta
    wq_ref, wv_ref,            # (B*V, B*V) block-diag q/k and v conv weights
    bv_ref,                    # (B*V, F)   v conv bias broadcast over features
    r1_ref,                    # (V, F)     fusion_ratio broadcast over features
    g1g_ref, g1b_ref,          # (1, F)     global_f BatchNormPoint gamma/beta
    r2_ref,                    # (V, F)     fusion_ratio_res broadcast
    n1g_ref, n1b_ref,          # (1, F)     norm BatchNormPoint gamma/beta
    wgT_ref, bg_ref,           # (D, D), (1, D)  global_f Linear (pre-transposed)
    g2g_ref, g2b_ref,          # (1, D)     global_f BatchNorm1d gamma/beta
    n2g_ref, n2b_ref,          # (1, D)     norm BatchNorm1d gamma/beta
    v0g_ref, v0b_ref,          # (1, D)     view_f BatchNorm1d gamma/beta
    w1T_ref, b1_ref,           # (D, D), (1, D)  view_f Linear 1 (pre-transposed)
    w2T_ref, b2_ref,           # (D, D), (1, D)  view_f Linear 2 (pre-transposed)
    out_ref,                   # (B, D)
    *, batch, views, in_feat, eps, adapter_ratio,
):
    n_rows = batch * views
    inv_n = 1.0 / n_rows
    inv_b = 1.0 / batch
    dim = views * in_feat

    # ---- attention: BatchNormPoint over the B*V rows ------------------------
    x = x_ref[...]
    mean = jnp.sum(x, axis=0, keepdims=True) * inv_n
    xc = x - mean
    var = jnp.sum(xc * xc, axis=0, keepdims=True) * inv_n
    xn = xc * (bn_g_ref[...] * lax.rsqrt(var + eps)) + bn_b_ref[...]

    # q/k (shared weights) and v 1x1 convs, batched over B as one
    # block-diagonal (BV,BV) x (BV,F) MXU matmul each.
    q = jnp.dot(wq_ref[...], xn, preferred_element_type=jnp.float32)
    v = jnp.dot(wv_ref[...], xn, preferred_element_type=jnp.float32) + bv_ref[...]

    # per-batch F x F attention (B is tiny -> static unrolled loop)
    att_blocks = []
    for b in range(batch):
        lo, hi = b * views, (b + 1) * views
        q_b = q[lo:hi, :]                                    # (V, F)
        v_b = v[lo:hi, :]                                    # (V, F)
        # energy[f, g] = sum_v q[v, f] * q[v, g]: contract dim 0 directly.
        energy = lax.dot_general(q_b, q_b, (((0,), (0,)), ((), ())),
                                 preferred_element_type=jnp.float32)   # (F, F)
        e_max = jnp.max(energy, axis=-1, keepdims=True)
        p = jnp.exp(energy - e_max)
        attn = p * pl.reciprocal(jnp.sum(p, axis=-1, keepdims=True), approx=False)
        attn = attn * pl.reciprocal(
            1e-9 + jnp.sum(attn, axis=0, keepdims=True), approx=False)
        ksa = jnp.dot(v_b, attn, preferred_element_type=jnp.float32)   # (V, F)
        att_blocks.append(xn[lo:hi, :] + ksa)

    # ---- the two fusion-scaled BatchNormPoint branches ----------------------
    def bnp_blocks(ratio, gamma, beta):
        blocks = [blk * ratio for blk in att_blocks]
        m = sum(jnp.sum(blk, axis=0, keepdims=True) for blk in blocks) * inv_n
        centered = [blk - m for blk in blocks]               # reused below
        var_b = sum(jnp.sum(c * c, axis=0, keepdims=True)
                    for c in centered) * inv_n
        scale = gamma * lax.rsqrt(var_b + eps)               # hoisted once
        return [c * scale + beta for c in centered]          # B x (V, F)

    g_blocks = bnp_blocks(r1_ref[...], g1g_ref[...], g1b_ref[...])
    n_blocks = bnp_blocks(r2_ref[...], n1g_ref[...], n1b_ref[...])

    # ---- in-kernel nn.Flatten: (V, F) blocks -> lane-dense (B, D) rows ------
    # Exact 0/1 placement matmuls (built from iota compares, no HBM traffic):
    # place_v[f, d] = 1 iff d == v*F + f.
    f_ids = lax.broadcasted_iota(jnp.int32, (in_feat, dim), 0)
    d_ids = lax.broadcasted_iota(jnp.int32, (in_feat, dim), 1)
    diff = d_ids - f_ids
    acc = jnp.zeros((2 * batch, dim), jnp.float32)   # rows: [g_b0..g_bB, n_b0..]
    for vw in range(views):
        pieces = ([g_blocks[b][vw:vw + 1, :] for b in range(batch)]
                  + [n_blocks[b][vw:vw + 1, :] for b in range(batch)])
        rows_v = jnp.concatenate(pieces, axis=0)                     # (2B, F)
        place_v = (diff == vw * in_feat).astype(jnp.float32)         # (F, D)
        acc = acc + jnp.dot(rows_v, place_v,
                            preferred_element_type=jnp.float32)      # (2B, D)
    g_flat = acc[0:batch, :]                                          # (B, D)
    n_flat = acc[batch:2 * batch, :]                                  # (B, D)

    # ---- adapter MLP tail in lane-dense (B, D) ------------------------------
    def bn_rows(y, gamma, beta):                 # BatchNorm1d over the batch
        m = jnp.sum(y, axis=0, keepdims=True) * inv_b
        yc = y - m
        vv = jnp.sum(yc * yc, axis=0, keepdims=True) * inv_b
        return yc * (gamma * lax.rsqrt(vv + eps)) + beta

    # global_f tail: Linear -> BatchNorm1d -> ReLU     (Dropout == identity)
    g = jnp.dot(g_flat, wgT_ref[...],
                preferred_element_type=jnp.float32) + bg_ref[...]
    g = jnp.maximum(bn_rows(g, g2g_ref[...], g2b_ref[...]), 0.0)

    # norm tail: BatchNorm1d
    n = bn_rows(n_flat, n2g_ref[...], n2b_ref[...])

    gf = g * adapter_ratio + n * (1.0 - adapter_ratio)

    # view_f: BatchNorm1d -> Linear -> ReLU -> Linear -> ReLU
    h = bn_rows(gf, v0g_ref[...], v0b_ref[...])
    h = jnp.maximum(jnp.dot(h, w1T_ref[...],
                            preferred_element_type=jnp.float32) + b1_ref[...], 0.0)
    h = jnp.maximum(jnp.dot(h, w2T_ref[...],
                            preferred_element_type=jnp.float32) + b2_ref[...], 0.0)

    out_ref[...] = h * adapter_ratio + res_ref[...] * (1.0 - adapter_ratio)


# ----------------------------------------------------------------------------
# One-time parameter preparation (hoisted out of the per-call hot path).
# ----------------------------------------------------------------------------
def prepare_adapter_params(params, *, batch, views, feat):
    B, V, F = batch, views, feat
    eye_b = jnp.eye(B, dtype=jnp.float32)
    row = lambda p: p.reshape(1, -1)
    return dict(
        bn_g=row(params["att_bn_gamma"]), bn_b=row(params["att_bn_beta"]),
        wq=jnp.kron(eye_b, params["att_wq"]),                 # (B*V, B*V)
        wv=jnp.kron(eye_b, params["att_wv"]),                 # (B*V, B*V)
        bv=jnp.tile(jnp.broadcast_to(params["att_bv"][:, None], (V, F)), (B, 1)),
        r1=jnp.broadcast_to(params["fusion_ratio"][:, None], (V, F)),
        g1g=row(params["g1_bn_gamma"]), g1b=row(params["g1_bn_beta"]),
        r2=jnp.broadcast_to(params["fusion_ratio_res"][:, None], (V, F)),
        n1g=row(params["n1_bn_gamma"]), n1b=row(params["n1_bn_beta"]),
        wgT=params["g_lin_w"].T, bg=row(params["g_lin_b"]),
        g2g=row(params["g2_bn_gamma"]), g2b=row(params["g2_bn_beta"]),
        n2g=row(params["n2_bn_gamma"]), n2b=row(params["n2_bn_beta"]),
        v0g=row(params["v0_bn_gamma"]), v0b=row(params["v0_bn_beta"]),
        w1T=params["v_lin1_w"].T, b1=row(params["v_lin1_b"]),
        w2T=params["v_lin2_w"].T, b2=row(params["v_lin2_b"]),
    )


# ----------------------------------------------------------------------------
# Per-call wrapper: two free contiguous reshapes + one pallas_call.
# ----------------------------------------------------------------------------
def adapter_forward(feat, kp, *, adapter_ratio, eps=1e-5):
    """feat: (B, V, F) float32.  Returns (B*V, F), matching Adapter.forward."""
    B, V, F = feat.shape
    D = V * F
    # Alignment guards (perf, not correctness): lane-dense output + 8-aligned
    # per-batch sublane slices.  Holds for the module's B=2, V=8, F=32.
    assert D % 128 == 0, "expect V*F % 128 == 0 for lane-dense output rows"
    assert views_ok(B, V), "expect (B*V) % 8 == 0 for aligned per-batch slices"

    x2 = feat.reshape(B * V, F)    # contiguous -> free
    res = feat.reshape(B, D)       # contiguous -> free

    out = pl.pallas_call(
        functools.partial(_adapter_fused_kernel, batch=B, views=V, in_feat=F,
                          eps=eps, adapter_ratio=adapter_ratio),
        out_shape=jax.ShapeDtypeStruct((B, D), jnp.float32),
    )(x2, res,
      kp["bn_g"], kp["bn_b"], kp["wq"], kp["wv"], kp["bv"],
      kp["r1"], kp["g1g"], kp["g1b"], kp["r2"], kp["n1g"], kp["n1b"],
      kp["wgT"], kp["bg"], kp["g2g"], kp["g2b"], kp["n2g"], kp["n2b"],
      kp["v0g"], kp["v0b"], kp["w1T"], kp["b1"], kp["w2T"], kp["b2"])

    return out.reshape(B * V, F)   # contiguous -> free


def views_ok(batch, views):
    return (batch * views) % 8 == 0


# ----------------------------------------------------------------------------
# Pure-JAX reference (mirrors the PyTorch forward, training-mode BN stats,
# dropout == identity).
# ----------------------------------------------------------------------------
def adapter_reference(feat, params, *, adapter_ratio, eps=1e-5):
    B, V, F = feat.shape
    D = V * F
    hi = jax.lax.Precision.HIGHEST

    def bn_point(y3, gamma, beta):        # BatchNormPoint: per-F over B*V rows
        flat = y3.reshape(B * V, F)
        m = jnp.mean(flat, axis=0)
        v = jnp.mean((flat - m) ** 2, axis=0)
        return ((flat - m) / jnp.sqrt(v + eps) * gamma + beta).reshape(B, V, F)

    def bn_1d(y2, gamma, beta):           # BatchNorm1d(D): per-channel over B
        m = jnp.mean(y2, axis=0)
        v = jnp.mean((y2 - m) ** 2, axis=0)
        return (y2 - m) / jnp.sqrt(v + eps) * gamma + beta

    res = feat.reshape(B, D)

    # Attention
    xn = bn_point(feat, params["att_bn_gamma"], params["att_bn_beta"])
    q = jnp.einsum("ij,bjf->bif", params["att_wq"], xn, precision=hi)
    v = (jnp.einsum("ij,bjf->bif", params["att_wv"], xn, precision=hi)
         + params["att_bv"][None, :, None])
    energy = jnp.einsum("bvf,bvg->bfg", q, q, precision=hi)   # k == q (shared)
    attn = jax.nn.softmax(energy, axis=-1)
    attn = attn / (1e-9 + jnp.sum(attn, axis=1, keepdims=True))
    ksa = jnp.einsum("bvf,bfg->bvg", v, attn, precision=hi)
    att = xn + ksa

    # Adapter
    g1 = bn_point(att * params["fusion_ratio"][None, :, None],
                  params["g1_bn_gamma"], params["g1_bn_beta"]).reshape(B, D)
    g2 = jnp.dot(g1, params["g_lin_w"].T, precision=hi) + params["g_lin_b"]
    g4 = jax.nn.relu(bn_1d(g2, params["g2_bn_gamma"], params["g2_bn_beta"]))

    n1 = bn_point(att * params["fusion_ratio_res"][None, :, None],
                  params["n1_bn_gamma"], params["n1_bn_beta"]).reshape(B, D)
    n2 = bn_1d(n1, params["n2_bn_gamma"], params["n2_bn_beta"])

    gf = g4 * adapter_ratio + n2 * (1.0 - adapter_ratio)

    h = bn_1d(gf, params["v0_bn_gamma"], params["v0_bn_beta"])
    h = jax.nn.relu(jnp.dot(h, params["v_lin1_w"].T, precision=hi) + params["v_lin1_b"])
    h = jax.nn.relu(jnp.dot(h, params["v_lin2_w"].T, precision=hi) + params["v_lin2_b"])

    out = h * adapter_ratio + res * (1.0 - adapter_ratio)
    return out.reshape(B * V, F)


if __name__ == "__main__":
    B, V, F = 2, 8, 32            # batch, mesh_views, in_features
    D = V * F
    ADAPTER_RATIO = 0.6
    EPS = 1e-5

    kit = iter(jax.random.split(jax.random.PRNGKey(0), 32))
    nrm = lambda shape, s: jax.random.normal(next(kit), shape, jnp.float32) * s

    params = {
        # Attention (q_conv.weight == k_conv.weight, both bias-free)
        "att_wq": nrm((V, V), 0.1),
        "att_wv": nrm((V, V), 0.1),
        "att_bv": nrm((V,), 0.1),
        "att_bn_gamma": 1.0 + nrm((F,), 0.1),
        "att_bn_beta": nrm((F,), 0.1),
        # fusion ratios (module init 0.5, perturbed to exercise the path)
        "fusion_ratio": 0.5 + nrm((V,), 0.1),
        "fusion_ratio_res": 0.5 + nrm((V,), 0.1),
        # global_f
        "g1_bn_gamma": 1.0 + nrm((F,), 0.1),
        "g1_bn_beta": nrm((F,), 0.1),
        "g_lin_w": nrm((D, D), 0.05),
        "g_lin_b": nrm((D,), 0.05),
        "g2_bn_gamma": 1.0 + nrm((D,), 0.1),
        "g2_bn_beta": nrm((D,), 0.1),
        # norm
        "n1_bn_gamma": 1.0 + nrm((F,), 0.1),
        "n1_bn_beta": nrm((F,), 0.1),
        "n2_bn_gamma": 1.0 + nrm((D,), 0.1),
        "n2_bn_beta": nrm((D,), 0.1),
        # view_f
        "v0_bn_gamma": 1.0 + nrm((D,), 0.1),
        "v0_bn_beta": nrm((D,), 0.1),
        "v_lin1_w": nrm((D, D), 0.05),
        "v_lin1_b": nrm((D,), 0.05),
        "v_lin2_w": nrm((D, D), 0.05),
        "v_lin2_b": nrm((D,), 0.05),
    }

    feat = jax.random.normal(next(kit), (B, V, F), jnp.float32)

    # One-time parameter preparation (hoisted out of the per-call hot path).
    kp = prepare_adapter_params(params, batch=B, views=V, feat=F)

    fwd = jax.jit(functools.partial(adapter_forward,
                                    adapter_ratio=ADAPTER_RATIO, eps=EPS))
    out = jax.block_until_ready(fwd(feat, kp))

    ref = adapter_reference(feat, params, adapter_ratio=ADAPTER_RATIO, eps=EPS)
    assert out.shape == (B * V, F)
    assert jnp.allclose(out, ref, atol=2e-3, rtol=2e-3), (
        "mismatch vs reference: max abs diff "
        f"{float(jnp.max(jnp.abs(out - ref)))}")

    print("KERNEL_OK")
</pallas_src>

<mosaic_0001>
module attributes {stable_mosaic.version = 11 : i64} {
  func.func @_adapter_fused_kernel(%arg0: memref<16x32xf32, #tpu.memory_space<vmem>>, %arg1: memref<2x256xf32, #tpu.memory_space<vmem>>, %arg2: memref<1x32xf32, #tpu.memory_space<vmem>>, %arg3: memref<1x32xf32, #tpu.memory_space<vmem>>, %arg4: memref<16x16xf32, #tpu.memory_space<vmem>>, %arg5: memref<16x16xf32, #tpu.memory_space<vmem>>, %arg6: memref<16x32xf32, #tpu.memory_space<vmem>>, %arg7: memref<8x32xf32, #tpu.memory_space<vmem>>, %arg8: memref<1x32xf32, #tpu.memory_space<vmem>>, %arg9: memref<1x32xf32, #tpu.memory_space<vmem>>, %arg10: memref<8x32xf32, #tpu.memory_space<vmem>>, %arg11: memref<1x32xf32, #tpu.memory_space<vmem>>, %arg12: memref<1x32xf32, #tpu.memory_space<vmem>>, %arg13: memref<256x256xf32, #tpu.memory_space<vmem>>, %arg14: memref<1x256xf32, #tpu.memory_space<vmem>>, %arg15: memref<1x256xf32, #tpu.memory_space<vmem>>, %arg16: memref<1x256xf32, #tpu.memory_space<vmem>>, %arg17: memref<1x256xf32, #tpu.memory_space<vmem>>, %arg18: memref<1x256xf32, #tpu.memory_space<vmem>>, %arg19: memref<1x256xf32, #tpu.memory_space<vmem>>, %arg20: memref<1x256xf32, #tpu.memory_space<vmem>>, %arg21: memref<256x256xf32, #tpu.memory_space<vmem>>, %arg22: memref<1x256xf32, #tpu.memory_space<vmem>>, %arg23: memref<256x256xf32, #tpu.memory_space<vmem>>, %arg24: memref<1x256xf32, #tpu.memory_space<vmem>>, %arg25: memref<2x256xf32, #tpu.memory_space<vmem>>) attributes {dimension_semantics = [], scalar_prefetch = 0 : i64, scratch_operands = 0 : i64, tpu.core_type = #tpu.core_type<tc>} {
    %c0 = arith.constant 0 : index
    %c0_0 = arith.constant 0 : index
    %0 = vector.load %arg0[%c0, %c0_0] : memref<16x32xf32, #tpu.memory_space<vmem>>, vector<16x32xf32>
    %cst = arith.constant dense<0.000000e+00> : vector<32xf32>
    %1 = vector.multi_reduction <add>, %0, %cst [0] : vector<16x32xf32> to vector<32xf32>
    %2 = vector.shape_cast %1 : vector<32xf32> to vector<1x32xf32>
    %cst_1 = arith.constant 6.250000e-02 : f32
    %3 = vector.broadcast %cst_1 : f32 to vector<1x32xf32>
    %4 = arith.mulf %2, %3 : vector<1x32xf32>
    %5 = vector.broadcast %4 : vector<1x32xf32> to vector<16x32xf32>
    %6 = arith.subf %0, %5 : vector<16x32xf32>
    %7 = arith.mulf %6, %6 : vector<16x32xf32>
    %cst_2 = arith.constant dense<0.000000e+00> : vector<32xf32>
    %8 = vector.multi_reduction <add>, %7, %cst_2 [0] : vector<16x32xf32> to vector<32xf32>
    %9 = vector.shape_cast %8 : vector<32xf32> to vector<1x32xf32>
    %cst_3 = arith.constant 6.250000e-02 : f32
    %10 = vector.broadcast %cst_3 : f32 to vector<1x32xf32>
    %11 = arith.mulf %9, %10 : vector<1x32xf32>
    %c0_4 = arith.constant 0 : index
    %c0_5 = arith.constant 0 : index
    %12 = vector.load %arg2[%c0_4, %c0_5] : memref<1x32xf32, #tpu.memory_space<vmem>>, vector<1x32xf32>
    %cst_6 = arith.constant 9.99999974E-6 : f32
    %13 = vector.broadcast %cst_6 : f32 to vector<1x32xf32>
    %14 = arith.addf %11, %13 : vector<1x32xf32>
    %15 = math.rsqrt %14 : vector<1x32xf32>
    %16 = arith.mulf %12, %15 : vector<1x32xf32>
    %17 = vector.broadcast %16 : vector<1x32xf32> to vector<16x32xf32>
    %18 = arith.mulf %6, %17 : vector<16x32xf32>
    %c0_7 = arith.constant 0 : index
    %c0_8 = arith.constant 0 : index
    %19 = vector.load %arg3[%c0_7, %c0_8] : memref<1x32xf32, #tpu.memory_space<vmem>>, vector<1x32xf32>
    %20 = vector.broadcast %19 : vector<1x32xf32> to vector<16x32xf32>
    %21 = arith.addf %18, %20 : vector<16x32xf32>
    %c0_9 = arith.constant 0 : index
    %c0_10 = arith.constant 0 : index
    %22 = vector.load %arg4[%c0_9, %c0_10] : memref<16x16xf32, #tpu.memory_space<vmem>>, vector<16x16xf32>
    %cst_11 = arith.constant dense<0.000000e+00> : vector<16x32xf32>
    %23 = tpu.matmul %22, %21, %cst_11 {dimension_numbers = #tpu.dot_dimension_numbers<[1], [0], [0], [1], [0, 0, 1, 1], [], []>} : vector<16x16xf32>, vector<16x32xf32>, vector<16x32xf32> -> vector<16x32xf32>
    %c0_12 = arith.constant 0 : index
    %c0_13 = arith.constant 0 : index
    %24 = vector.load %arg5[%c0_12, %c0_13] : memref<16x16xf32, #tpu.memory_space<vmem>>, vector<16x16xf32>
    %cst_14 = arith.constant dense<0.000000e+00> : vector<16x32xf32>
    %25 = tpu.matmul %24, %21, %cst_14 {dimension_numbers = #tpu.dot_dimension_numbers<[1], [0], [0], [1], [0, 0, 1, 1], [], []>} : vector<16x16xf32>, vector<16x32xf32>, vector<16x32xf32> -> vector<16x32xf32>
    %c0_15 = arith.constant 0 : index
    %c0_16 = arith.constant 0 : index
    %26 = vector.load %arg6[%c0_15, %c0_16] : memref<16x32xf32, #tpu.memory_space<vmem>>, vector<16x32xf32>
    %27 = arith.addf %25, %26 : vector<16x32xf32>
    %28 = vector.extract_strided_slice %23 {offsets = [0, 0], sizes = [8, 32], strides = [1, 1]} : vector<16x32xf32> to vector<8x32xf32>
    %29 = vector.extract_strided_slice %27 {offsets = [0, 0], sizes = [8, 32], strides = [1, 1]} : vector<16x32xf32> to vector<8x32xf32>
    %cst_17 = arith.constant dense<0.000000e+00> : vector<32x32xf32>
    %30 = tpu.matmul %28, %28, %cst_17 {dimension_numbers = #tpu.dot_dimension_numbers<[0], [0], [1], [1], [0, 1, 1, 1], [], []>} : vector<8x32xf32>, vector<8x32xf32>, vector<32x32xf32> -> vector<32x32xf32>
    %cst_18 = arith.constant dense<0xFF800000> : vector<32xf32>
    %31 = vector.multi_reduction <maximumf>, %30, %cst_18 [1] : vector<32x32xf32> to vector<32xf32>
    %32 = vector.shape_cast %31 : vector<32xf32> to vector<32x1xf32>
    %33 = vector.broadcast %32 : vector<32x1xf32> to vector<32x32xf32>
    %34 = arith.subf %30, %33 : vector<32x32xf32>
    %35 = math.exp %34 : vector<32x32xf32>
    %cst_19 = arith.constant dense<0.000000e+00> : vector<32xf32>
    %36 = vector.multi_reduction <add>, %35, %cst_19 [1] : vector<32x32xf32> to vector<32xf32>
    %37 = vector.shape_cast %36 : vector<32xf32> to vector<32x1xf32>
    %38 = tpu.reciprocal %37 : vector<32x1xf32> -> vector<32x1xf32>
    %39 = vector.broadcast %38 : vector<32x1xf32> to vector<32x32xf32>
    %40 = arith.mulf %35, %39 : vector<32x32xf32>
    %cst_20 = arith.constant dense<0.000000e+00> : vector<32xf32>
    %41 = vector.multi_reduction <add>, %40, %cst_20 [0] : vector<32x32xf32> to vector<32xf32>
    %42 = vector.shape_cast %41 : vector<32xf32> to vector<1x32xf32>
    %cst_21 = arith.constant 9.99999971E-10 : f32
    %43 = vector.broadcast %cst_21 : f32 to vector<1x32xf32>
    %44 = arith.addf %43, %42 : vector<1x32xf32>
    %45 = tpu.reciprocal %44 : vector<1x32xf32> -> vector<1x32xf32>
    %46 = vector.broadcast %45 : vector<1x32xf32> to vector<32x32xf32>
    %47 = arith.mulf %40, %46 : vector<32x32xf32>
    %cst_22 = arith.constant dense<0.000000e+00> : vector<8x32xf32>
    %48 = tpu.matmul %29, %47, %cst_22 {dimension_numbers = #tpu.dot_dimension_numbers<[1], [0], [0], [1], [0, 0, 1, 1], [], []>} : vector<8x32xf32>, vector<32x32xf32>, vector<8x32xf32> -> vector<8x32xf32>
    %49 = vector.extract_strided_slice %21 {offsets = [0, 0], sizes = [8, 32], strides = [1, 1]} : vector<16x32xf32> to vector<8x32xf32>
    %50 = arith.addf %49, %48 : vector<8x32xf32>
    %51 = vector.extract_strided_slice %23 {offsets = [8, 0], sizes = [8, 32], strides = [1, 1]} : vector<16x32xf32> to vector<8x32xf32>
    %52 = vector.extract_strided_slice %27 {offsets = [8, 0], sizes = [8, 32], strides = [1, 1]} : vector<16x32xf32> to vector<8x32xf32>
    %cst_23 = arith.constant dense<0.000000e+00> : vector<32x32xf32>
    %53 = tpu.matmul %51, %51, %cst_23 {dimension_numbers = #tpu.dot_dimension_numbers<[0], [0], [1], [1], [0, 1, 1, 1], [], []>} : vector<8x32xf32>, vector<8x32xf32>, vector<32x32xf32> -> vector<32x32xf32>
    %cst_24 = arith.constant dense<0xFF800000> : vector<32xf32>
    %54 = vector.multi_reduction <maximumf>, %53, %cst_24 [1] : vector<32x32xf32> to vector<32xf32>
    %55 = vector.shape_cast %54 : vector<32xf32> to vector<32x1xf32>
    %56 = vector.broadcast %55 : vector<32x1xf32> to vector<32x32xf32>
    %57 = arith.subf %53, %56 : vector<32x32xf32>
    %58 = math.exp %57 : vector<32x32xf32>
    %cst_25 = arith.constant dense<0.000000e+00> : vector<32xf32>
    %59 = vector.multi_reduction <add>, %58, %cst_25 [1] : vector<32x32xf32> to vector<32xf32>
    %60 = vector.shape_cast %59 : vector<32xf32> to vector<32x1xf32>
    %61 = tpu.reciprocal %60 : vector<32x1xf32> -> vector<32x1xf32>
    %62 = vector.broadcast %61 : vector<32x1xf32> to vector<32x32xf32>
    %63 = arith.mulf %58, %62 : vector<32x32xf32>
    %cst_26 = arith.constant dense<0.000000e+00> : vector<32xf32>
    %64 = vector.multi_reduction <add>, %63, %cst_26 [0] : vector<32x32xf32> to vector<32xf32>
    %65 = vector.shape_cast %64 : vector<32xf32> to vector<1x32xf32>
    %cst_27 = arith.constant 9.99999971E-10 : f32
    %66 = vector.broadcast %cst_27 : f32 to vector<1x32xf32>
    %67 = arith.addf %66, %65 : vector<1x32xf32>
    %68 = tpu.reciprocal %67 : vector<1x32xf32> -> vector<1x32xf32>
    %69 = vector.broadcast %68 : vector<1x32xf32> to vector<32x32xf32>
    %70 = arith.mulf %63, %69 : vector<32x32xf32>
    %cst_28 = arith.constant dense<0.000000e+00> : vector<8x32xf32>
    %71 = tpu.matmul %52, %70, %cst_28 {dimension_numbers = #tpu.dot_dimension_numbers<[1], [0], [0], [1], [0, 0, 1, 1], [], []>} : vector<8x32xf32>, vector<32x32xf32>, vector<8x32xf32> -> vector<8x32xf32>
    %72 = vector.extract_strided_slice %21 {offsets = [8, 0], sizes = [8, 32], strides = [1, 1]} : vector<16x32xf32> to vector<8x32xf32>
    %73 = arith.addf %72, %71 : vector<8x32xf32>
    %c0_29 = arith.constant 0 : index
    %c0_30 = arith.constant 0 : index
    %74 = vector.load %arg7[%c0_29, %c0_30] : memref<8x32xf32, #tpu.memory_space<vmem>>, vector<8x32xf32>
    %c0_31 = arith.constant 0 : index
    %c0_32 = arith.constant 0 : index
    %75 = vector.load %arg8[%c0_31, %c0_32] : memref<1x32xf32, #tpu.memory_space<vmem>>, vector<1x32xf32>
    %c0_33 = arith.constant 0 : index
    %c0_34 = arith.constant 0 : index
    %76 = vector.load %arg9[%c0_33, %c0_34] : memref<1x32xf32, #tpu.memory_space<vmem>>, vector<1x32xf32>
    %77 = arith.mulf %50, %74 : vector<8x32xf32>
    %78 = arith.mulf %73, %74 : vector<8x32xf32>
    %cst_35 = arith.constant dense<0.000000e+00> : vector<32xf32>
    %79 = vector.multi_reduction <add>, %77, %cst_35 [0] : vector<8x32xf32> to vector<32xf32>
    %80 = vector.shape_cast %79 : vector<32xf32> to vector<1x32xf32>
    %cst_36 = arith.constant 0.000000e+00 : f32
    %81 = vector.broadcast %cst_36 : f32 to vector<1x32xf32>
    %82 = arith.addf %81, %80 : vector<1x32xf32>
    %cst_37 = arith.constant dense<0.000000e+00> : vector<32xf32>
    %83 = vector.multi_reduction <add>, %78, %cst_37 [0] : vector<8x32xf32> to vector<32xf32>
    %84 = vector.shape_cast %83 : vector<32xf32> to vector<1x32xf32>
    %85 = arith.addf %82, %84 : vector<1x32xf32>
    %cst_38 = arith.constant 6.250000e-02 : f32
    %86 = vector.broadcast %cst_38 : f32 to vector<1x32xf32>
    %87 = arith.mulf %85, %86 : vector<1x32xf32>
    %88 = vector.broadcast %87 : vector<1x32xf32> to vector<8x32xf32>
    %89 = arith.subf %77, %88 : vector<8x32xf32>
    %90 = vector.broadcast %87 : vector<1x32xf32> to vector<8x32xf32>
    %91 = arith.subf %78, %90 : vector<8x32xf32>
    %92 = arith.mulf %89, %89 : vector<8x32xf32>
    %cst_39 = arith.constant dense<0.000000e+00> : vector<32xf32>
    %93 = vector.multi_reduction <add>, %92, %cst_39 [0] : vector<8x32xf32> to vector<32xf32>
    %94 = vector.shape_cast %93 : vector<32xf32> to vector<1x32xf32>
    %cst_40 = arith.constant 0.000000e+00 : f32
    %95 = vector.broadcast %cst_40 : f32 to vector<1x32xf32>
    %96 = arith.addf %95, %94 : vector<1x32xf32>
    %97 = arith.mulf %91, %91 : vector<8x32xf32>
    %cst_41 = arith.constant dense<0.000000e+00> : vector<32xf32>
    %98 = vector.multi_reduction <add>, %97, %cst_41 [0] : vector<8x32xf32> to vector<32xf32>
    %99 = vector.shape_cast %98 : vector<32xf32> to vector<1x32xf32>
    %100 = arith.addf %96, %99 : vector<1x32xf32>
    %cst_42 = arith.constant 6.250000e-02 : f32
    %101 = vector.broadcast %cst_42 : f32 to vector<1x32xf32>
    %102 = arith.mulf %100, %101 : vector<1x32xf32>
    %cst_43 = arith.constant 9.99999974E-6 : f32
    %103 = vector.broadcast %cst_43 : f32 to vector<1x32xf32>
    %104 = arith.addf %102, %103 : vector<1x32xf32>
    %105 = math.rsqrt %104 : vector<1x32xf32>
    %106 = arith.mulf %75, %105 : vector<1x32xf32>
    %107 = vector.broadcast %106 : vector<1x32xf32> to vector<8x32xf32>
    %108 = arith.mulf %89, %107 : vector<8x32xf32>
    %109 = vector.broadcast %76 : vector<1x32xf32> to vector<8x32xf32>
    %110 = arith.addf %108, %109 : vector<8x32xf32>
    %111 = vector.broadcast %106 : vector<1x32xf32> to vector<8x32xf32>
    %112 = arith.mulf %91, %111 : vector<8x32xf32>
    %113 = vector.broadcast %76 : vector<1x32xf32> to vector<8x32xf32>
    %114 = arith.addf %112, %113 : vector<8x32xf32>
    %c0_44 = arith.constant 0 : index
    %c0_45 = arith.constant 0 : index
    %115 = vector.load %arg10[%c0_44, %c0_45] : memref<8x32xf32, #tpu.memory_space<vmem>>, vector<8x32xf32>
    %c0_46 = arith.constant 0 : index
    %c0_47 = arith.constant 0 : index
    %116 = vector.load %arg11[%c0_46, %c0_47] : memref<1x32xf32, #tpu.memory_space<vmem>>, vector<1x32xf32>
    %c0_48 = arith.constant 0 : index
    %c0_49 = arith.constant 0 : index
    %117 = vector.load %arg12[%c0_48, %c0_49] : memref<1x32xf32, #tpu.memory_space<vmem>>, vector<1x32xf32>
    %118 = arith.mulf %50, %115 : vector<8x32xf32>
    %119 = arith.mulf %73, %115 : vector<8x32xf32>
    %cst_50 = arith.constant dense<0.000000e+00> : vector<32xf32>
    %120 = vector.multi_reduction <add>, %118, %cst_50 [0] : vector<8x32xf32> to vector<32xf32>
    %121 = vector.shape_cast %120 : vector<32xf32> to vector<1x32xf32>
    %cst_51 = arith.constant 0.000000e+00 : f32
    %122 = vector.broadcast %cst_51 : f32 to vector<1x32xf32>
    %123 = arith.addf %122, %121 : vector<1x32xf32>
    %cst_52 = arith.constant dense<0.000000e+00> : vector<32xf32>
    %124 = vector.multi_reduction <add>, %119, %cst_52 [0] : vector<8x32xf32> to vector<32xf32>
    %125 = vector.shape_cast %124 : vector<32xf32> to vector<1x32xf32>
    %126 = arith.addf %123, %125 : vector<1x32xf32>
    %cst_53 = arith.constant 6.250000e-02 : f32
    %127 = vector.broadcast %cst_53 : f32 to vector<1x32xf32>
    %128 = arith.mulf %126, %127 : vector<1x32xf32>
    %129 = vector.broadcast %128 : vector<1x32xf32> to vector<8x32xf32>
    %130 = arith.subf %118, %129 : vector<8x32xf32>
    %131 = vector.broadcast %128 : vector<1x32xf32> to vector<8x32xf32>
    %132 = arith.subf %119, %131 : vector<8x32xf32>
    %133 = arith.mulf %130, %130 : vector<8x32xf32>
    %cst_54 = arith.constant dense<0.000000e+00> : vector<32xf32>
    %134 = vector.multi_reduction <add>, %133, %cst_54 [0] : vector<8x32xf32> to vector<32xf32>
    %135 = vector.shape_cast %134 : vector<32xf32> to vector<1x32xf32>
    %cst_55 = arith.constant 0.000000e+00 : f32
    %136 = vector.broadcast %cst_55 : f32 to vector<1x32xf32>
    %137 = arith.addf %136, %135 : vector<1x32xf32>
    %138 = arith.mulf %132, %132 : vector<8x32xf32>
    %cst_56 = arith.constant dense<0.000000e+00> : vector<32xf32>
    %139 = vector.multi_reduction <add>, %138, %cst_56 [0] : vector<8x32xf32> to vector<32xf32>
    %140 = vector.shape_cast %139 : vector<32xf32> to vector<1x32xf32>
    %141 = arith.addf %137, %140 : vector<1x32xf32>
    %cst_57 = arith.constant 6.250000e-02 : f32
    %142 = vector.broadcast %cst_57 : f32 to vector<1x32xf32>
    %143 = arith.mulf %141, %142 : vector<1x32xf32>
    %cst_58 = arith.constant 9.99999974E-6 : f32
    %144 = vector.broadcast %cst_58 : f32 to vector<1x32xf32>
    %145 = arith.addf %143, %144 : vector<1x32xf32>
    %146 = math.rsqrt %145 : vector<1x32xf32>
    %147 = arith.mulf %116, %146 : vector<1x32xf32>
    %148 = vector.broadcast %147 : vector<1x32xf32> to vector<8x32xf32>
    %149 = arith.mulf %130, %148 : vector<8x32xf32>
    %150 = vector.broadcast %117 : vector<1x32xf32> to vector<8x32xf32>
    %151 = arith.addf %149, %150 : vector<8x32xf32>
    %152 = vector.broadcast %147 : vector<1x32xf32> to vector<8x32xf32>
    %153 = arith.mulf %132, %152 : vector<8x32xf32>
    %154 = vector.broadcast %117 : vector<1x32xf32> to vector<8x32xf32>
    %155 = arith.addf %153, %154 : vector<8x32xf32>
    %156 = tpu.iota {dimensions = array<i32: 0>} : vector<32x256xi32>
    %157 = tpu.iota {dimensions = array<i32: 1>} : vector<32x256xi32>
    %158 = arith.subi %157, %156 : vector<32x256xi32>
    %cst_59 = arith.constant 0.000000e+00 : f32
    %159 = vector.broadcast %cst_59 : f32 to vector<4x256xf32>
    %160 = vector.extract_strided_slice %110 {offsets = [0, 0], sizes = [1, 32], strides = [1, 1]} : vector<8x32xf32> to vector<1x32xf32>
    %161 = vector.extract_strided_slice %114 {offsets = [0, 0], sizes = [1, 32], strides = [1, 1]} : vector<8x32xf32> to vector<1x32xf32>
    %162 = vector.extract_strided_slice %151 {offsets = [0, 0], sizes = [1, 32], strides = [1, 1]} : vector<8x32xf32> to vector<1x32xf32>
    %163 = vector.extract_strided_slice %155 {offsets = [0, 0], sizes = [1, 32], strides = [1, 1]} : vector<8x32xf32> to vector<1x32xf32>
    %164 = tpu.concatenate %160, %161, %162, %163 in 0 : vector<1x32xf32>, vector<1x32xf32>, vector<1x32xf32>, vector<1x32xf32> -> vector<4x32xf32>
    %c0_i32 = arith.constant 0 : i32
    %165 = vector.broadcast %c0_i32 : i32 to vector<32x256xi32>
    %166 = arith.cmpi eq, %158, %165 : vector<32x256xi32>
    %167 = arith.extui %166 : vector<32x256xi1> to vector<32x256xi32>
    %168 = arith.sitofp %167 : vector<32x256xi32> to vector<32x256xf32>
    %cst_60 = arith.constant dense<0.000000e+00> : vector<4x256xf32>
    %169 = tpu.matmul %164, %168, %cst_60 {dimension_numbers = #tpu.dot_dimension_numbers<[1], [0], [0], [1], [0, 0, 1, 1], [], []>} : vector<4x32xf32>, vector<32x256xf32>, vector<4x256xf32> -> vector<4x256xf32>
    %170 = arith.addf %159, %169 : vector<4x256xf32>
    %171 = vector.extract_strided_slice %110 {offsets = [1, 0], sizes = [1, 32], strides = [1, 1]} : vector<8x32xf32> to vector<1x32xf32>
    %172 = vector.extract_strided_slice %114 {offsets = [1, 0], sizes = [1, 32], strides = [1, 1]} : vector<8x32xf32> to vector<1x32xf32>
    %173 = vector.extract_strided_slice %151 {offsets = [1, 0], sizes = [1, 32], strides = [1, 1]} : vector<8x32xf32> to vector<1x32xf32>
    %174 = vector.extract_strided_slice %155 {offsets = [1, 0], sizes = [1, 32], strides = [1, 1]} : vector<8x32xf32> to vector<1x32xf32>
    %175 = tpu.concatenate %171, %172, %173, %174 in 0 : vector<1x32xf32>, vector<1x32xf32>, vector<1x32xf32>, vector<1x32xf32> -> vector<4x32xf32>
    %c32_i32 = arith.constant 32 : i32
    %176 = vector.broadcast %c32_i32 : i32 to vector<32x256xi32>
    %177 = arith.cmpi eq, %158, %176 : vector<32x256xi32>
    %178 = arith.extui %177 : vector<32x256xi1> to vector<32x256xi32>
    %179 = arith.sitofp %178 : vector<32x256xi32> to vector<32x256xf32>
    %cst_61 = arith.constant dense<0.000000e+00> : vector<4x256xf32>
    %180 = tpu.matmul %175, %179, %cst_61 {dimension_numbers = #tpu.dot_dimension_numbers<[1], [0], [0], [1], [0, 0, 1, 1], [], []>} : vector<4x32xf32>, vector<32x256xf32>, vector<4x256xf32> -> vector<4x256xf32>
    %181 = arith.addf %170, %180 : vector<4x256xf32>
    %182 = vector.extract_strided_slice %110 {offsets = [2, 0], sizes = [1, 32], strides = [1, 1]} : vector<8x32xf32> to vector<1x32xf32>
    %183 = vector.extract_strided_slice %114 {offsets = [2, 0], sizes = [1, 32], strides = [1, 1]} : vector<8x32xf32> to vector<1x32xf32>
    %184 = vector.extract_strided_slice %151 {offsets = [2, 0], sizes = [1, 32], strides = [1, 1]} : vector<8x32xf32> to vector<1x32xf32>
    %185 = vector.extract_strided_slice %155 {offsets = [2, 0], sizes = [1, 32], strides = [1, 1]} : vector<8x32xf32> to vector<1x32xf32>
    %186 = tpu.concatenate %182, %183, %184, %185 in 0 : vector<1x32xf32>, vector<1x32xf32>, vector<1x32xf32>, vector<1x32xf32> -> vector<4x32xf32>
    %c64_i32 = arith.constant 64 : i32
    %187 = vector.broadcast %c64_i32 : i32 to vector<32x256xi32>
    %188 = arith.cmpi eq, %158, %187 : vector<32x256xi32>
    %189 = arith.extui %188 : vector<32x256xi1> to vector<32x256xi32>
    %190 = arith.sitofp %189 : vector<32x256xi32> to vector<32x256xf32>
    %cst_62 = arith.constant dense<0.000000e+00> : vector<4x256xf32>
    %191 = tpu.matmul %186, %190, %cst_62 {dimension_numbers = #tpu.dot_dimension_numbers<[1], [0], [0], [1], [0, 0, 1, 1], [], []>} : vector<4x32xf32>, vector<32x256xf32>, vector<4x256xf32> -> vector<4x256xf32>
    %192 = arith.addf %181, %191 : vector<4x256xf32>
    %193 = vector.extract_strided_slice %110 {offsets = [3, 0], sizes = [1, 32], strides = [1, 1]} : vector<8x32xf32> to vector<1x32xf32>
    %194 = vector.extract_strided_slice %114 {offsets = [3, 0], sizes = [1, 32], strides = [1, 1]} : vector<8x32xf32> to vector<1x32xf32>
    %195 = vector.extract_strided_slice %151 {offsets = [3, 0], sizes = [1, 32], strides = [1, 1]} : vector<8x32xf32> to vector<1x32xf32>
    %196 = vector.extract_strided_slice %155 {offsets = [3, 0], sizes = [1, 32], strides = [1, 1]} : vector<8x32xf32> to vector<1x32xf32>
    %197 = tpu.concatenate %193, %194, %195, %196 in 0 : vector<1x32xf32>, vector<1x32xf32>, vector<1x32xf32>, vector<1x32xf32> -> vector<4x32xf32>
    %c96_i32 = arith.constant 96 : i32
    %198 = vector.broadcast %c96_i32 : i32 to vector<32x256xi32>
    %199 = arith.cmpi eq, %158, %198 : vector<32x256xi32>
    %200 = arith.extui %199 : vector<32x256xi1> to vector<32x256xi32>
    %201 = arith.sitofp %200 : vector<32x256xi32> to vector<32x256xf32>
    %cst_63 = arith.constant dense<0.000000e+00> : vector<4x256xf32>
    %202 = tpu.matmul %197, %201, %cst_63 {dimension_numbers = #tpu.dot_dimension_numbers<[1], [0], [0], [1], [0, 0, 1, 1], [], []>} : vector<4x32xf32>, vector<32x256xf32>, vector<4x256xf32> -> vector<4x256xf32>
    %203 = arith.addf %192, %202 : vector<4x256xf32>
    %204 = vector.extract_strided_slice %110 {offsets = [4, 0], sizes = [1, 32], strides = [1, 1]} : vector<8x32xf32> to vector<1x32xf32>
    %205 = vector.extract_strided_slice %114 {offsets = [4, 0], sizes = [1, 32], strides = [1, 1]} : vector<8x32xf32> to vector<1x32xf32>
    %206 = vector.extract_strided_slice %151 {offsets = [4, 0], sizes = [1, 32], strides = [1, 1]} : vector<8x32xf32> to vector<1x32xf32>
    %207 = vector.extract_strided_slice %155 {offsets = [4, 0], sizes = [1, 32], strides = [1, 1]} : vector<8x32xf32> to vector<1x32xf32>
    %208 = tpu.concatenate %204, %205, %206, %207 in 0 : vector<1x32xf32>, vector<1x32xf32>, vector<1x32xf32>, vector<1x32xf32> -> vector<4x32xf32>
    %c128_i32 = arith.constant 128 : i32
    %209 = vector.broadcast %c128_i32 : i32 to vector<32x256xi32>
    %210 = arith.cmpi eq, %158, %209 : vector<32x256xi32>
    %211 = arith.extui %210 : vector<32x256xi1> to vector<32x256xi32>
    %212 = arith.sitofp %211 : vector<32x256xi32> to vector<32x256xf32>
    %cst_64 = arith.constant dense<0.000000e+00> : vector<4x256xf32>
    %213 = tpu.matmul %208, %212, %cst_64 {dimension_numbers = #tpu.dot_dimension_numbers<[1], [0], [0], [1], [0, 0, 1, 1], [], []>} : vector<4x32xf32>, vector<32x256xf32>, vector<4x256xf32> -> vector<4x256xf32>
    %214 = arith.addf %203, %213 : vector<4x256xf32>
    %215 = vector.extract_strided_slice %110 {offsets = [5, 0], sizes = [1, 32], strides = [1, 1]} : vector<8x32xf32> to vector<1x32xf32>
    %216 = vector.extract_strided_slice %114 {offsets = [5, 0], sizes = [1, 32], strides = [1, 1]} : vector<8x32xf32> to vector<1x32xf32>
    %217 = vector.extract_strided_slice %151 {offsets = [5, 0], sizes = [1, 32], strides = [1, 1]} : vector<8x32xf32> to vector<1x32xf32>
    %218 = vector.extract_strided_slice %155 {offsets = [5, 0], sizes = [1, 32], strides = [1, 1]} : vector<8x32xf32> to vector<1x32xf32>
    %219 = tpu.concatenate %215, %216, %217, %218 in 0 : vector<1x32xf32>, vector<1x32xf32>, vector<1x32xf32>, vector<1x32xf32> -> vector<4x32xf32>
    %c160_i32 = arith.constant 160 : i32
    %220 = vector.broadcast %c160_i32 : i32 to vector<32x256xi32>
    %221 = arith.cmpi eq, %158, %220 : vector<32x256xi32>
    %222 = arith.extui %221 : vector<32x256xi1> to vector<32x256xi32>
    %223 = arith.sitofp %222 : vector<32x256xi32> to vector<32x256xf32>
    %cst_65 = arith.constant dense<0.000000e+00> : vector<4x256xf32>
    %224 = tpu.matmul %219, %223, %cst_65 {dimension_numbers = #tpu.dot_dimension_numbers<[1], [0], [0], [1], [0, 0, 1, 1], [], []>} : vector<4x32xf32>, vector<32x256xf32>, vector<4x256xf32> -> vector<4x256xf32>
    %225 = arith.addf %214, %224 : vector<4x256xf32>
    %226 = vector.extract_strided_slice %110 {offsets = [6, 0], sizes = [1, 32], strides = [1, 1]} : vector<8x32xf32> to vector<1x32xf32>
    %227 = vector.extract_strided_slice %114 {offsets = [6, 0], sizes = [1, 32], strides = [1, 1]} : vector<8x32xf32> to vector<1x32xf32>
    %228 = vector.extract_strided_slice %151 {offsets = [6, 0], sizes = [1, 32], strides = [1, 1]} : vector<8x32xf32> to vector<1x32xf32>
    %229 = vector.extract_strided_slice %155 {offsets = [6, 0], sizes = [1, 32], strides = [1, 1]} : vector<8x32xf32> to vector<1x32xf32>
    %230 = tpu.concatenate %226, %227, %228, %229 in 0 : vector<1x32xf32>, vector<1x32xf32>, vector<1x32xf32>, vector<1x32xf32> -> vector<4x32xf32>
    %c192_i32 = arith.constant 192 : i32
    %231 = vector.broadcast %c192_i32 : i32 to vector<32x256xi32>
    %232 = arith.cmpi eq, %158, %231 : vector<32x256xi32>
    %233 = arith.extui %232 : vector<32x256xi1> to vector<32x256xi32>
    %234 = arith.sitofp %233 : vector<32x256xi32> to vector<32x256xf32>
    %cst_66 = arith.constant dense<0.000000e+00> : vector<4x256xf32>
    %235 = tpu.matmul %230, %234, %cst_66 {dimension_numbers = #tpu.dot_dimension_numbers<[1], [0], [0], [1], [0, 0, 1, 1], [], []>} : vector<4x32xf32>, vector<32x256xf32>, vector<4x256xf32> -> vector<4x256xf32>
    %236 = arith.addf %225, %235 : vector<4x256xf32>
    %237 = vector.extract_strided_slice %110 {offsets = [7, 0], sizes = [1, 32], strides = [1, 1]} : vector<8x32xf32> to vector<1x32xf32>
    %238 = vector.extract_strided_slice %114 {offsets = [7, 0], sizes = [1, 32], strides = [1, 1]} : vector<8x32xf32> to vector<1x32xf32>
    %239 = vector.extract_strided_slice %151 {offsets = [7, 0], sizes = [1, 32], strides = [1, 1]} : vector<8x32xf32> to vector<1x32xf32>
    %240 = vector.extract_strided_slice %155 {offsets = [7, 0], sizes = [1, 32], strides = [1, 1]} : vector<8x32xf32> to vector<1x32xf32>
    %241 = tpu.concatenate %237, %238, %239, %240 in 0 : vector<1x32xf32>, vector<1x32xf32>, vector<1x32xf32>, vector<1x32xf32> -> vector<4x32xf32>
    %c224_i32 = arith.constant 224 : i32
    %242 = vector.broadcast %c224_i32 : i32 to vector<32x256xi32>
    %243 = arith.cmpi eq, %158, %242 : vector<32x256xi32>
    %244 = arith.extui %243 : vector<32x256xi1> to vector<32x256xi32>
    %245 = arith.sitofp %244 : vector<32x256xi32> to vector<32x256xf32>
    %cst_67 = arith.constant dense<0.000000e+00> : vector<4x256xf32>
    %246 = tpu.matmul %241, %245, %cst_67 {dimension_numbers = #tpu.dot_dimension_numbers<[1], [0], [0], [1], [0, 0, 1, 1], [], []>} : vector<4x32xf32>, vector<32x256xf32>, vector<4x256xf32> -> vector<4x256xf32>
    %247 = arith.addf %236, %246 : vector<4x256xf32>
    %248 = vector.extract_strided_slice %247 {offsets = [0, 0], sizes = [2, 256], strides = [1, 1]} : vector<4x256xf32> to vector<2x256xf32>
    %249 = vector.extract_strided_slice %247 {offsets = [2, 0], sizes = [2, 256], strides = [1, 1]} : vector<4x256xf32> to vector<2x256xf32>
    %c0_68 = arith.constant 0 : index
    %c0_69 = arith.constant 0 : index
    %250 = vector.load %arg13[%c0_68, %c0_69] : memref<256x256xf32, #tpu.memory_space<vmem>>, vector<256x256xf32>
    %cst_70 = arith.constant dense<0.000000e+00> : vector<2x256xf32>
    %251 = tpu.matmul %248, %250, %cst_70 {dimension_numbers = #tpu.dot_dimension_numbers<[1], [0], [0], [1], [0, 0, 1, 1], [], []>} : vector<2x256xf32>, vector<256x256xf32>, vector<2x256xf32> -> vector<2x256xf32>
    %c0_71 = arith.constant 0 : index
    %c0_72 = arith.constant 0 : index
    %252 = vector.load %arg14[%c0_71, %c0_72] : memref<1x256xf32, #tpu.memory_space<vmem>>, vector<1x256xf32>
    %253 = vector.broadcast %252 : vector<1x256xf32> to vector<2x256xf32>
    %254 = arith.addf %251, %253 : vector<2x256xf32>
    %c0_73 = arith.constant 0 : index
    %c0_74 = arith.constant 0 : index
    %255 = vector.load %arg15[%c0_73, %c0_74] : memref<1x256xf32, #tpu.memory_space<vmem>>, vector<1x256xf32>
    %c0_75 = arith.constant 0 : index
    %c0_76 = arith.constant 0 : index
    %256 = vector.load %arg16[%c0_75, %c0_76] : memref<1x256xf32, #tpu.memory_space<vmem>>, vector<1x256xf32>
    %cst_77 = arith.constant dense<0.000000e+00> : vector<256xf32>
    %257 = vector.multi_reduction <add>, %254, %cst_77 [0] : vector<2x256xf32> to vector<256xf32>
    %258 = vector.shape_cast %257 : vector<256xf32> to vector<1x256xf32>
    %cst_78 = arith.constant 5.000000e-01 : f32
    %259 = vector.broadcast %cst_78 : f32 to vector<1x256xf32>
    %260 = arith.mulf %258, %259 : vector<1x256xf32>
    %261 = vector.broadcast %260 : vector<1x256xf32> to vector<2x256xf32>
    %262 = arith.subf %254, %261 : vector<2x256xf32>
    %263 = arith.mulf %262, %262 : vector<2x256xf32>
    %cst_79 = arith.constant dense<0.000000e+00> : vector<256xf32>
    %264 = vector.multi_reduction <add>, %263, %cst_79 [0] : vector<2x256xf32> to vector<256xf32>
    %265 = vector.shape_cast %264 : vector<256xf32> to vector<1x256xf32>
    %cst_80 = arith.constant 5.000000e-01 : f32
    %266 = vector.broadcast %cst_80 : f32 to vector<1x256xf32>
    %267 = arith.mulf %265, %266 : vector<1x256xf32>
    %cst_81 = arith.constant 9.99999974E-6 : f32
    %268 = vector.broadcast %cst_81 : f32 to vector<1x256xf32>
    %269 = arith.addf %267, %268 : vector<1x256xf32>
    %270 = math.rsqrt %269 : vector<1x256xf32>
    %271 = arith.mulf %255, %270 : vector<1x256xf32>
    %272 = vector.broadcast %271 : vector<1x256xf32> to vector<2x256xf32>
    %273 = arith.mulf %262, %272 : vector<2x256xf32>
    %274 = vector.broadcast %256 : vector<1x256xf32> to vector<2x256xf32>
    %275 = arith.addf %273, %274 : vector<2x256xf32>
    %cst_82 = arith.constant 0.000000e+00 : f32
    %276 = vector.broadcast %cst_82 : f32 to vector<2x256xf32>
    %277 = arith.maximumf %275, %276 : vector<2x256xf32>
    %c0_83 = arith.constant 0 : index
    %c0_84 = arith.constant 0 : index
    %278 = vector.load %arg17[%c0_83, %c0_84] : memref<1x256xf32, #tpu.memory_space<vmem>>, vector<1x256xf32>
    %c0_85 = arith.constant 0 : index
    %c0_86 = arith.constant 0 : index
    %279 = vector.load %arg18[%c0_85, %c0_86] : memref<1x256xf32, #tpu.memory_space<vmem>>, vector<1x256xf32>
    %cst_87 = arith.constant dense<0.000000e+00> : vector<256xf32>
    %280 = vector.multi_reduction <add>, %249, %cst_87 [0] : vector<2x256xf32> to vector<256xf32>
    %281 = vector.shape_cast %280 : vector<256xf32> to vector<1x256xf32>
    %cst_88 = arith.constant 5.000000e-01 : f32
    %282 = vector.broadcast %cst_88 : f32 to vector<1x256xf32>
    %283 = arith.mulf %281, %282 : vector<1x256xf32>
    %284 = vector.broadcast %283 : vector<1x256xf32> to vector<2x256xf32>
    %285 = arith.subf %249, %284 : vector<2x256xf32>
    %286 = arith.mulf %285, %285 : vector<2x256xf32>
    %cst_89 = arith.constant dense<0.000000e+00> : vector<256xf32>
    %287 = vector.multi_reduction <add>, %286, %cst_89 [0] : vector<2x256xf32> to vector<256xf32>
    %288 = vector.shape_cast %287 : vector<256xf32> to vector<1x256xf32>
    %cst_90 = arith.constant 5.000000e-01 : f32
    %289 = vector.broadcast %cst_90 : f32 to vector<1x256xf32>
    %290 = arith.mulf %288, %289 : vector<1x256xf32>
    %cst_91 = arith.constant 9.99999974E-6 : f32
    %291 = vector.broadcast %cst_91 : f32 to vector<1x256xf32>
    %292 = arith.addf %290, %291 : vector<1x256xf32>
    %293 = math.rsqrt %292 : vector<1x256xf32>
    %294 = arith.mulf %278, %293 : vector<1x256xf32>
    %295 = vector.broadcast %294 : vector<1x256xf32> to vector<2x256xf32>
    %296 = arith.mulf %285, %295 : vector<2x256xf32>
    %297 = vector.broadcast %279 : vector<1x256xf32> to vector<2x256xf32>
    %298 = arith.addf %296, %297 : vector<2x256xf32>
    %cst_92 = arith.constant 6.000000e-01 : f32
    %299 = vector.broadcast %cst_92 : f32 to vector<2x256xf32>
    %300 = arith.mulf %277, %299 : vector<2x256xf32>
    %cst_93 = arith.constant 4.000000e-01 : f32
    %301 = vector.broadcast %cst_93 : f32 to vector<2x256xf32>
    %302 = arith.mulf %298, %301 : vector<2x256xf32>
    %303 = arith.addf %300, %302 : vector<2x256xf32>
    %c0_94 = arith.constant 0 : index
    %c0_95 = arith.constant 0 : index
    %304 = vector.load %arg19[%c0_94, %c0_95] : memref<1x256xf32, #tpu.memory_space<vmem>>, vector<1x256xf32>
    %c0_96 = arith.constant 0 : index
    %c0_97 = arith.constant 0 : index
    %305 = vector.load %arg20[%c0_96, %c0_97] : memref<1x256xf32, #tpu.memory_space<vmem>>, vector<1x256xf32>
    %cst_98 = arith.constant dense<0.000000e+00> : vector<256xf32>
    %306 = vector.multi_reduction <add>, %303, %cst_98 [0] : vector<2x256xf32> to vector<256xf32>
    %307 = vector.shape_cast %306 : vector<256xf32> to vector<1x256xf32>
    %cst_99 = arith.constant 5.000000e-01 : f32
    %308 = vector.broadcast %cst_99 : f32 to vector<1x256xf32>
    %309 = arith.mulf %307, %308 : vector<1x256xf32>
    %310 = vector.broadcast %309 : vector<1x256xf32> to vector<2x256xf32>
    %311 = arith.subf %303, %310 : vector<2x256xf32>
    %312 = arith.mulf %311, %311 : vector<2x256xf32>
    %cst_100 = arith.constant dense<0.000000e+00> : vector<256xf32>
    %313 = vector.multi_reduction <add>, %312, %cst_100 [0] : vector<2x256xf32> to vector<256xf32>
    %314 = vector.shape_cast %313 : vector<256xf32> to vector<1x256xf32>
    %cst_101 = arith.constant 5.000000e-01 : f32
    %315 = vector.broadcast %cst_101 : f32 to vector<1x256xf32>
    %316 = arith.mulf %314, %315 : vector<1x256xf32>
    %cst_102 = arith.constant 9.99999974E-6 : f32
    %317 = vector.broadcast %cst_102 : f32 to vector<1x256xf32>
    %318 = arith.addf %316, %317 : vector<1x256xf32>
    %319 = math.rsqrt %318 : vector<1x256xf32>
    %320 = arith.mulf %304, %319 : vector<1x256xf32>
    %321 = vector.broadcast %320 : vector<1x256xf32> to vector<2x256xf32>
    %322 = arith.mulf %311, %321 : vector<2x256xf32>
    %323 = vector.broadcast %305 : vector<1x256xf32> to vector<2x256xf32>
    %324 = arith.addf %322, %323 : vector<2x256xf32>
    %c0_103 = arith.constant 0 : index
    %c0_104 = arith.constant 0 : index
    %325 = vector.load %arg21[%c0_103, %c0_104] : memref<256x256xf32, #tpu.memory_space<vmem>>, vector<256x256xf32>
    %cst_105 = arith.constant dense<0.000000e+00> : vector<2x256xf32>
    %326 = tpu.matmul %324, %325, %cst_105 {dimension_numbers = #tpu.dot_dimension_numbers<[1], [0], [0], [1], [0, 0, 1, 1], [], []>} : vector<2x256xf32>, vector<256x256xf32>, vector<2x256xf32> -> vector<2x256xf32>
    %c0_106 = arith.constant 0 : index
    %c0_107 = arith.constant 0 : index
    %327 = vector.load %arg22[%c0_106, %c0_107] : memref<1x256xf32, #tpu.memory_space<vmem>>, vector<1x256xf32>
    %328 = vector.broadcast %327 : vector<1x256xf32> to vector<2x256xf32>
    %329 = arith.addf %326, %328 : vector<2x256xf32>
    %cst_108 = arith.constant 0.000000e+00 : f32
    %330 = vector.broadcast %cst_108 : f32 to vector<2x256xf32>
    %331 = arith.maximumf %329, %330 : vector<2x256xf32>
    %c0_109 = arith.constant 0 : index
    %c0_110 = arith.constant 0 : index
    %332 = vector.load %arg23[%c0_109, %c0_110] : memref<256x256xf32, #tpu.memory_space<vmem>>, vector<256x256xf32>
    %cst_111 = arith.constant dense<0.000000e+00> : vector<2x256xf32>
    %333 = tpu.matmul %331, %332, %cst_111 {dimension_numbers = #tpu.dot_dimension_numbers<[1], [0], [0], [1], [0, 0, 1, 1], [], []>} : vector<2x256xf32>, vector<256x256xf32>, vector<2x256xf32> -> vector<2x256xf32>
    %c0_112 = arith.constant 0 : index
    %c0_113 = arith.constant 0 : index
    %334 = vector.load %arg24[%c0_112, %c0_113] : memref<1x256xf32, #tpu.memory_space<vmem>>, vector<1x256xf32>
    %335 = vector.broadcast %334 : vector<1x256xf32> to vector<2x256xf32>
    %336 = arith.addf %333, %335 : vector<2x256xf32>
    %cst_114 = arith.constant 0.000000e+00 : f32
    %337 = vector.broadcast %cst_114 : f32 to vector<2x256xf32>
    %338 = arith.maximumf %336, %337 : vector<2x256xf32>
    %cst_115 = arith.constant 6.000000e-01 : f32
    %339 = vector.broadcast %cst_115 : f32 to vector<2x256xf32>
    %340 = arith.mulf %338, %339 : vector<2x256xf32>
    %c0_116 = arith.constant 0 : index
    %c0_117 = arith.constant 0 : index
    %341 = vector.load %arg1[%c0_116, %c0_117] : memref<2x256xf32, #tpu.memory_space<vmem>>, vector<2x256xf32>
    %cst_118 = arith.constant 4.000000e-01 : f32
    %342 = vector.broadcast %cst_118 : f32 to vector<2x256xf32>
    %343 = arith.mulf %341, %342 : vector<2x256xf32>
    %344 = arith.addf %340, %343 : vector<2x256xf32>
    %c0_119 = arith.constant 0 : index
    %c0_120 = arith.constant 0 : index
    %345 = vector.load %arg25[%c0_119, %c0_120] : memref<2x256xf32, #tpu.memory_space<vmem>>, vector<2x256xf32>
    tpu.vector_store %arg25[%c0_119, %c0_120], %344 {strides = array<i32>} : memref<2x256xf32, #tpu.memory_space<vmem>>, vector<2x256xf32>,
    return
  }
}

</mosaic_0001>

<bundles_post_ra>
// kernel: adapter_forward.1
= control target key start
LH: loop header
LB: loop body
LE: loop exit
PB: predicated region body
PF: predicated region fallthrough
CT: control target
= control target key end

     0   :  { %s3705_s0 = inlined_call_operand.vmem [shape: f32[16,32], index: 0, kind: input, shape index: {}]   ;;  %s3706_s1 = inlined_call_operand.vmem [shape: f32[2,256], index: 1, kind: input, shape index: {}]   ;;  %s3707_s2 = inlined_call_operand.vmem [shape: f32[1,32], index: 2, kind: input, shape index: {}]   ;;  %s3708_s3 = inlined_call_operand.hbm [shape: f32[1,32], index: 3, kind: input, shape index: {}]   ;;  %s3709_s4 = inlined_call_operand.vmem [shape: f32[16,16], index: 4, kind: input, shape index: {}]   ;;  %s3710_s5 = inlined_call_operand.hbm [shape: f32[16,16], index: 5, kind: input, shape index: {}]   ;;  %s3711_s6 = inlined_call_operand.hbm [shape: f32[16,32], index: 6, kind: input, shape index: {}]   ;;  %s3712_s7 = inlined_call_operand.vmem [shape: f32[8,32], index: 7, kind: input, shape index: {}]   ;;  %s3713_s8 = inlined_call_operand.hbm [shape: f32[1,32], index: 8, kind: input, shape index: {}]   ;;  %s3714_s9 = inlined_call_operand.hbm [shape: f32[1,32], index: 9, kind: input, shape index: {}]   ;;  %s3715_s10 = inlined_call_operand.hbm [shape: f32[8,32], index: 10, kind: input, shape index: {}]   ;;  %s3716_s11 = inlined_call_operand.hbm [shape: f32[1,32], index: 11, kind: input, shape index: {}]   ;;  %s3717_s12 = inlined_call_operand.hbm [shape: f32[1,32], index: 12, kind: input, shape index: {}]   ;;  %s3718_s13 = inlined_call_operand.hbm [shape: f32[256,256], index: 13, kind: input, shape index: {}]   ;;  %s3719_s14 = inlined_call_operand.vmem [shape: f32[1,256], index: 14, kind: input, shape index: {}]   ;;  %s3720_s15 = inlined_call_operand.hbm [shape: f32[1,256], index: 15, kind: input, shape index: {}]   ;;  %s3721_s16 = inlined_call_operand.hbm [shape: f32[1,256], index: 16, kind: input, shape index: {}]   ;;  %s3722_s17 = inlined_call_operand.hbm [shape: f32[1,256], index: 17, kind: input, shape index: {}]   ;;  %s3723_s18 = inlined_call_operand.hbm [shape: f32[1,256], index: 18, kind: input, shape index: {}]   ;;  %s3724_s19 = inlined_call_operand.hbm [shape: f32[1,256], index: 19, kind: input, shape index: {}]   ;;  %s3725_s20 = inlined_call_operand.hbm [shape: f32[1,256], index: 20, kind: input, shape index: {}]   ;;  %s3726_s21 = inlined_call_operand.hbm [shape: f32[256,256], index: 21, kind: input, shape index: {}]   ;;  %s3727_s22 = inlined_call_operand.hbm [shape: f32[1,256], index: 22, kind: input, shape index: {}]   ;;  %s3728_s23 = inlined_call_operand.hbm [shape: f32[256,256], index: 23, kind: input, shape index: {}]   ;;  %s3729_s24 = inlined_call_operand.hbm [shape: f32[1,256], index: 24, kind: input, shape index: {}]   ;;  %s3730_s25 = inlined_call_operand.vmem [shape: f32[2,256], index: 25, kind: output, shape index: {}]  }
   0x1   :  { %3735 = sst [smem:[#allocation41_spill]] %s3705_s0 }
   0x2   :  { %3736 = sst [smem:[#allocation42_spill]] %s3706_s1 }
   0x3   :  { %3737 = sst [smem:[#allocation43_spill]] %s3707_s2 }
   0x4   :  { %3738 = sst [smem:[#allocation44_spill]] %s3708_s3 }
   0x5   :  { %3739 = sst [smem:[#allocation45_spill]] %s3709_s4 }
   0x6   :  { %3740 = sst [smem:[#allocation46_spill]] %s3710_s5 }
   0x7   :  { %3741 = sst [smem:[#allocation47_spill]] %s3711_s6 }
   0x8   :  { %3742 = sst [smem:[#allocation48_spill]] %s3712_s7 }
   0x9   :  { %3743 = sst [smem:[#allocation49_spill]] %s3713_s8 }
   0xa   :  { %3744 = sst [smem:[#allocation50_spill]] %s3714_s9 }
   0xb   :  { %30 = vsyncpa [#allocation3], 0 }
   0xc   :  { %31 = vsyncpa [#allocation5], 0 }
   0xd   :  { %32 = vsyncpa [#allocation8], 0 }
   0xe   :  { %33 = vsyncpa [#allocation11], 0 }
   0xf   :  { %34 = vsyncpa [#allocation14], 0 }
  0x10   :  { %35 = vsyncpa [#allocation17], 0 }
  0x11   :  { %36 = vsyncpa [#allocation20], 0 }
  0x12   :  { %37 = vsyncpa [#allocation23], 0 }
  0x13   :  { %38 = vsyncpa [#allocation26], 0  ;;  %s3745_s6 = sld [smem:[#allocation46_spill]] }
  0x19   :  { %s63_s30 = sshll.u32 %s3745_s6, 4  ;;  %s64_s30 = int_to_ptr.hbm [resolvable:$true] %s63_s30 }
  0x1a   :  { %39 = vsyncpa [#allocation29], 0  ;;  %s3099_s7 = smov [#allocation4]   ;;  %s3746_s8 = sld [smem:[#allocation49_spill]] }
  0x1b   :  { %s65_s3 = sshll.u32 %s3099_s7, 4  ;;  %s3733_s4 = smov 128   ;;  %s66_s3 = int_to_ptr.vmem [resolvable:$true] %s65_s3 }
  0x1c   :  { %s3734_s28 = smov 8   ;;  %s3102_s9 = smov [#allocation7]  }
  0x1d   :  { %71 = dma.hbm_to_vmem [thread:$0]  %s64_s30, 256, %s66_s3, [#allocation5], %s3733_s4, %s3733_s4, %s3734_s28  }
  0x1e   :  { %s94_s5 = sshll.u32 %s3102_s9, 4  ;;  %s114_s2 = sshll.u32 %s3715_s10, 4  ;;  %s95_s5 = int_to_ptr.vmem [resolvable:$true] %s94_s5  ;;  %s115_s2 = int_to_ptr.hbm [resolvable:$true] %s114_s2 }
  0x1f   :  { %s136_s26 = sshll.u32 %s3717_s12, 4  ;;  %s3103_s1 = smov [#allocation10]   ;;  %s137_s26 = int_to_ptr.hbm [resolvable:$true] %s136_s26 }
  0x20   :  { %s92_s27 = sshll.u32 %s3746_s8, 4  ;;  %s116_s8 = sshll.u32 %s3103_s1, 4  ;;  %s93_s27 = int_to_ptr.hbm [resolvable:$true] %s92_s27  ;;  %s117_s8 = int_to_ptr.vmem [resolvable:$true] %s116_s8 }
  0x21   :  { %97 = dma.hbm_to_vmem [thread:$0]  %s93_s27, 16, %s95_s5, [#allocation8]  }
  0x22   :  { %119 = dma.hbm_to_vmem [thread:$0]  %s115_s2, 128, %s117_s8, [#allocation11]  }
  0x23   :  { %s3104_s30 = smov [#allocation13]   ;;  %s162_s28 = sshll.u32 %s3720_s15, 4  ;;  %s163_s28 = int_to_ptr.hbm [resolvable:$true] %s162_s28 }
  0x24   :  { %s138_s3 = sshll.u32 %s3104_s30, 4  ;;  %s184_s5 = sshll.u32 %s3722_s17, 4  ;;  %s139_s3 = int_to_ptr.vmem [resolvable:$true] %s138_s3  ;;  %s185_s5 = int_to_ptr.hbm [resolvable:$true] %s184_s5 }
  0x25   :  { %141 = dma.hbm_to_vmem [thread:$0]  %s137_s26, 16, %s139_s3, [#allocation14]  }
  0x26   :  { %s3105_s0 = smov [#allocation16]   ;;  %s3106_s29 = smov [#allocation19]  }
  0x27   :  { %s164_s12 = sshll.u32 %s3105_s0, 4  ;;  %s186_s2 = sshll.u32 %s3106_s29, 4  ;;  %s165_s12 = int_to_ptr.vmem [resolvable:$true] %s164_s12  ;;  %s187_s2 = int_to_ptr.vmem [resolvable:$true] %s186_s2 }
  0x28   :  { %167 = dma.hbm_to_vmem [thread:$0]  %s163_s28, 32, %s165_s12, [#allocation17]  }
  0x29   :  { %s206_s1 = sshll.u32 %s3724_s19, 4  ;;  %s3107_s15 = smov [#allocation22]   ;;  %s207_s1 = int_to_ptr.hbm [resolvable:$true] %s206_s1 }
  0x2a   :  { %189 = dma.hbm_to_vmem [thread:$0]  %s185_s5, 32, %s187_s2, [#allocation20]  }
  0x2b   :  { %s208_s4 = sshll.u32 %s3107_s15, 4  ;;  %s227_s17 = sshll.u32 %s3726_s21, 4  ;;  %s209_s4 = int_to_ptr.vmem [resolvable:$true] %s208_s4  ;;  %s228_s17 = int_to_ptr.hbm [resolvable:$true] %s227_s17 }
  0x2c   :  { %211 = dma.hbm_to_vmem [thread:$0]  %s207_s1, 32, %s209_s4, [#allocation23]  }
  0x2d   :  { %s3108_s30 = smov [#allocation25]   ;;  %s251_s10 = sshll.u32 %s3728_s23, 4  ;;  %s252_s10 = int_to_ptr.hbm [resolvable:$true] %s251_s10 }
  0x2e   :  { %s229_s28 = sshll.u32 %s3108_s30, 4  ;;  %s3109_s19 = smov 256   ;;  %s230_s28 = int_to_ptr.vmem [resolvable:$true] %s229_s28 }
  0x2f   :  { %s3110_s27 = smov 16   ;;  %s3747_s12 = sld [smem:[#allocation44_spill]] }
  0x30   :  { %235 = dma.hbm_to_vmem [thread:$0]  %s228_s17, 8192, %s230_s28, [#allocation26], %s3109_s19, %s3109_s19, %s3110_s27  }
  0x31   :  { %s3111_s29 = smov [#allocation28]   ;;  %s3112_s23 = smov [#allocation2]  }
  0x32   :  { %s253_s2 = sshll.u32 %s3111_s29, 4  ;;  %s53_s6 = sshll.u32 %s3112_s23, 4  ;;  %s254_s2 = int_to_ptr.vmem [resolvable:$true] %s253_s2  ;;  %s54_s6 = int_to_ptr.vmem [resolvable:$true] %s53_s6 }
  0x33   :  { %259 = dma.hbm_to_vmem [thread:$0]  %s252_s10, 8192, %s254_s2, [#allocation29], %s3109_s19, %s3109_s19, %s3110_s27  }
  0x34   :  { %s3748_s15 = sld [smem:[#allocation47_spill]]  ;;  %s3113_s28 = smov [#allocation6]  }
  0x35   :  { %s51_s21 = sshll.u32 %s3747_s12, 4  ;;  %s3749_s17 = sld [smem:[#allocation50_spill]]  ;;  %s52_s21 = int_to_ptr.hbm [resolvable:$true] %s51_s21 }
  0x36   :  { %56 = dma.hbm_to_vmem [thread:$0]  %s52_s21, 16, %s54_s6, [#allocation3]  }
  0x37   :  { %s78_s3 = sshll.u32 %s3113_s28, 4  ;;  %s3750_s9 = smov 8   ;;  %s79_s3 = int_to_ptr.vmem [resolvable:$true] %s78_s3 }
  0x38   :  { %s3751_s5 = smov 128   ;;  %s3114_s10 = smov [#allocation9]  }
  0x39   :  { %s105_s0 = sshll.u32 %s3114_s10, 4  ;;  %s125_s2 = sshll.u32 %s3716_s11, 4  ;;  %s106_s0 = int_to_ptr.vmem [resolvable:$true] %s105_s0  ;;  %s126_s2 = int_to_ptr.hbm [resolvable:$true] %s125_s2 }
  0x3a   :  { %s76_s4 = sshll.u32 %s3748_s15, 4  ;;  %s146_s6 = sshll.u32 %s3718_s13, 4  ;;  %s77_s4 = int_to_ptr.hbm [resolvable:$true] %s76_s4  ;;  %s147_s6 = int_to_ptr.hbm [resolvable:$true] %s146_s6 }
  0x3b   :  { %s103_s30 = sshll.u32 %s3749_s17, 4  ;;  %s3115_s7 = smov [#allocation12]   ;;  %s104_s30 = int_to_ptr.hbm [resolvable:$true] %s103_s30 }
  0x3c   :  { %84 = dma.hbm_to_vmem [thread:$0]  %s77_s4, 256, %s79_s3, [#allocation5], %s3751_s5, %s3751_s5, %s3750_s9  }
  0x3d   :  { %108 = dma.hbm_to_vmem [thread:$0]  %s104_s30, 16, %s106_s0, [#allocation8]  }
  0x3e   :  { %s127_s1 = sshll.u32 %s3115_s7, 4  ;;  %s3116_s15 = smov [#allocation15]   ;;  %s128_s1 = int_to_ptr.vmem [resolvable:$true] %s127_s1 }
  0x3f   :  { %130 = dma.hbm_to_vmem [thread:$0]  %s126_s2, 16, %s128_s1, [#allocation11]  }
  0x40   :  { %s148_s4 = sshll.u32 %s3116_s15, 4  ;;  %s173_s17 = sshll.u32 %s3721_s16, 4  ;;  %s149_s4 = int_to_ptr.vmem [resolvable:$true] %s148_s4  ;;  %s174_s17 = int_to_ptr.hbm [resolvable:$true] %s173_s17 }
  0x41   :  { %154 = dma.hbm_to_vmem [thread:$0]  %s147_s6, 8192, %s149_s4, [#allocation14], %s3109_s19, %s3109_s19, %s3110_s27  }
  0x42   :  { %s195_s13 = sshll.u32 %s3723_s18, 4  ;;  %s3117_s28 = smov [#allocation18]   ;;  %s196_s13 = int_to_ptr.hbm [resolvable:$true] %s195_s13 }
  0x43   :  { %s175_s3 = sshll.u32 %s3117_s28, 4  ;;  %s3118_s9 = smov [#allocation21]   ;;  %s176_s3 = int_to_ptr.vmem [resolvable:$true] %s175_s3 }
  0x44   :  { %178 = dma.hbm_to_vmem [thread:$0]  %s174_s17, 32, %s176_s3, [#allocation17]  }
  0x45   :  { %s197_s5 = sshll.u32 %s3118_s9, 4  ;;  %s217_s16 = sshll.u32 %s3725_s20, 4  ;;  %s198_s5 = int_to_ptr.vmem [resolvable:$true] %s197_s5  ;;  %s218_s16 = int_to_ptr.hbm [resolvable:$true] %s217_s16 }
  0x46   :  { %200 = dma.hbm_to_vmem [thread:$0]  %s196_s13, 32, %s198_s5, [#allocation20]  }
  0x47   :  { %s241_s27 = sshll.u32 %s3727_s22, 4  ;;  %s3119_s29 = smov [#allocation24]   ;;  %s242_s27 = int_to_ptr.hbm [resolvable:$true] %s241_s27 }
  0x48   :  { %s219_s18 = sshll.u32 %s3119_s29, 4  ;;  %s3120_s2 = smov [#allocation27]   ;;  %s220_s18 = int_to_ptr.vmem [resolvable:$true] %s219_s18 }
  0x49   :  { %222 = dma.hbm_to_vmem [thread:$0]  %s218_s16, 32, %s220_s18, [#allocation23]  }
  0x4a   :  { %s243_s21 = sshll.u32 %s3120_s2, 4  ;;  %s265_s7 = sshll.u32 %s3729_s24, 4  ;;  %s244_s21 = int_to_ptr.vmem [resolvable:$true] %s243_s21  ;;  %s266_s7 = int_to_ptr.hbm [resolvable:$true] %s265_s7 }
  0x4b   :  { %246 = dma.hbm_to_vmem [thread:$0]  %s242_s27, 32, %s244_s21, [#allocation26]  }
  0x4c   :  { %s3121_s20 = smov [#allocation30]  }
  0x4d   :  { %s267_s1 = sshll.u32 %s3121_s20, 4  ;;  %s268_s1 = int_to_ptr.vmem [resolvable:$true] %s267_s1 }
  0x4e   :  { %270 = dma.hbm_to_vmem [thread:$0]  %s266_s7, 32, %s268_s1, [#allocation29]  }
  0x4f   :  { %3079 = dma.done.wait [#allocation3], 16  }
  0x50   :  { %3080 = vsyncadd [#allocation3], 4294967280 }
  0x51   :  { %3081 = dma.done.wait [#allocation5], 512  }
  0x52   :  { %3082 = vsyncadd [#allocation5], 4294966784 }
  0x53   :  { %3083 = dma.done.wait [#allocation8], 32  }
  0x54   :  { %3084 = vsyncadd [#allocation8], 4294967264 }
  0x55   :  { %3085 = dma.done.wait [#allocation11], 144  }
  0x56   :  { %3086 = vsyncadd [#allocation11], 4294967152 }
  0x57   :  { %3087 = dma.done.wait [#allocation14], 8208  }
  0x58   :  { %3088 = vsyncadd [#allocation14], 4294959088 }
  0x59   :  { %3089 = dma.done.wait [#allocation17], 64  }
  0x5a   :  { %3090 = vsyncadd [#allocation17], 4294967232 }
  0x5b   :  { %3091 = dma.done.wait [#allocation20], 64  }
  0x5c   :  { %3092 = vsyncadd [#allocation20], 4294967232 }
  0x5d   :  { %3093 = dma.done.wait [#allocation23], 64  }
  0x5e   :  { %3094 = vsyncadd [#allocation23], 4294967232 }
  0x5f   :  { %3095 = dma.done.wait [#allocation26], 8224  }
  0x60   :  { %3096 = vsyncadd [#allocation26], 4294959072 }
  0x61   :  { %3097 = dma.done.wait [#allocation29], 8224  }
  0x62   :  { %3098 = vsyncadd [#allocation29], 4294959072  ;;  %vm349_vm0 = vcmask 261120   ;;  %s3752_s15 = sld [smem:[#allocation41_spill]]  ;;  %v2566_v37 = vld [vmem:[#allocation2] ss:$0 sm:$0xff] }
  0x63   :  { %s3753_s11 = sld [smem:[#allocation43_spill]]  ;;  %vm400_vm4 = vcmask 130048   ;;  %vm495_vm5 = vcmask 64512  }
  0x64   :  { %s3754_s28 = sld [smem:[#allocation45_spill]] }
  0x65   :  { %s3763_s0 = sld [smem:[#allocation48_spill]] }
  0x66   :  { %s3764_s27 = sld [smem:[#allocation42_spill]] }
  0x68   :  { %v347_v0 = vld [vmem:[%s3752_s15] sm:$0xff]  ;;  %v348_v1 = vld [vmem:[%s3752_s15 + $0x8] sm:$0xff] }
  0x69   :  { %v350_v2 = vsel %vm349_vm0, %v347_v0, 0.0  ;;  %v351_v3 = vsel %vm349_vm0, %v348_v1, 0.0  ;;  %v374_v32 = vld [vmem:[%s3753_s11] sm:$0x1] }
  0x6a   :  { %v352_v4 = vadd.f32 %v351_v3, %v350_v2  ;;  %v398_v42 = vld [vmem:[%s3754_s28] sm:$0xff]  ;;  %v399_v48 = vld [vmem:[%s3754_s28 + $0x8] sm:$0xff] }
  0x6c   :  { %v353_v5 = vrot.slane %v352_v4, 4 }
  0x6e   :  { %v354_v6 = vadd.f32 %v353_v5, %v352_v4 }
  0x70   :  { %v355_v7 = vrot.slane %v354_v6, 2 }
  0x72   :  { %v356_v8 = vadd.f32 %v355_v7, %v354_v6 }
  0x74   :  { %v357_v9 = vrot.slane %v356_v8, 1 }
  0x76   :  { %v358_v10 = vadd.f32 %v357_v9, %v356_v8 }
  0x78   :  { %v359_v11 = vmul.f32 0.0625, %v358_v10 }
  0x7a   :  { %v360_v12 = vsub.f32 %v347_v0, %v359_v11  ;;  %v361_v13 = vsub.f32 %v348_v1, %v359_v11 }
  0x7c   :  { %v362_v14 = vmul.f32 %v360_v12, %v360_v12  ;;  %v363_v15 = vmul.f32 %v361_v13, %v361_v13 }
  0x7e   :  { %v364_v16 = vsel %vm349_vm0, %v362_v14, 0.0  ;;  %v365_v17 = vsel %vm349_vm0, %v363_v15, 0.0 }
  0x7f   :  { %v366_v18 = vadd.f32 %v365_v17, %v364_v16 }
  0x81   :  { %v367_v19 = vrot.slane %v366_v18, 4 }
  0x83   :  { %v368_v20 = vadd.f32 %v367_v19, %v366_v18 }
  0x85   :  { %v369_v21 = vrot.slane %v368_v20, 2 }
  0x87   :  { %v370_v22 = vadd.f32 %v369_v21, %v368_v20 }
  0x89   :  { %v371_v23 = vrot.slane %v370_v22, 1 }
  0x8b   :  { %v372_v24 = vadd.f32 %v371_v23, %v370_v22 }
  0x8d   :  { %v373_v25 = vmul.f32 0.0625, %v372_v24 }
  0x8f   :  { %v375_v26 = vadd.f32 1e-05, %v373_v25 }
  0x91   :  { %2569 = vrsqrt.f32 %v375_v26  ;;  %vm382_vm1 = vweird.f32 %v375_v26 }
  0x97   :  { %v2570_v27 = vpop.eup %2569 }
  0x98   :  { %v377_v28 = vmul.f32 %v2570_v27, %v375_v26  ;;  %vm383_vm2 = vweird.f32 %v2570_v27 }
  0x99   :  { %vm384_vm3 = vmor %vm382_vm1, %vm383_vm2 }
  0x9a   :  { %v378_v29 = vmul.f32 %v2570_v27, %v377_v28 }
  0x9c   :  { %v379_v30 = vmul.f32 0.5, %v378_v29 }
  0x9e   :  { %v380_v31 = vsub.f32 1.5, %v379_v30 }
  0xa0   :  { %v381_v33 = vmul.f32 %v2570_v27, %v380_v31 }
  0xa2   :  { %v385_v34 = vsel %vm384_vm3, %v2570_v27, %v381_v33 }
  0xa3   :  { %v386_v35 = vmul.f32 %v385_v34, %v374_v32 }
  0xa5   :  { %v388_v36 = vperm.slane %v386_v35, 0 }
  0xa7   :  { %v391_v38 = vmul.f32 %v388_v36, %v361_v13  ;;  %v390_v39 = vmul.f32 %v388_v36, %v360_v12  ;;  %v430_v13 = vld [vmem:[#allocation4] sm:$0xff] }
  0xa9   :  { %v3339_v40 = vadd.f32 %v2566_v37, %v391_v38  ;;  %v3341_v41 = vadd.f32 %v2566_v37, %v390_v39 }
  0xab   :  { %421 = vmatpush.msra.mxu0 %v3339_v40  ;;  %454 = vmatpush.msra.mxu1 %v3339_v40 }
  0xad   :  { %422 = vmatpush.msra.mxu0 %v3341_v41  ;;  %455 = vmatpush.msra.mxu1 %v3341_v41 }
  0xae   :  { %2447 = vmatmul.msk.f32.vlgmr.msra.gmra.mxu0 %vm400_vm4, %v398_v42  ;;  %2449 = vmatmul.msk.f32.vlgmr.msra.gmra.mxu1 %vm400_vm4, %v430_v13 }
  0xb6   :  { %2448 = vmatmul.msk.f32.gmra.mxu0 %vm400_vm4, %v399_v48 }
 0x12b   :  { %v424_v43 = vpop.f32.mrf.mxu0 }
 0x12c   :  { %463 = vxpose.xlu0.b32.start.end [1/1] (short) (narrow) %v424_v43, 32  ;;  %523 = vmatpush.msra.mxu2 %v424_v43 }
 0x133   :  { %v3380_v14 = vpop.f32.mrf.mxu0 }
 0x1d0   :  { %v479_v44 = vpop.trf.xlu0 }
 0x1d1   :  { %2451 = vmatmul.msk.f32.vlgmr.msra.gmra.mxu2 %vm495_vm5, %v479_v44 }
 0x1d8   :  { %v480_v45 = vpop.trf.xlu0 }
 0x1d9   :  { %2452 = vmatmul.msk.f32.gmra.mxu2 %vm495_vm5, %v480_v45 }
 0x1e0   :  { %v481_v46 = vpop.trf.xlu0 }
 0x1e1   :  { %2453 = vmatmul.msk.f32.gmra.mxu2 %vm495_vm5, %v481_v46 }
 0x1e8   :  { %v482_v47 = vpop.trf.xlu0 }
 0x1e9   :  { %2454 = vmatmul.msk.f32.gmra.mxu2 %vm495_vm5, %v482_v47 }
 0x254   :  { %v525_v49 = vpop.f32.mrf.mxu2 }
 0x255   :  { %v537_v50 = vsel %vm349_vm0, %v525_v49, -inf }
 0x256   :  { %538 = vmax.xlane.f32.xlu0 %v537_v50 }
 0x25c   :  { %v528_v51 = vpop.f32.mrf.mxu2 }
 0x25d   :  { %v540_v52 = vsel %vm349_vm0, %v528_v51, -inf }
 0x25e   :  { %541 = vmax.xlane.f32.xlu1 %v540_v52 }
 0x264   :  { %v531_v53 = vpop.f32.mrf.mxu2 }
 0x265   :  { %v543_v54 = vsel %vm349_vm0, %v531_v53, -inf }
 0x266   :  { %544 = vmax.xlane.f32.xlu1 %v543_v54 }
 0x26c   :  { %v534_v55 = vpop.f32.mrf.mxu2 }
 0x26d   :  { %v546_v56 = vsel %vm349_vm0, %v534_v55, -inf }
 0x26e   :  { %547 = vmax.xlane.f32.xlu2 %v546_v56 }
 0x2c9   :  { %v539_v57 = vpop.xlane.xlu0 %538 }
 0x2ca   :  { %v549_v58 = vsub.f32 %v525_v49, %v539_v57 }
 0x2cc   :  { %v553_v59 = vmul.f32 1.442695, %v549_v58 }
 0x2ce   :  { %2571 = vpow2.f32 %v553_v59 }
 0x2d1   :  { %v542_v60 = vpop.xlane.xlu1 %541 }
 0x2d2   :  { %v550_v61 = vsub.f32 %v528_v51, %v542_v60 }
 0x2d4   :  { %v3363_v62 = vpop.eup %2571  ;;  %v555_v63 = vmul.f32 1.442695, %v550_v61 }
 0x2d5   :  { %v561_v0 = vsel %vm349_vm0, %v3363_v62, 0.0 }
 0x2d6   :  { %2573 = vpow2.f32 %v555_v63  ;;  %562 = vadd.xlane.f32.xlu2 %v561_v0 }
 0x2d9   :  { %v545_v1 = vpop.xlane.xlu1 %544 }
 0x2da   :  { %v551_v2 = vsub.f32 %v531_v53, %v545_v1 }
 0x2dc   :  { %v3367_v3 = vpop.eup %2573  ;;  %v557_v4 = vmul.f32 1.442695, %v551_v2 }
 0x2dd   :  { %v564_v5 = vsel %vm349_vm0, %v3367_v3, 0.0 }
 0x2de   :  { %2575 = vpow2.f32 %v557_v4  ;;  %565 = vadd.xlane.f32.xlu1 %v564_v5 }
 0x2e1   :  { %v548_v6 = vpop.xlane.xlu2 %547 }
 0x2e2   :  { %v552_v7 = vsub.f32 %v534_v55, %v548_v6 }
 0x2e4   :  { %v3371_v8 = vpop.eup %2575  ;;  %v559_v9 = vmul.f32 1.442695, %v552_v7 }
 0x2e5   :  { %v567_v10 = vsel %vm349_vm0, %v3371_v8, 0.0 }
 0x2e6   :  { %2577 = vpow2.f32 %v559_v9  ;;  %568 = vadd.xlane.f32.xlu2 %v567_v10 }
 0x2ec   :  { %v3375_v11 = vpop.eup %2577 }
 0x2ed   :  { %v570_v12 = vsel %vm349_vm0, %v3375_v11, 0.0 }
 0x2ee   :  { %571 = vadd.xlane.f32.xlu1 %v570_v12 }
 0x30f   :  { %689 = vxpose.xlu2.b32.start.end [1/1] (short) (narrow) %v3380_v14, 32 }
 0x349   :  { %v563_v15 = vpop.xlane.xlu2 %562 }
 0x34a   :  { %2579 = vrcp.f32 %v563_v15  ;;  %v584_v32 = vand.u32 2147483648, %v563_v15  ;;  %vm578_vm9 = vweird.f32 %v563_v15  ;;  %v582_v35 = vand.u32 2147483647, %v563_v15 }
 0x34c   :  { %v585_v46 = vor.u32 1.1754944e-38, %v584_v32  ;;  %vm583_vm15 = vcmp.eq.f32.partialorder %v582_v35, 8.507059e+37 }
 0x350   :  { %v2580_v17 = vpop.eup %2579 }
 0x351   :  { %v566_v16 = vpop.xlane.xlu1 %565  ;;  %v574_v18 = vmul.f32 %v2580_v17, %v563_v15  ;;  %vm579_vm7 = vweird.f32 %v2580_v17 }
 0x352   :  { %2581 = vrcp.f32 %v566_v16  ;;  %v598_v31 = vand.u32 2147483648, %v566_v16  ;;  %vm592_vm8 = vweird.f32 %v566_v16  ;;  %v596_v33 = vand.u32 2147483647, %v566_v16  ;;  %vm3387_vm11 = vmor %vm578_vm9, %vm579_vm7 }
 0x353   :  { %v575_v22 = vsub.f32 1.0, %v574_v18 }
 0x354   :  { %v599_v45 = vor.u32 1.1754944e-38, %v598_v31  ;;  %vm597_vm13 = vcmp.eq.f32.partialorder %v596_v33, 8.507059e+37  ;;  %v457_v31 = vpop.f32.mrf.mxu1 }
 0x355   :  { %v576_v25 = vmul.f32 %v2580_v17, %v575_v22 }
 0x357   :  { %v577_v30 = vadd.f32 %v2580_v17, %v576_v25 }
 0x358   :  { %v2582_v19 = vpop.eup %2581 }
 0x359   :  { %v588_v20 = vmul.f32 %v2582_v19, %v566_v16  ;;  %v569_v21 = vpop.xlane.xlu2 %568  ;;  %vm593_vm6 = vweird.f32 %v2582_v19  ;;  %v581_v44 = vsel %vm3387_vm11, %v2580_v17, %v577_v30  ;;  %v432_v30 = vld [vmem:[#allocation6] sm:$0xff] }
 0x35a   :  { %2583 = vrcp.f32 %v569_v21  ;;  %vm3383_vm10 = vmor %vm592_vm8, %vm593_vm6  ;;  %v612_v37 = vand.u32 2147483648, %v569_v21  ;;  %v610_v43 = vand.u32 2147483647, %v569_v21  ;;  %vm606_vm14 = vweird.f32 %v569_v21 }
 0x35b   :  { %v589_v23 = vsub.f32 1.0, %v588_v20  ;;  %v586_v51 = vsel %vm583_vm15, %v585_v46, %v581_v44  ;;  %v458_v33 = vadd.f32 %v457_v31, %v432_v30 }
 0x35c   :  { %v613_v50 = vor.u32 1.1754944e-38, %v612_v37  ;;  %vm611_vm2 = vcmp.eq.f32.partialorder %v610_v43, 8.507059e+37  ;;  %v629_v58 = vmul.f32 %v3363_v62, %v586_v51 }
 0x35d   :  { %v590_v24 = vmul.f32 %v2582_v19, %v589_v23 }
 0x35e   :  { %v633_v4 = vsel %vm349_vm0, %v629_v58, 0.0 }
 0x35f   :  { %v591_v27 = vadd.f32 %v2582_v19, %v590_v24 }
 0x360   :  { %v2584_v26 = vpop.eup %2583 }
 0x361   :  { %v602_v28 = vmul.f32 %v2584_v26, %v569_v21  ;;  %v572_v29 = vpop.xlane.xlu1 %571  ;;  %v595_v39 = vsel %vm3383_vm10, %v2582_v19, %v591_v27  ;;  %vm607_vm12 = vweird.f32 %v2584_v26 }
 0x362   :  { %2585 = vrcp.f32 %v572_v29  ;;  %v600_v49 = vsel %vm597_vm13, %v599_v45, %v595_v39  ;;  %vm608_vm1 = vmor %vm606_vm14, %vm607_vm12  ;;  %v626_v57 = vand.u32 2147483648, %v572_v29  ;;  %v624_v60 = vand.u32 2147483647, %v572_v29 }
 0x363   :  { %v603_v34 = vsub.f32 1.0, %v602_v28  ;;  %v630_v56 = vmul.f32 %v3367_v3, %v600_v49  ;;  %vm620_vm6 = vweird.f32 %v572_v29 }
 0x364   :  { %v627_v1 = vor.u32 1.1754944e-38, %v626_v57  ;;  %vm625_vm8 = vcmp.eq.f32.partialorder %v624_v60, 8.507059e+37 }
 0x365   :  { %v604_v42 = vmul.f32 %v2584_v26, %v603_v34  ;;  %v634_v0 = vsel %vm349_vm0, %v630_v56, 0.0 }
 0x366   :  { %v635_v6 = vadd.f32 %v634_v0, %v633_v4 }
 0x367   :  { %v605_v47 = vadd.f32 %v2584_v26, %v604_v42 }
 0x368   :  { %v2586_v48 = vpop.eup %2585 }
 0x369   :  { %v609_v52 = vsel %vm608_vm1, %v2584_v26, %v605_v47  ;;  %v616_v53 = vmul.f32 %v2586_v48, %v572_v29  ;;  %vm621_vm3 = vweird.f32 %v2586_v48 }
 0x36a   :  { %v614_v54 = vsel %vm611_vm2, %v613_v50, %v609_v52  ;;  %vm622_vm7 = vmor %vm620_vm6, %vm621_vm3  ;;  %v431_v52 = vld [vmem:[#allocation4 + $0x8] sm:$0xff] }
 0x36b   :  { %v617_v55 = vsub.f32 1.0, %v616_v53  ;;  %v631_v61 = vmul.f32 %v3371_v8, %v614_v54  ;;  %2450 = vmatmul.msk.f32.gmra.mxu1 %vm400_vm4, %v431_v52 }
 0x36d   :  { %v618_v59 = vmul.f32 %v2586_v48, %v617_v55  ;;  %v636_v3 = vsel %vm349_vm0, %v631_v61, 0.0 }
 0x36e   :  { %v637_v7 = vadd.f32 %v636_v3, %v635_v6 }
 0x36f   :  { %v619_v63 = vadd.f32 %v2586_v48, %v618_v59 }
 0x371   :  { %v623_v2 = vsel %vm622_vm7, %v2586_v48, %v619_v63 }
 0x372   :  { %v628_v5 = vsel %vm625_vm8, %v627_v1, %v623_v2 }
 0x373   :  { %v632_v62 = vmul.f32 %v3375_v11, %v628_v5 }
 0x375   :  { %v638_v9 = vsel %vm349_vm0, %v632_v62, 0.0 }
 0x376   :  { %v639_v8 = vadd.f32 %v638_v9, %v637_v7 }
 0x378   :  { %v640_v10 = vrot.slane %v639_v8, 4 }
 0x37a   :  { %v641_v12 = vadd.f32 %v640_v10, %v639_v8 }
 0x37c   :  { %v642_v13 = vrot.slane %v641_v12, 2 }
 0x37e   :  { %v643_v15 = vadd.f32 %v642_v13, %v641_v12 }
 0x380   :  { %v644_v16 = vrot.slane %v643_v15, 1 }
 0x382   :  { %v645_v17 = vadd.f32 %v644_v16, %v643_v15 }
 0x384   :  { %v646_v18 = vadd.f32 1e-09, %v645_v17 }
 0x386   :  { %2587 = vrcp.f32 %v646_v18  ;;  %v658_v22 = vand.u32 2147483648, %v646_v18  ;;  %v656_v24 = vand.u32 2147483647, %v646_v18  ;;  %vm652_vm10 = vweird.f32 %v646_v18 }
 0x388   :  { %v659_v25 = vor.u32 1.1754944e-38, %v658_v22  ;;  %vm657_vm12 = vcmp.eq.f32.partialorder %v656_v24, 8.507059e+37 }
 0x38c   :  { %v2588_v19 = vpop.eup %2587 }
 0x38d   :  { %v648_v20 = vmul.f32 %v2588_v19, %v646_v18  ;;  %vm653_vm9 = vweird.f32 %v2588_v19 }
 0x38e   :  { %vm654_vm11 = vmor %vm652_vm10, %vm653_vm9 }
 0x38f   :  { %v649_v21 = vsub.f32 1.0, %v648_v20 }
 0x391   :  { %v650_v23 = vmul.f32 %v2588_v19, %v649_v21 }
 0x393   :  { %v651_v11 = vadd.f32 %v2588_v19, %v650_v23 }
 0x395   :  { %v655_v26 = vsel %vm654_vm11, %v2588_v19, %v651_v11 }
 0x396   :  { %v660_v27 = vsel %vm657_vm12, %v659_v25, %v655_v26 }
 0x397   :  { %v664_v28 = vmul.f32 %v660_v27, %v632_v62  ;;  %v663_v29 = vmul.f32 %v660_v27, %v631_v61  ;;  %v662_v32 = vmul.f32 %v660_v27, %v630_v56  ;;  %v661_v34 = vmul.f32 %v660_v27, %v629_v58 }
 0x399   :  { %680 = vmatpush.msra.mxu3 %v664_v28  ;;  %v914_v28 = vld [vmem:[%s3763_s0] sm:$0xff] }
 0x39b   :  { %681 = vmatpush.msra.mxu3 %v663_v29 }
 0x39d   :  { %682 = vmatpush.msra.mxu3 %v662_v32 }
 0x39f   :  { %683 = vmatpush.msra.mxu3 %v661_v34 }
 0x3a0   :  { %2455 = vmatmul.msk.f32.vlgmr.msra.gmra.mxu3 %vm349_vm0, %v458_v33 }
 0x3a1   :  { %748 = vmatpush.msrb.mxu3 %v3380_v14 }
 0x3a8   :  { %v705_v35 = vpop.trf.xlu2 }
 0x3a9   :  { %2456 = vmatmul.msk.f32.vlgmr.msrb.gmra.mxu3 %vm495_vm5, %v705_v35 }
 0x3b0   :  { %v706_v36 = vpop.trf.xlu2 }
 0x3b1   :  { %2457 = vmatmul.msk.f32.gmra.mxu3 %vm495_vm5, %v706_v36 }
 0x3b8   :  { %v707_v37 = vpop.trf.xlu2 }
 0x3b9   :  { %2458 = vmatmul.msk.f32.gmra.mxu3 %vm495_vm5, %v707_v37 }
 0x3c0   :  { %v708_v38 = vpop.trf.xlu2 }
 0x3c1   :  { %2459 = vmatmul.msk.f32.gmra.mxu3 %vm495_vm5, %v708_v38 }
 0x423   :  { %v3409_v39 = vpop.f32.mrf.mxu3 }
 0x42c   :  { %v750_v42 = vpop.f32.mrf.mxu3 }
 0x42d   :  { %v762_v43 = vsel %vm349_vm0, %v750_v42, -inf }
 0x42e   :  { %763 = vmax.xlane.f32.xlu1 %v762_v43 }
 0x434   :  { %v753_v44 = vpop.f32.mrf.mxu3 }
 0x435   :  { %v765_v14 = vsel %vm349_vm0, %v753_v44, -inf }
 0x436   :  { %766 = vmax.xlane.f32.xlu1 %v765_v14 }
 0x43c   :  { %v756_v45 = vpop.f32.mrf.mxu3 }
 0x43d   :  { %v768_v46 = vsel %vm349_vm0, %v756_v45, -inf }
 0x43e   :  { %769 = vmax.xlane.f32.xlu1 %v768_v46 }
 0x444   :  { %v759_v47 = vpop.f32.mrf.mxu3 }
 0x445   :  { %v771_v48 = vsel %vm349_vm0, %v759_v47, -inf }
 0x446   :  { %772 = vmax.xlane.f32.xlu1 %v771_v48 }
 0x4a1   :  { %v764_v49 = vpop.xlane.xlu1 %763 }
 0x4a2   :  { %v774_v50 = vsub.f32 %v750_v42, %v764_v49 }
 0x4a4   :  { %v778_v51 = vmul.f32 1.442695, %v774_v50 }
 0x4a6   :  { %2589 = vpow2.f32 %v778_v51 }
 0x4a9   :  { %v767_v53 = vpop.xlane.xlu1 %766 }
 0x4aa   :  { %v775_v54 = vsub.f32 %v753_v44, %v767_v53 }
 0x4ac   :  { %v3416_v55 = vpop.eup %2589  ;;  %v780_v56 = vmul.f32 1.442695, %v775_v54 }
 0x4ad   :  { %v786_v57 = vsel %vm349_vm0, %v3416_v55, 0.0 }
 0x4ae   :  { %2591 = vpow2.f32 %v780_v56  ;;  %787 = vadd.xlane.f32.xlu1 %v786_v57 }
 0x4b1   :  { %v770_v58 = vpop.xlane.xlu1 %769 }
 0x4b2   :  { %v776_v59 = vsub.f32 %v756_v45, %v770_v58 }
 0x4b4   :  { %v3420_v60 = vpop.eup %2591  ;;  %v782_v61 = vmul.f32 1.442695, %v776_v59 }
 0x4b5   :  { %v789_v63 = vsel %vm349_vm0, %v3420_v60, 0.0 }
 0x4b6   :  { %2593 = vpow2.f32 %v782_v61  ;;  %790 = vadd.xlane.f32.xlu2 %v789_v63 }
 0x4b9   :  { %v773_v0 = vpop.xlane.xlu1 %772 }
 0x4ba   :  { %v777_v1 = vsub.f32 %v759_v47, %v773_v0 }
 0x4bc   :  { %v3424_v2 = vpop.eup %2593  ;;  %v784_v4 = vmul.f32 1.442695, %v777_v1 }
 0x4bd   :  { %v792_v3 = vsel %vm349_vm0, %v3424_v2, 0.0 }
 0x4be   :  { %2595 = vpow2.f32 %v784_v4  ;;  %793 = vadd.xlane.f32.xlu1 %v792_v3 }
 0x4c4   :  { %v3428_v5 = vpop.eup %2595 }
 0x4c5   :  { %v795_v6 = vsel %vm349_vm0, %v3428_v5, 0.0 }
 0x4c6   :  { %796 = vadd.xlane.f32.xlu1 %v795_v6 }
 0x521   :  { %v788_v62 = vpop.xlane.xlu1 %787 }
 0x522   :  { %2597 = vrcp.f32 %v788_v62  ;;  %v809_v11 = vand.u32 2147483648, %v788_v62  ;;  %vm803_vm14 = vweird.f32 %v788_v62  ;;  %v807_v27 = vand.u32 2147483647, %v788_v62 }
 0x524   :  { %v810_v36 = vor.u32 1.1754944e-38, %v809_v11  ;;  %vm808_vm7 = vcmp.eq.f32.partialorder %v807_v27, 8.507059e+37  ;;  %v688_v27 = vadd.f32 %v3409_v39, %v3341_v41 }
 0x526   :  { %v917_v30 = vmul.f32 %v914_v28, %v688_v27 }
 0x528   :  { %v2598_v9 = vpop.eup %2597 }
 0x529   :  { %v791_v7 = vpop.xlane.xlu2 %790  ;;  %v799_v8 = vmul.f32 %v2598_v9, %v788_v62  ;;  %vm804_vm5 = vweird.f32 %v2598_v9 }
 0x52a   :  { %2599 = vrcp.f32 %v791_v7  ;;  %v823_v24 = vand.u32 2147483648, %v791_v7  ;;  %vm817_vm13 = vweird.f32 %v791_v7  ;;  %v821_v25 = vand.u32 2147483647, %v791_v7  ;;  %vm3436_vm1 = vmor %vm803_vm14, %vm804_vm5 }
 0x52b   :  { %v800_v15 = vsub.f32 1.0, %v799_v8 }
 0x52c   :  { %v824_v35 = vor.u32 1.1754944e-38, %v823_v24  ;;  %vm822_vm3 = vcmp.eq.f32.partialorder %v821_v25, 8.507059e+37  ;;  %v460_v24 = vpop.f32.mrf.mxu1 }
 0x52d   :  { %v801_v18 = vmul.f32 %v2598_v9, %v800_v15 }
 0x52f   :  { %v802_v23 = vadd.f32 %v2598_v9, %v801_v18 }
 0x530   :  { %v2600_v10 = vpop.eup %2599 }
 0x531   :  { %v813_v12 = vmul.f32 %v2600_v10, %v791_v7  ;;  %v794_v13 = vpop.xlane.xlu1 %793  ;;  %vm818_vm4 = vweird.f32 %v2600_v10  ;;  %v806_v34 = vsel %vm3436_vm1, %v2598_v9, %v802_v23  ;;  %v433_v23 = vld [vmem:[#allocation6 + $0x8] sm:$0xff] }
 0x532   :  { %2601 = vrcp.f32 %v794_v13  ;;  %vm3432_vm15 = vmor %vm817_vm13, %vm818_vm4  ;;  %v837_v29 = vand.u32 2147483648, %v794_v13  ;;  %v835_v33 = vand.u32 2147483647, %v794_v13  ;;  %vm831_vm6 = vweird.f32 %v794_v13 }
 0x533   :  { %v814_v16 = vsub.f32 1.0, %v813_v12  ;;  %v811_v44 = vsel %vm808_vm7, %v810_v36, %v806_v34  ;;  %v461_v25 = vadd.f32 %v460_v24, %v433_v23 }
 0x534   :  { %v838_v43 = vor.u32 1.1754944e-38, %v837_v29  ;;  %vm836_vm9 = vcmp.eq.f32.partialorder %v835_v33, 8.507059e+37  ;;  %v854_v49 = vmul.f32 %v3416_v55, %v811_v44  ;;  %v979_v29 = vld [vmem:[#allocation10] sm:$0xff] }
 0x535   :  { %v815_v17 = vmul.f32 %v2600_v10, %v814_v16 }
 0x536   :  { %v858_v59 = vsel %vm349_vm0, %v854_v49, 0.0 }
 0x537   :  { %v816_v20 = vadd.f32 %v2600_v10, %v815_v17 }
 0x538   :  { %v2602_v19 = vpop.eup %2601 }
 0x539   :  { %v827_v21 = vmul.f32 %v2602_v19, %v794_v13  ;;  %v797_v22 = vpop.xlane.xlu1 %796  ;;  %v820_v31 = vsel %vm3432_vm15, %v2600_v10, %v816_v20  ;;  %vm832_vm2 = vweird.f32 %v2602_v19 }
 0x53a   :  { %2603 = vrcp.f32 %v797_v22  ;;  %v825_v42 = vsel %vm822_vm3, %v824_v35, %v820_v31  ;;  %vm833_vm8 = vmor %vm831_vm6, %vm832_vm2  ;;  %v851_v50 = vand.u32 2147483648, %v797_v22  ;;  %v849_v52 = vand.u32 2147483647, %v797_v22 }
 0x53b   :  { %v828_v26 = vsub.f32 1.0, %v827_v21  ;;  %v855_v47 = vmul.f32 %v3420_v60, %v825_v42  ;;  %vm845_vm11 = vweird.f32 %v797_v22  ;;  %v982_v31 = vmul.f32 %v979_v29, %v688_v27 }
 0x53c   :  { %v852_v57 = vor.u32 1.1754944e-38, %v851_v50  ;;  %vm850_vm4 = vcmp.eq.f32.partialorder %v849_v52, 8.507059e+37 }
 0x53d   :  { %v829_v32 = vmul.f32 %v2602_v19, %v828_v26  ;;  %v859_v56 = vsel %vm349_vm0, %v855_v47, 0.0  ;;  %v984_v33 = vsel %vm349_vm0, %v982_v31, 0.0 }
 0x53e   :  { %v860_v55 = vadd.f32 %v859_v56, %v858_v59  ;;  %v985_v35 = vrot.slane %v984_v33, 4 }
 0x53f   :  { %v830_v37 = vadd.f32 %v2602_v19, %v829_v32  ;;  %v919_v32 = vsel %vm349_vm0, %v917_v30, 0.0 }
 0x540   :  { %v2604_v38 = vpop.eup %2603  ;;  %v920_v34 = vrot.slane %v919_v32, 4 }
 0x541   :  { %v834_v14 = vsel %vm833_vm8, %v2602_v19, %v830_v37  ;;  %v841_v45 = vmul.f32 %v2604_v38, %v797_v22  ;;  %vm846_vm10 = vweird.f32 %v2604_v38  ;;  %v986_v37 = vadd.f32 %v985_v35, %v984_v33 }
 0x542   :  { %v839_v46 = vsel %vm836_vm9, %v838_v43, %v834_v14  ;;  %vm847_vm12 = vmor %vm845_vm11, %vm846_vm10  ;;  %v921_v36 = vadd.f32 %v920_v34, %v919_v32 }
 0x543   :  { %v842_v48 = vsub.f32 1.0, %v841_v45  ;;  %v856_v53 = vmul.f32 %v3424_v2, %v839_v46  ;;  %v987_v44 = vrot.slane %v986_v37, 2 }
 0x544   :  { %v922_v39 = vrot.slane %v921_v36, 2 }
 0x545   :  { %v843_v51 = vmul.f32 %v2604_v38, %v842_v48  ;;  %v861_v60 = vsel %vm349_vm0, %v856_v53, 0.0 }
 0x546   :  { %v862_v0 = vadd.f32 %v861_v60, %v860_v55  ;;  %v923_v48 = vadd.f32 %v922_v39, %v921_v36 }
 0x547   :  { %v844_v54 = vadd.f32 %v2604_v38, %v843_v51 }
 0x549   :  { %v848_v58 = vsel %vm847_vm12, %v2604_v38, %v844_v54  ;;  %v924_v54 = vrot.slane %v923_v48, 1 }
 0x54a   :  { %v853_v61 = vsel %vm850_vm4, %v852_v57, %v848_v58 }
 0x54b   :  { %v857_v63 = vmul.f32 %v3428_v5, %v853_v61  ;;  %v925_v60 = vadd.f32 %v924_v54, %v923_v48 }
 0x54d   :  { %v863_v1 = vsel %vm349_vm0, %v857_v63, 0.0 }
 0x54e   :  { %v864_v2 = vadd.f32 %v863_v1, %v862_v0 }
 0x550   :  { %v865_v4 = vrot.slane %v864_v2, 4 }
 0x552   :  { %v866_v3 = vadd.f32 %v865_v4, %v864_v2 }
 0x554   :  { %v867_v6 = vrot.slane %v866_v3, 2 }
 0x556   :  { %v868_v62 = vadd.f32 %v867_v6, %v866_v3 }
 0x558   :  { %v869_v7 = vrot.slane %v868_v62, 1 }
 0x55a   :  { %v870_v9 = vadd.f32 %v869_v7, %v868_v62 }
 0x55c   :  { %v871_v8 = vadd.f32 1e-09, %v870_v9 }
 0x55e   :  { %2605 = vrcp.f32 %v871_v8  ;;  %v883_v15 = vand.u32 2147483648, %v871_v8  ;;  %v881_v17 = vand.u32 2147483647, %v871_v8  ;;  %vm877_vm13 = vweird.f32 %v871_v8 }
 0x560   :  { %v884_v18 = vor.u32 1.1754944e-38, %v883_v15  ;;  %vm882_vm15 = vcmp.eq.f32.partialorder %v881_v17, 8.507059e+37 }
 0x564   :  { %v2606_v10 = vpop.eup %2605 }
 0x565   :  { %v873_v12 = vmul.f32 %v2606_v10, %v871_v8  ;;  %vm878_vm5 = vweird.f32 %v2606_v10 }
 0x566   :  { %vm879_vm14 = vmor %vm877_vm13, %vm878_vm5 }
 0x567   :  { %v874_v13 = vsub.f32 1.0, %v873_v12 }
 0x569   :  { %v875_v16 = vmul.f32 %v2606_v10, %v874_v13 }
 0x56b   :  { %v876_v5 = vadd.f32 %v2606_v10, %v875_v16 }
 0x56d   :  { %v880_v19 = vsel %vm879_vm14, %v2606_v10, %v876_v5 }
 0x56e   :  { %v885_v20 = vsel %vm882_vm15, %v884_v18, %v880_v19 }
 0x56f   :  { %v889_v21 = vmul.f32 %v885_v20, %v857_v63  ;;  %v888_v22 = vmul.f32 %v885_v20, %v856_v53  ;;  %v887_v11 = vmul.f32 %v885_v20, %v855_v47  ;;  %v886_v26 = vmul.f32 %v885_v20, %v854_v49 }
 0x570   :  { %v988_v49 = vadd.f32 %v987_v44, %v986_v37 }
 0x571   :  { %905 = vmatpush.msrb.mxu0 %v889_v21 }
 0x572   :  { %v989_v56 = vrot.slane %v988_v49, 1 }
 0x573   :  { %906 = vmatpush.msrb.mxu0 %v888_v22 }
 0x574   :  { %v990_v55 = vadd.f32 %v989_v56, %v988_v49 }
 0x575   :  { %907 = vmatpush.msrb.mxu0 %v887_v11  ;;  %v1044_v11 = vlaneseq }
 0x577   :  { %908 = vmatpush.msrb.mxu0 %v886_v26 }
 0x578   :  { %2460 = vmatmul.msk.f32.vlgmr.msrb.gmra.mxu0 %vm349_vm0, %v461_v25 }
 0x5f5   :  { %v910_v38 = vpop.f32.mrf.mxu0 }
 0x5f6   :  { %v913_v42 = vadd.f32 %v910_v38, %v3339_v40 }
 0x5f8   :  { %v918_v43 = vmul.f32 %v914_v28, %v913_v42  ;;  %v983_v41 = vmul.f32 %v979_v29, %v913_v42  ;;  %v1045_v29 = vshrl.u32 %v1044_v11, 7 }
 0x5fa   :  { %v927_v14 = vsel %vm349_vm0, %v918_v43, 0.0  ;;  %v992_v45 = vsel %vm349_vm0, %v983_v41, 0.0  ;;  %v1048_v35 = vadd.s32 24, %v1045_v29  ;;  %v1047_v44 = vadd.s32 16, %v1045_v29 }
 0x5fb   :  { %v928_v46 = vrot.slane %v927_v14, 4  ;;  %v993_v47 = vrot.slane %v992_v45, 4 }
 0x5fd   :  { %v929_v50 = vadd.f32 %v928_v46, %v927_v14  ;;  %v994_v51 = vadd.f32 %v993_v47, %v992_v45 }
 0x5ff   :  { %v930_v52 = vrot.slane %v929_v50, 2  ;;  %v995_v53 = vrot.slane %v994_v51, 2 }
 0x601   :  { %v931_v57 = vadd.f32 %v930_v52, %v929_v50  ;;  %v996_v40 = vadd.f32 %v995_v53, %v994_v51  ;;  %v3122_v50 = vmov 0.0   ;;  %v3123_v51 = vmov 1.0  }
 0x602   :  { %1214 = vmatpush.msrb.mxu2 %v3122_v50  ;;  %v1046_v53 = vadd.s32 8, %v1045_v29  ;;  %1171 = vmatpush.msra.mxu0 %v3122_v50 }
 0x603   :  { %v932_v58 = vrot.slane %v931_v57, 1  ;;  %v997_v59 = vrot.slane %v996_v40, 1 }
 0x605   :  { %v933_v61 = vadd.f32 %v932_v58, %v931_v57  ;;  %v998_v63 = vadd.f32 %v997_v59, %v996_v40 }
 0x607   :  { %v934_v0 = vadd.f32 %v933_v61, %v925_v60  ;;  %v999_v1 = vadd.f32 %v998_v63, %v990_v55 }
 0x609   :  { %v935_v2 = vmul.f32 0.0625, %v934_v0  ;;  %v1000_v4 = vmul.f32 0.0625, %v999_v1 }
 0x60b   :  { %v3463_v3 = vsub.f32 %v917_v30, %v935_v2  ;;  %v3465_v6 = vsub.f32 %v918_v43, %v935_v2  ;;  %v3467_v62 = vsub.f32 %v982_v31, %v1000_v4  ;;  %v3469_v7 = vsub.f32 %v983_v41, %v1000_v4 }
 0x60c   :  { %v1050_v30 = vand.u32 127, %v1044_v11  ;;  %v2568_v11 = vld [vmem:[#allocation13] ss:$0 sm:$0xff] }
 0x60d   :  { %v938_v9 = vmul.f32 %v3463_v3, %v3463_v3  ;;  %v947_v8 = vmul.f32 %v3465_v6, %v3465_v6  ;;  %v1003_v10 = vmul.f32 %v3467_v62, %v3467_v62  ;;  %v1012_v12 = vmul.f32 %v3469_v7, %v3469_v7 }
 0x60e   :  { %v1051_v36 = vadd.s32 128, %v1050_v30  ;;  %v1058_v41 = vsub.s32 %v1050_v30, %v1048_v35  ;;  %v1056_v52 = vsub.s32 %v1050_v30, %v1047_v44  ;;  %v1052_v56 = vsub.s32 %v1050_v30, %v1045_v29 }
 0x60f   :  { %v939_v13 = vsel %vm349_vm0, %v938_v9, 0.0  ;;  %v948_v15 = vsel %vm349_vm0, %v947_v8, 0.0  ;;  %v1004_v16 = vsel %vm349_vm0, %v1003_v10, 0.0  ;;  %v1013_v17 = vsel %vm349_vm0, %v1012_v12, 0.0 }
 0x610   :  { %v940_v5 = vrot.slane %v939_v13, 4  ;;  %v949_v18 = vrot.slane %v948_v15, 4  ;;  %v1005_v19 = vrot.slane %v1004_v16, 4  ;;  %v1014_v20 = vrot.slane %v1013_v17, 4 }
 0x611   :  { %v3483_v39 = vsub.s32 %v1051_v36, %v1048_v35  ;;  %vm1115_vm1 = vcmp.eq.s32.totalorder %v1058_v41, 32  ;;  %v3489_v54 = vsub.s32 %v1051_v36, %v1047_v44  ;;  %v3492_v57 = vsub.s32 %v1051_v36, %v1045_v29 }
 0x612   :  { %v941_v21 = vadd.f32 %v940_v5, %v939_v13  ;;  %v950_v22 = vadd.f32 %v949_v18, %v948_v15  ;;  %v1006_v23 = vadd.f32 %v1005_v19, %v1004_v16  ;;  %v1015_v24 = vadd.f32 %v1014_v20, %v1013_v17  ;;  %2469 = vmatpush.msk.msrb.mxu1 %vm1115_vm1, %v3123_v51  ;;  %v915_v15 = vld [vmem:[#allocation7] sm:$0x1]  ;;  %v980_v17 = vld [vmem:[#allocation12] sm:$0x1] }
 0x613   :  { %vm1393_vm2 = vcmp.eq.s32.totalorder %v3483_v39, 128  ;;  %vm1113_vm3 = vcmp.eq.s32.totalorder %v1056_v52, 32  ;;  %v1054_v59 = vsub.s32 %v1050_v30, %v1046_v53  ;;  %vm1391_vm6 = vcmp.eq.s32.totalorder %v3489_v54, 128 }
 0x614   :  { %v942_v25 = vrot.slane %v941_v21, 2  ;;  %v951_v26 = vrot.slane %v950_v22, 2  ;;  %v1007_v27 = vrot.slane %v1006_v23, 2  ;;  %v1016_v28 = vrot.slane %v1015_v24, 2  ;;  %2506 = vmatpush.msk.msra.mxu3 %vm1393_vm2, %v3123_v51  ;;  %2470 = vmatpush.msk.msrb.mxu1 %vm1113_vm3, %v3123_v51 }
 0x615   :  { %v3496_v60 = vsub.s32 %v1051_v36, %v1046_v53  ;;  %vm1111_vm7 = vcmp.eq.s32.totalorder %v1054_v59, 32  ;;  %vm1109_vm8 = vcmp.eq.s32.totalorder %v1052_v56, 32  ;;  %vm1387_vm10 = vcmp.eq.s32.totalorder %v3492_v57, 128 }
 0x616   :  { %v943_v31 = vadd.f32 %v942_v25, %v941_v21  ;;  %v952_v32 = vadd.f32 %v951_v26, %v950_v22  ;;  %v1008_v33 = vadd.f32 %v1007_v27, %v1006_v23  ;;  %v1017_v34 = vadd.f32 %v1016_v28, %v1015_v24  ;;  %2507 = vmatpush.msk.msra.mxu3 %vm1391_vm6, %v3123_v51  ;;  %v2567_v23 = vld [vmem:[#allocation9] ss:$0 sm:$0xff] }
 0x617   :  { %2471 = vmatpush.msk.msrb.mxu1 %vm1111_vm7, %v3123_v51  ;;  %vm1389_vm9 = vcmp.eq.s32.totalorder %v3496_v60, 128  ;;  %vm1081_vm11 = vcmp.eq.s32.totalorder %v1058_v41, 0  ;;  %vm1234_vm12 = vcmp.eq.s32.totalorder %v1058_v41, 64  ;;  %vm1312_vm4 = vcmp.eq.s32.totalorder %v1058_v41, 96 }
 0x618   :  { %v944_v37 = vrot.slane %v943_v31, 1  ;;  %v953_v38 = vrot.slane %v952_v32, 1  ;;  %v1009_v42 = vrot.slane %v1008_v33, 1  ;;  %v1018_v43 = vrot.slane %v1017_v34, 1  ;;  %2508 = vmatpush.msk.msra.mxu3 %vm1389_vm9, %v3123_v51  ;;  %2485 = vmatpush.msk.msrb.mxu0 %vm1234_vm12, %v3123_v51 }
 0x619   :  { %2472 = vmatpush.msk.msrb.mxu1 %vm1109_vm8, %v3123_v51  ;;  %vm1553_vm5 = vcmp.eq.s32.totalorder %v3483_v39, 192  ;;  %vm1079_vm13 = vcmp.eq.s32.totalorder %v1056_v52, 0  ;;  %vm1232_vm14 = vcmp.eq.s32.totalorder %v1056_v52, 64  ;;  %vm1310_vm15 = vcmp.eq.s32.totalorder %v1056_v52, 96  ;;  %2495 = vmatpush.msk.msra.mxu2 %vm1312_vm4, %v3123_v51 }
 0x61a   :  { %v945_v14 = vadd.f32 %v944_v37, %v943_v31  ;;  %v954_v45 = vadd.f32 %v953_v38, %v952_v32  ;;  %v1010_v46 = vadd.f32 %v1009_v42, %v1008_v33  ;;  %v1019_v47 = vadd.f32 %v1018_v43, %v1017_v34  ;;  %2509 = vmatpush.msk.msra.mxu3 %vm1387_vm10, %v3123_v51 }
 0x61b   :  { %2475 = vmatpush.msk.msra.mxu1 %vm1081_vm11, %v3123_v51  ;;  %vm1551_vm1 = vcmp.eq.s32.totalorder %v3489_v54, 192  ;;  %vm1077_vm2 = vcmp.eq.s32.totalorder %v1054_v59, 0  ;;  %vm1230_vm3 = vcmp.eq.s32.totalorder %v1054_v59, 64  ;;  %vm1308_vm6 = vcmp.eq.s32.totalorder %v1054_v59, 96  ;;  %2486 = vmatpush.msk.msrb.mxu0 %vm1232_vm14, %v3123_v51 }
 0x61c   :  { %v955_v48 = vadd.f32 %v954_v45, %v945_v14  ;;  %v1020_v49 = vadd.f32 %v1019_v47, %v1010_v46  ;;  %2526 = vmatpush.msk.msrb.mxu3 %vm1553_vm5, %v3123_v51  ;;  %2496 = vmatpush.msk.msra.mxu2 %vm1310_vm15, %v3123_v51  ;;  %vm1549_vm7 = vcmp.eq.s32.totalorder %v3496_v60, 192  ;;  %vm1075_vm8 = vcmp.eq.s32.totalorder %v1052_v56, 0 }
 0x61d   :  { %2476 = vmatpush.msk.msra.mxu1 %vm1079_vm13, %v3123_v51  ;;  %vm1228_vm9 = vcmp.eq.s32.totalorder %v1052_v56, 64  ;;  %vm1306_vm10 = vcmp.eq.s32.totalorder %v1052_v56, 96  ;;  %2487 = vmatpush.msk.msrb.mxu0 %vm1230_vm3, %v3123_v51  ;;  %vm1547_vm11 = vcmp.eq.s32.totalorder %v3492_v57, 192  ;;  %vm1073_vm3 = vcmask 1042432  }
 0x61e   :  { %v956_v40 = vmul.f32 0.0625, %v955_v48  ;;  %v1021_v58 = vmul.f32 0.0625, %v1020_v49  ;;  %2527 = vmatpush.msk.msrb.mxu3 %vm1551_vm1, %v3123_v51  ;;  %2497 = vmatpush.msk.msra.mxu2 %vm1308_vm6, %v3123_v51  ;;  %vm1069_vm1 = vcmask 1040384   ;;  %vm1473_vm6 = vcmp.eq.s32.totalorder %v3483_v39, 160 }
 0x61f   :  { %2477 = vmatpush.msk.msra.mxu1 %vm1077_vm2, %v3123_v51  ;;  %2488 = vmatpush.msk.msrb.mxu0 %vm1228_vm9, %v3123_v51  ;;  %vm1071_vm2 = vcmask 1041408   ;;  %vm1467_vm9 = vcmp.eq.s32.totalorder %v3492_v57, 160 }
 0x620   :  { %v957_v61 = vadd.f32 1e-05, %v956_v40  ;;  %v3498_v55 = vadd.f32 1e-05, %v1021_v58  ;;  %2528 = vmatpush.msk.msrb.mxu3 %vm1549_vm7, %v3123_v51  ;;  %2498 = vmatpush.msk.msra.mxu2 %vm1306_vm10, %v3123_v51  ;;  %vm1471_vm7 = vcmp.eq.s32.totalorder %v3489_v54, 160  ;;  %vm1633_vm10 = vcmp.eq.s32.totalorder %v3483_v39, 224 }
 0x621   :  { %2478 = vmatpush.msk.msra.mxu1 %vm1075_vm8, %v3123_v51  ;;  %vm1469_vm8 = vcmp.eq.s32.totalorder %v3496_v60, 160 }
 0x622   :  { %2607 = vrsqrt.f32 %v957_v61  ;;  %2529 = vmatpush.msk.msrb.mxu3 %vm1547_vm11, %v3123_v51  ;;  %vm964_vm5 = vweird.f32 %v957_v61  ;;  %vm1029_vm14 = vweird.f32 %v3498_v55  ;;  %vm1631_vm11 = vcmp.eq.s32.totalorder %v3489_v54, 224 }
 0x623   :  { %2609 = vrsqrt.f32 %v3498_v55 }
 0x628   :  { %v2608_v63 = vpop.eup %2607 }
 0x629   :  { %v2610_v0 = vpop.eup %2609  ;;  %v959_v1 = vmul.f32 %v2608_v63, %v957_v61  ;;  %vm965_vm12 = vweird.f32 %v2608_v63 }
 0x62a   :  { %v1024_v2 = vmul.f32 %v2610_v0, %v3498_v55  ;;  %vm1030_vm4 = vweird.f32 %v2610_v0  ;;  %vm966_vm13 = vmor %vm964_vm5, %vm965_vm12  ;;  %vm1629_vm12 = vcmp.eq.s32.totalorder %v3496_v60, 224  ;;  %v1758_v60 = vld [vmem:[#allocation15 + $0x1f8] sm:$0xff] }
 0x62b   :  { %v960_v4 = vmul.f32 %v2608_v63, %v959_v1  ;;  %vm1031_vm15 = vmor %vm1029_vm14, %vm1030_vm4  ;;  %vm1627_vm4 = vcmp.eq.s32.totalorder %v3492_v57, 224  ;;  %v1755_v57 = vld [vmem:[#allocation15 + $0x1e0] sm:$0xff] }
 0x62c   :  { %v1025_v9 = vmul.f32 %v2610_v0, %v1024_v2 }
 0x62d   :  { %v961_v8 = vmul.f32 0.5, %v960_v4 }
 0x62e   :  { %v1026_v10 = vmul.f32 0.5, %v1025_v9 }
 0x62f   :  { %v962_v12 = vsub.f32 1.5, %v961_v8 }
 0x630   :  { %v1027_v13 = vsub.f32 1.5, %v1026_v10 }
 0x631   :  { %v963_v16 = vmul.f32 %v2608_v63, %v962_v12 }
 0x632   :  { %v1028_v5 = vmul.f32 %v2610_v0, %v1027_v13 }
 0x633   :  { %v967_v18 = vsel %vm966_vm13, %v2608_v63, %v963_v16 }
 0x634   :  { %v968_v19 = vmul.f32 %v967_v18, %v915_v15  ;;  %v1032_v20 = vsel %vm1031_vm15, %v2610_v0, %v1028_v5 }
 0x635   :  { %v1033_v21 = vmul.f32 %v1032_v20, %v980_v17 }
 0x636   :  { %v970_v22 = vperm.slane %v968_v19, 0 }
 0x637   :  { %v1035_v24 = vperm.slane %v1033_v21, 0 }
 0x638   :  { %v972_v25 = vmul.f32 %v970_v22, %v3463_v3  ;;  %v977_v26 = vmul.f32 %v970_v22, %v3465_v6 }
 0x639   :  { %v1037_v27 = vmul.f32 %v1035_v24, %v3467_v62  ;;  %v1042_v28 = vmul.f32 %v1035_v24, %v3469_v7 }
 0x63a   :  { %v3534_v29 = vadd.f32 %v2567_v23, %v972_v25  ;;  %v3536_v30 = vadd.f32 %v2567_v23, %v977_v26  ;;  %v1725_v25 = vld [vmem:[#allocation15 + $0xf0] sm:$0xff]  ;;  %v1726_v26 = vld [vmem:[#allocation15 + $0xf8] sm:$0xff] }
 0x63b   :  { %v3538_v31 = vadd.f32 %v2568_v11, %v1037_v27  ;;  %v3540_v32 = vadd.f32 %v2568_v11, %v1042_v28  ;;  %v1756_v27 = vld [vmem:[#allocation15 + $0x1e8] sm:$0xff]  ;;  %v1723_v28 = vld [vmem:[#allocation15 + $0xe0] sm:$0xff] }
 0x63c   :  { %v1100_v33 = vrot.slane %v3534_v29, 1  ;;  %v1061_v3 = vrot.slane %v3536_v30, 7  ;;  %v1375_v6 = vrot.slane %v3534_v29, 4  ;;  %v1377_v62 = vrot.slane %v3536_v30, 3 }
 0x63d   :  { %v1102_v7 = vrot.slane %v3538_v31, 7  ;;  %v1104_v34 = vrot.slane %v3540_v32, 6  ;;  %v1064_v35 = vrot.slane %v3538_v31, 6  ;;  %v1067_v36 = vrot.slane %v3540_v32, 5 }
 0x63e   :  { %v1106_v37 = vsel %vm1069_vm1, %v1100_v33, %v3536_v30  ;;  %v1070_v38 = vsel %vm1069_vm1, %v3534_v29, %v1061_v3  ;;  %v1379_v42 = vrot.slane %v3538_v31, 2  ;;  %v1381_v43 = vrot.slane %v3540_v32, 1  ;;  %v1722_v33 = vld [vmem:[#allocation15 + $0xd8] sm:$0xff]  ;;  %v1752_v3 = vld [vmem:[#allocation15 + $0x1c8] sm:$0xff] }
 0x63f   :  { %v1107_v41 = vsel %vm1071_vm2, %v1106_v37, %v1102_v7  ;;  %v1072_v44 = vsel %vm1071_vm2, %v1070_v38, %v1064_v35  ;;  %v1383_v14 = vsel %vm1069_vm1, %v1375_v6, %v1377_v62  ;;  %v1219_v45 = vrot.slane %v3534_v29, 2  ;;  %v1719_v6 = vld [vmem:[#allocation15 + $0xc0] sm:$0xff]  ;;  %v1749_v62 = vld [vmem:[#allocation15 + $0x1b0] sm:$0xff]  ;;  %v1720_v7 = vld [vmem:[#allocation15 + $0xc8] sm:$0xff] }
 0x640   :  { %v1108_v46 = vsel %vm1073_vm3, %v1107_v41, %v1104_v34  ;;  %v1074_v47 = vsel %vm1073_vm3, %v1072_v44, %v1067_v36  ;;  %v1384_v48 = vsel %vm1071_vm2, %v1383_v14, %v1379_v42  ;;  %v1221_v49 = vrot.slane %v3536_v30, 1  ;;  %v1750_v34 = vld [vmem:[#allocation15 + $0x1b8] sm:$0xff]  ;;  %v1717_v35 = vld [vmem:[#allocation15 + $0xb0] sm:$0xff]  ;;  %v1747_v36 = vld [vmem:[#allocation15 + $0x1a0] sm:$0xff] }
 0x641   :  { %2473 = vmatmul.msk.f32.vlgmr.msrb.gmra.mxu1 %vm349_vm0, %v1108_v46  ;;  %2474 = vmatmul.msk.f32.vlgmr.msra.gmra.mxu0 %vm349_vm0, %v1108_v46  ;;  %v1385_v52 = vsel %vm1073_vm3, %v1384_v48, %v1381_v43  ;;  %v1297_v53 = vrot.slane %v3534_v29, 3  ;;  %v1299_v56 = vrot.slane %v3536_v30, 2  ;;  %v1301_v58 = vrot.slane %v3538_v31, 1  ;;  %v1718_v37 = vld [vmem:[#allocation15 + $0xb8] sm:$0xff]  ;;  %v1748_v38 = vld [vmem:[#allocation15 + $0x1a8] sm:$0xff]  ;;  %v1715_v42 = vld [vmem:[#allocation15 + $0xa0] sm:$0xff] }
 0x642   :  { %2480 = vmatmul.msk.f32.vlgmr.msrb.gmra.mxu2 %vm349_vm0, %v1074_v47  ;;  %2510 = vmatmul.msk.f32.vlgmr.msra.gmra.mxu3 %vm349_vm0, %v1385_v52  ;;  %v1225_v40 = vsel %vm1069_vm1, %v1219_v45, %v1221_v49  ;;  %v1535_v59 = vrot.slane %v3534_v29, 6  ;;  %v1537_v61 = vrot.slane %v3536_v30, 5  ;;  %v1539_v63 = vrot.slane %v3538_v31, 4  ;;  %v1745_v43 = vld [vmem:[#allocation15 + $0x190] sm:$0xff]  ;;  %v1716_v41 = vld [vmem:[#allocation15 + $0xa8] sm:$0xff]  ;;  %v1746_v44 = vld [vmem:[#allocation15 + $0x198] sm:$0xff] }
 0x643   :  { %v1303_v55 = vsel %vm1069_vm1, %v1297_v53, %v1299_v56  ;;  %1290 = vmatpush.msrb.mxu1 %v3122_v50  ;;  %1368 = vmatpush.msra.mxu0 %v3122_v50  ;;  %v1226_v1 = vsel %vm1071_vm2, %v1225_v40, %v3538_v31  ;;  %v1223_v2 = vrot.slane %v3540_v32, 7  ;;  %v1541_v8 = vrot.slane %v3540_v32, 3  ;;  %v1713_v14 = vld [vmem:[#allocation15 + $0x90] sm:$0xff]  ;;  %v1743_v45 = vld [vmem:[#allocation15 + $0x180] sm:$0xff]  ;;  %v1714_v46 = vld [vmem:[#allocation15 + $0x98] sm:$0xff] }
 0x644   :  { %v1543_v0 = vsel %vm1069_vm1, %v1535_v59, %v1537_v61  ;;  %1508 = vmatpush.msrb.mxu2 %v3122_v50  ;;  %v1304_v4 = vsel %vm1071_vm2, %v1303_v55, %v1301_v58  ;;  %v1455_v10 = vrot.slane %v3534_v29, 5  ;;  %v1457_v12 = vrot.slane %v3536_v30, 4  ;;  %v1711_v48 = vld [vmem:[#allocation15 + $0x80] sm:$0xff]  ;;  %v1741_v49 = vld [vmem:[#allocation15 + $0x170] sm:$0xff]  ;;  %v1742_v53 = vld [vmem:[#allocation15 + $0x178] sm:$0xff] }
 0x645   :  { %v1544_v9 = vsel %vm1071_vm2, %v1543_v0, %v1539_v63  ;;  %v1227_v13 = vsel %vm1073_vm3, %v1226_v1, %v1223_v2  ;;  %v1305_v15 = vsel %vm1073_vm3, %v1304_v4, %v3540_v32  ;;  %v1459_v17 = vrot.slane %v3538_v31, 3  ;;  %v1709_v56 = vld [vmem:[#allocation15 + $0x70] sm:$0xff]  ;;  %v1739_v40 = vld [vmem:[#allocation15 + $0x160] sm:$0xff]  ;;  %v1710_v58 = vld [vmem:[#allocation15 + $0x78] sm:$0xff] }
 0x646   :  { %v1545_v16 = vsel %vm1073_vm3, %v1544_v9, %v1541_v8  ;;  %v1463_v5 = vsel %vm1069_vm1, %v1455_v10, %v1457_v12  ;;  %v1461_v19 = vrot.slane %v3540_v32, 2  ;;  %v1615_v20 = vrot.slane %v3534_v29, 7  ;;  %v1753_v29 = vld [vmem:[#allocation15 + $0x1d0] sm:$0xff]  ;;  %v1740_v59 = vld [vmem:[#allocation15 + $0x168] sm:$0xff]  ;;  %v1707_v61 = vld [vmem:[#allocation15 + $0x60] sm:$0xff] }
 0x647   :  { %v1464_v18 = vsel %vm1071_vm2, %v1463_v5, %v1459_v17  ;;  %v1617_v21 = vrot.slane %v3536_v30, 6  ;;  %v1619_v23 = vrot.slane %v3538_v31, 5  ;;  %v1621_v11 = vrot.slane %v3540_v32, 4  ;;  %v1724_v30 = vld [vmem:[#allocation15 + $0xe8] sm:$0xff]  ;;  %v1721_v31 = vld [vmem:[#allocation15 + $0xd0] sm:$0xff]  ;;  %v1751_v32 = vld [vmem:[#allocation15 + $0x1c0] sm:$0xff] }
 0x648   :  { %v1465_v22 = vsel %vm1073_vm3, %v1464_v18, %v1461_v19  ;;  %v1737_v55 = vld [vmem:[#allocation15 + $0x150] sm:$0xff]  ;;  %v1708_v63 = vld [vmem:[#allocation15 + $0x68] sm:$0xff]  ;;  %v1738_v0 = vld [vmem:[#allocation15 + $0x158] sm:$0xff] }
 0x649   :  { %2479 = vmatmul.msk.f32.vlgmr.msra.gmra.mxu1 %vm349_vm0, %v1074_v47  ;;  %2489 = vmatmul.msk.f32.vlgmr.msrb.gmra.mxu0 %vm349_vm0, %v1227_v13  ;;  %v1623_v24 = vsel %vm1069_vm1, %v1615_v20, %v1617_v21  ;;  %v1744_v47 = vld [vmem:[#allocation15 + $0x188] sm:$0xff]  ;;  %v1705_v1 = vld [vmem:[#allocation15 + $0x50] sm:$0xff]  ;;  %v1735_v2 = vld [vmem:[#allocation15 + $0x140] sm:$0xff] }
 0x64a   :  { %2499 = vmatmul.msk.f32.vlgmr.msra.gmra.mxu2 %vm349_vm0, %v1305_v15  ;;  %2530 = vmatmul.msk.f32.vlgmr.msrb.gmra.mxu3 %vm349_vm0, %v1545_v16  ;;  %v1624_v39 = vsel %vm1071_vm2, %v1623_v24, %v1619_v23  ;;  %v1706_v4 = vld [vmem:[#allocation15 + $0x58] sm:$0xff]  ;;  %v1736_v9 = vld [vmem:[#allocation15 + $0x148] sm:$0xff]  ;;  %v1703_v8 = vld [vmem:[#allocation15 + $0x40] sm:$0xff] }
 0x64b   :  { %2516 = vmatpush.msk.msrb.mxu0 %vm1473_vm6, %v3123_v51  ;;  %1428 = vmatpush.msra.mxu1 %v3122_v50  ;;  %v1625_v54 = vsel %vm1073_vm3, %v1624_v39, %v1621_v11  ;;  %v1733_v10 = vld [vmem:[#allocation15 + $0x130] sm:$0xff]  ;;  %v1704_v12 = vld [vmem:[#allocation15 + $0x48] sm:$0xff]  ;;  %v1702_v18 = vld [vmem:[#allocation15 + $0x38] sm:$0xff] }
 0x64c   :  { %1668 = vmatpush.msra.mxu2 %v3122_v50  ;;  %v1732_v19 = vld [vmem:[#allocation15 + $0x128] sm:$0xff]  ;;  %v1699_v23 = vld [vmem:[#allocation15 + $0x20] sm:$0xff]  ;;  %v1729_v24 = vld [vmem:[#allocation15 + $0x110] sm:$0xff] }
 0x64d   :  { %2517 = vmatpush.msk.msrb.mxu0 %vm1471_vm7, %v3123_v51  ;;  %v1700_v39 = vld [vmem:[#allocation15 + $0x28] sm:$0xff]  ;;  %v1730_v11 = vld [vmem:[#allocation15 + $0x118] sm:$0xff] }
 0x64f   :  { %2518 = vmatpush.msk.msrb.mxu0 %vm1469_vm8, %v3123_v51 }
 0x651   :  { %2490 = vmatmul.msk.f32.vlgmr.msrb.gmra.mxu1 %vm349_vm0, %v1227_v13  ;;  %2500 = vmatmul.msk.f32.vlgmr.msra.gmra.mxu0 %vm349_vm0, %v1305_v15  ;;  %v1734_v13 = vld [vmem:[#allocation15 + $0x138] sm:$0xff]  ;;  %v1701_v15 = vld [vmem:[#allocation15 + $0x30] sm:$0xff] }
 0x652   :  { %2515 = vmatmul.msk.f32.vlgmr.msrb.gmra.mxu2 %vm349_vm0, %v1465_v22  ;;  %2519 = vmatpush.msk.msrb.mxu0 %vm1467_vm9, %v3123_v51 }
 0x653   :  { %1588 = vmatpush.msrb.mxu1 %v3122_v50  ;;  %v1757_v50 = vld [vmem:[#allocation15 + $0x1f0] sm:$0xff]  ;;  %1805 = vmatpush.msrb.mxu2 %v1726_v26  ;;  %v1696_v26 = vld [vmem:[#allocation15 + $0x8] sm:$0xff] }
 0x654   :  { %2536 = vmatpush.msk.msra.mxu0 %vm1633_vm10, %v3123_v51  ;;  %1785 = vmatpush.msra.mxu3 %v1757_v50  ;;  %v1727_v50 = vld [vmem:[#allocation15 + $0x100] sm:$0xff] }
 0x655   :  { %1806 = vmatpush.msrb.mxu2 %v1724_v30 }
 0x656   :  { %2537 = vmatpush.msk.msra.mxu0 %vm1631_vm11, %v3123_v51  ;;  %1786 = vmatpush.msra.mxu3 %v1755_v57  ;;  %v1695_v57 = vld [vmem:[#allocation15] sm:$0xff] }
 0x657   :  { %1807 = vmatpush.msrb.mxu2 %v1722_v33 }
 0x658   :  { %2538 = vmatpush.msk.msra.mxu0 %vm1629_vm12, %v3123_v51  ;;  %1787 = vmatpush.msra.mxu3 %v1753_v29 }
 0x659   :  { %2505 = vmatmul.msk.f32.vlgmr.msra.gmra.mxu1 %vm349_vm0, %v1385_v52  ;;  %2520 = vmatmul.msk.f32.vlgmr.msrb.gmra.mxu0 %vm349_vm0, %v1465_v22  ;;  %v1712_v52 = vld [vmem:[#allocation15 + $0x88] sm:$0xff] }
 0x65a   :  { %2535 = vmatmul.msk.f32.vlgmr.msra.gmra.mxu2 %vm349_vm0, %v1625_v54  ;;  %2539 = vmatpush.msk.msra.mxu0 %vm1627_vm4, %v3123_v51  ;;  %v1754_v51 = vld [vmem:[#allocation15 + $0x1d8] sm:$0xff] }
 0x65b   :  { %1765 = vmatpush.msra.mxu1 %v1725_v25  ;;  %1788 = vmatpush.msra.mxu3 %v1751_v32  ;;  %v1728_v25 = vld [vmem:[#allocation15 + $0x108] sm:$0xff] }
 0x65c   :  { %1825 = vmatpush.msrb.mxu0 %v1758_v60  ;;  %1808 = vmatpush.msrb.mxu2 %v1720_v7  ;;  %v1698_v60 = vld [vmem:[#allocation15 + $0x18] sm:$0xff] }
 0x65d   :  { %1766 = vmatpush.msra.mxu1 %v1723_v28  ;;  %1789 = vmatpush.msra.mxu3 %v1749_v62 }
 0x65e   :  { %1826 = vmatpush.msrb.mxu0 %v1756_v27  ;;  %1809 = vmatpush.msrb.mxu2 %v1718_v37 }
 0x65f   :  { %1767 = vmatpush.msra.mxu1 %v1721_v31  ;;  %1790 = vmatpush.msra.mxu3 %v1747_v36 }
 0x660   :  { %1827 = vmatpush.msrb.mxu0 %v1754_v51  ;;  %1810 = vmatpush.msrb.mxu2 %v1716_v41 }
 0x661   :  { %2525 = vmatmul.msk.f32.vlgmr.msrb.gmra.mxu1 %vm349_vm0, %v1545_v16  ;;  %2540 = vmatmul.msk.f32.vlgmr.msra.gmra.mxu0 %vm349_vm0, %v1625_v54  ;;  %v1731_v16 = vld [vmem:[#allocation15 + $0x120] sm:$0xff]  ;;  %v1697_v54 = vld [vmem:[#allocation15 + $0x10] sm:$0xff] }
 0x662   :  { %1828 = vmatpush.msrb.mxu0 %v1752_v3  ;;  %1768 = vmatpush.msra.mxu1 %v1719_v6 }
 0x663   :  { %1791 = vmatpush.msra.mxu3 %v1745_v43  ;;  %1811 = vmatpush.msrb.mxu2 %v1714_v46 }
 0x664   :  { %1829 = vmatpush.msrb.mxu0 %v1750_v34  ;;  %1769 = vmatpush.msra.mxu1 %v1717_v35 }
 0x665   :  { %1792 = vmatpush.msra.mxu3 %v1743_v45  ;;  %1812 = vmatpush.msrb.mxu2 %v1712_v52 }
 0x666   :  { %1830 = vmatpush.msrb.mxu0 %v1748_v38  ;;  %1770 = vmatpush.msra.mxu1 %v1715_v42 }
 0x667   :  { %1793 = vmatpush.msra.mxu3 %v1741_v49  ;;  %1813 = vmatpush.msrb.mxu2 %v1710_v58 }
 0x668   :  { %1831 = vmatpush.msrb.mxu0 %v1746_v44  ;;  %1771 = vmatpush.msra.mxu1 %v1713_v14 }
 0x669   :  { %1794 = vmatpush.msra.mxu3 %v1739_v40  ;;  %1814 = vmatpush.msrb.mxu2 %v1708_v63 }
 0x66a   :  { %1832 = vmatpush.msrb.mxu0 %v1744_v47  ;;  %1772 = vmatpush.msra.mxu1 %v1711_v48 }
 0x66b   :  { %1795 = vmatpush.msra.mxu3 %v1737_v55  ;;  %1815 = vmatpush.msrb.mxu2 %v1706_v4 }
 0x66c   :  { %1833 = vmatpush.msrb.mxu0 %v1742_v53  ;;  %1773 = vmatpush.msra.mxu1 %v1709_v56 }
 0x66d   :  { %1796 = vmatpush.msra.mxu3 %v1735_v2  ;;  %1816 = vmatpush.msrb.mxu2 %v1704_v12 }
 0x66e   :  { %1834 = vmatpush.msrb.mxu0 %v1740_v59  ;;  %1774 = vmatpush.msra.mxu1 %v1707_v61 }
 0x66f   :  { %1797 = vmatpush.msra.mxu3 %v1733_v10  ;;  %1817 = vmatpush.msrb.mxu2 %v1702_v18 }
 0x670   :  { %1835 = vmatpush.msrb.mxu0 %v1738_v0  ;;  %1775 = vmatpush.msra.mxu1 %v1705_v1 }
 0x671   :  { %1798 = vmatpush.msra.mxu3 %v1731_v16  ;;  %1818 = vmatpush.msrb.mxu2 %v1700_v39 }
 0x672   :  { %1836 = vmatpush.msrb.mxu0 %v1736_v9  ;;  %1776 = vmatpush.msra.mxu1 %v1703_v8 }
 0x673   :  { %1799 = vmatpush.msra.mxu3 %v1729_v24  ;;  %1819 = vmatpush.msrb.mxu2 %v1698_v60 }
 0x674   :  { %1837 = vmatpush.msrb.mxu0 %v1734_v13  ;;  %1777 = vmatpush.msra.mxu1 %v1701_v15 }
 0x675   :  { %1800 = vmatpush.msra.mxu3 %v1727_v50  ;;  %1820 = vmatpush.msrb.mxu2 %v1696_v26 }
 0x676   :  { %1838 = vmatpush.msrb.mxu0 %v1732_v19  ;;  %1778 = vmatpush.msra.mxu1 %v1699_v23 }
 0x678   :  { %1839 = vmatpush.msrb.mxu0 %v1730_v11  ;;  %1779 = vmatpush.msra.mxu1 %v1697_v54 }
 0x67a   :  { %1840 = vmatpush.msrb.mxu0 %v1728_v25  ;;  %1780 = vmatpush.msra.mxu1 %v1695_v57 }
 0x6be   :  { %v1153_v17 = vpop.f32.mrf.mxu1  ;;  %v1173_v5 = vpop.f32.mrf.mxu0 }
 0x6c5   :  { %v1216_v20 = vpop.f32.mrf.mxu2  ;;  %v1450_v32 = vpop.f32.mrf.mxu3 }
 0x6c6   :  { %v1196_v21 = vpop.f32.mrf.mxu1  ;;  %v1272_v22 = vpop.f32.mrf.mxu0  ;;  %v1217_v27 = vadd.f32 %v1216_v20, %v1173_v5 }
 0x6c7   :  { %v1197_v31 = vadd.f32 %v1196_v21, %v1153_v17 }
 0x6c9   :  { %v1295_v3 = vadd.f32 %v1272_v22, %v1197_v31 }
 0x6cd   :  { %v1350_v28 = vpop.f32.mrf.mxu2  ;;  %v1610_v38 = vpop.f32.mrf.mxu3 }
 0x6ce   :  { %v1292_v29 = vpop.f32.mrf.mxu1  ;;  %v1370_v30 = vpop.f32.mrf.mxu0  ;;  %v1373_v34 = vadd.f32 %v1350_v28, %v1295_v3 }
 0x6cf   :  { %v1296_v51 = vadd.f32 %v1292_v29, %v1217_v27 }
 0x6d1   :  { %v1374_v33 = vadd.f32 %v1370_v30, %v1296_v51 }
 0x6d3   :  { %v1454_v35 = vadd.f32 %v1450_v32, %v1374_v33 }
 0x6d5   :  { %v1510_v6 = vpop.f32.mrf.mxu2 }
 0x6d6   :  { %v1430_v62 = vpop.f32.mrf.mxu1  ;;  %v1530_v7 = vpop.f32.mrf.mxu0 }
 0x6d7   :  { %v1453_v36 = vadd.f32 %v1430_v62, %v1373_v34  ;;  %v1534_v37 = vadd.f32 %v1530_v7, %v1454_v35 }
 0x6d9   :  { %v1533_v42 = vadd.f32 %v1510_v6, %v1453_v36  ;;  %v1614_v43 = vadd.f32 %v1610_v38, %v1534_v37  ;;  %v1927_v38 = vld [vmem:[#allocation19] sm:$0x3] }
 0x6dd   :  { %v1670_v46 = vpop.f32.mrf.mxu2 }
 0x6de   :  { %v1590_v41 = vpop.f32.mrf.mxu1  ;;  %v1690_v44 = vpop.f32.mrf.mxu0 }
 0x6df   :  { %v1613_v14 = vadd.f32 %v1590_v41, %v1533_v42  ;;  %v1694_v45 = vadd.f32 %v1690_v44, %v1614_v43 }
 0x6e1   :  { %v1693_v47 = vadd.f32 %v1670_v46, %v1613_v14  ;;  %v1932_v48 = vrot.slane %v1694_v45, 2  ;;  %1801 = vmatmul.f32.vlgmr.msra.gmra.mxu3 %v1694_v45  ;;  %1841 = vmatmul.f32.vlgmr.msrb.gmra.mxu0 %v1694_v45 }
 0x6e3   :  { %v1931_v49 = vrot.slane %v1693_v47, 2  ;;  %v1942_v52 = vsel %vm1071_vm2, %v1932_v48, 0.0  ;;  %1781 = vmatmul.f32.vlgmr.msra.gmra.mxu1 %v1693_v47  ;;  %1821 = vmatmul.f32.vlgmr.msrb.gmra.mxu2 %v1693_v47  ;;  %v1759_v48 = vld [vmem:[%s3719_s14] sm:$0x3] }
 0x6e4   :  { %v1943_v53 = vrot.slane %v1942_v52, 4 }
 0x6e5   :  { %v1935_v56 = vsel %vm1071_vm2, %v1931_v49, 0.0  ;;  %v1761_v49 = vperm.slane %v1759_v48, 0 }
 0x6e6   :  { %v1936_v40 = vrot.slane %v1935_v56, 4  ;;  %v1944_v58 = vadd.f32 %v1943_v53, %v1942_v52 }
 0x6e8   :  { %v1937_v59 = vadd.f32 %v1936_v40, %v1935_v56  ;;  %v1945_v61 = vrot.slane %v1944_v58, 2  ;;  %v1762_v56 = vperm.slane %v1759_v48, 1 }
 0x6ea   :  { %v1938_v55 = vrot.slane %v1937_v59, 2  ;;  %v1946_v63 = vadd.f32 %v1945_v61, %v1944_v58 }
 0x6ec   :  { %v1939_v0 = vadd.f32 %v1938_v55, %v1937_v59  ;;  %v1947_v1 = vrot.slane %v1946_v63, 1 }
 0x6ee   :  { %v1940_v2 = vrot.slane %v1939_v0, 1  ;;  %v1948_v4 = vadd.f32 %v1947_v1, %v1946_v63 }
 0x6f0   :  { %v1941_v9 = vadd.f32 %v1940_v2, %v1939_v0  ;;  %v1950_v8 = vmul.f32 0.5, %v1948_v4 }
 0x6f2   :  { %v1949_v10 = vmul.f32 0.5, %v1941_v9  ;;  %v1952_v12 = vsub.f32 %v1694_v45, %v1950_v8 }
 0x6f4   :  { %v1951_v13 = vsub.f32 %v1693_v47, %v1949_v10  ;;  %v1954_v15 = vmul.f32 %v1952_v12, %v1952_v12 }
 0x6f6   :  { %v1953_v16 = vmul.f32 %v1951_v13, %v1951_v13  ;;  %v1958_v17 = vrot.slane %v1954_v15, 2 }
 0x6f8   :  { %v1957_v5 = vrot.slane %v1953_v16, 2  ;;  %v1968_v18 = vsel %vm1071_vm2, %v1958_v17, 0.0 }
 0x6f9   :  { %v1969_v19 = vrot.slane %v1968_v18, 4 }
 0x6fa   :  { %v1961_v20 = vsel %vm1071_vm2, %v1957_v5, 0.0 }
 0x6fb   :  { %v1962_v21 = vrot.slane %v1961_v20, 4  ;;  %v1970_v22 = vadd.f32 %v1969_v19, %v1968_v18 }
 0x6fd   :  { %v1963_v23 = vadd.f32 %v1962_v21, %v1961_v20  ;;  %v1971_v24 = vrot.slane %v1970_v22, 2 }
 0x6ff   :  { %v1964_v39 = vrot.slane %v1963_v23, 2  ;;  %v1972_v11 = vadd.f32 %v1971_v24, %v1970_v22 }
 0x701   :  { %v1965_v54 = vadd.f32 %v1964_v39, %v1963_v23  ;;  %v1973_v50 = vrot.slane %v1972_v11, 1 }
 0x703   :  { %v1966_v60 = vrot.slane %v1965_v54, 1  ;;  %v1974_v25 = vadd.f32 %v1973_v50, %v1972_v11 }
 0x705   :  { %v1967_v57 = vadd.f32 %v1966_v60, %v1965_v54  ;;  %v1976_v26 = vmul.f32 0.5, %v1974_v25 }
 0x707   :  { %v1975_v27 = vmul.f32 0.5, %v1967_v57  ;;  %v1978_v28 = vadd.f32 1e-05, %v1976_v26 }
 0x709   :  { %v1977_v29 = vadd.f32 1e-05, %v1975_v27  ;;  %2611 = vrsqrt.f32 %v1978_v28  ;;  %vm1995_vm13 = vweird.f32 %v1978_v28 }
 0x70b   :  { %2613 = vrsqrt.f32 %v1977_v29  ;;  %vm1985_vm15 = vweird.f32 %v1977_v29 }
 0x70f   :  { %v2612_v30 = vpop.eup %2611 }
 0x710   :  { %v1990_v51 = vmul.f32 %v2612_v30, %v1978_v28  ;;  %vm1996_vm0 = vweird.f32 %v2612_v30 }
 0x711   :  { %v2614_v31 = vpop.eup %2613  ;;  %vm1997_vm14 = vmor %vm1995_vm13, %vm1996_vm0 }
 0x712   :  { %v1980_v32 = vmul.f32 %v2614_v31, %v1977_v29  ;;  %v1991_v33 = vmul.f32 %v2612_v30, %v1990_v51  ;;  %vm1986_vm5 = vweird.f32 %v2614_v31 }
 0x713   :  { %vm1987_vm3 = vmor %vm1985_vm15, %vm1986_vm5 }
 0x714   :  { %v1981_v3 = vmul.f32 %v2614_v31, %v1980_v32  ;;  %v1992_v6 = vmul.f32 0.5, %v1991_v33 }
 0x716   :  { %v1982_v62 = vmul.f32 0.5, %v1981_v3  ;;  %v1993_v7 = vsub.f32 1.5, %v1992_v6 }
 0x718   :  { %v1983_v34 = vsub.f32 1.5, %v1982_v62  ;;  %v1994_v35 = vmul.f32 %v2612_v30, %v1993_v7 }
 0x71a   :  { %v1984_v36 = vmul.f32 %v2614_v31, %v1983_v34  ;;  %v1998_v37 = vsel %vm1997_vm14, %v2612_v30, %v1994_v35 }
 0x71b   :  { %v2001_v42 = vrot.slane %v1998_v37, 7 }
 0x71c   :  { %v1988_v43 = vsel %vm1987_vm3, %v2614_v31, %v1984_v36 }
 0x71d   :  { %v2002_v41 = vsel %vm1069_vm1, %v1988_v43, %v2001_v42 }
 0x71e   :  { %v2004_v44 = vmul.f32 %v2002_v41, %v1927_v38 }
 0x720   :  { %v2006_v14 = vperm.slane %v2004_v44, 0  ;;  %v2007_v45 = vperm.slane %v2004_v44, 1  ;;  %v1928_v44 = vld [vmem:[#allocation21] sm:$0x3] }
 0x722   :  { %v3641_v46 = vmul.f32 %v2007_v45, %v1952_v12  ;;  %v3643_v47 = vmul.f32 %v2006_v14, %v1951_v13 }
 0x75e   :  { %v1842_v63 = vpop.f32.mrf.mxu0 }
 0x760   :  { %v1782_v52 = vpop.f32.mrf.mxu1 }
 0x761   :  { %v1783_v53 = vadd.f32 %v1782_v52, %v1761_v49  ;;  %v2013_v49 = vperm.slane %v1928_v44, 0  ;;  %v2014_v52 = vperm.slane %v1928_v44, 1  ;;  %v2136_v44 = vld [vmem:[#allocation25 + $0xc8] sm:$0xff] }
 0x764   :  { %v1802_v40 = vpop.f32.mrf.mxu3 }
 0x765   :  { %v1803_v58 = vadd.f32 %v1802_v40, %v1783_v53  ;;  %v1845_v53 = vld [vmem:[#allocation16] sm:$0x3] }
 0x766   :  { %v1822_v59 = vpop.f32.mrf.mxu2 }
 0x767   :  { %v1847_v61 = vsel %vm1071_vm2, %v1803_v58, 0.0  ;;  %v1823_v55 = vadd.f32 %v1822_v59, %v1762_v56 }
 0x768   :  { %v1848_v0 = vrot.slane %v1847_v61, 4 }
 0x769   :  { %v1843_v1 = vadd.f32 %v1842_v63, %v1823_v55  ;;  %v2018_v55 = vadd.f32 %v2014_v52, %v3641_v46  ;;  %v2017_v63 = vadd.f32 %v2013_v49, %v3643_v47  ;;  %v2165_v49 = vld [vmem:[#allocation25 + $0x1b0] sm:$0xff] }
 0x76a   :  { %v1849_v2 = vadd.f32 %v1848_v0, %v1847_v61 }
 0x76b   :  { %v1854_v4 = vsel %vm1071_vm2, %v1843_v1, 0.0 }
 0x76c   :  { %v1850_v9 = vrot.slane %v1849_v2, 2  ;;  %v1855_v8 = vrot.slane %v1854_v4, 4 }
 0x76e   :  { %v1851_v10 = vadd.f32 %v1850_v9, %v1849_v2  ;;  %v1856_v12 = vadd.f32 %v1855_v8, %v1854_v4 }
 0x770   :  { %v1852_v13 = vrot.slane %v1851_v10, 1  ;;  %v1857_v15 = vrot.slane %v1856_v12, 2 }
 0x772   :  { %v1853_v16 = vadd.f32 %v1852_v13, %v1851_v10  ;;  %v1858_v17 = vadd.f32 %v1857_v15, %v1856_v12  ;;  %v2022_v10 = vmul.f32 0.4, %v2018_v55  ;;  %v2021_v15 = vmul.f32 0.4, %v2017_v63  ;;  %v2132_v63 = vld [vmem:[#allocation25 + $0xa8] sm:$0xff] }
 0x774   :  { %v1861_v5 = vmul.f32 0.5, %v1853_v16  ;;  %v1859_v18 = vrot.slane %v1858_v17, 1 }
 0x776   :  { %v1863_v19 = vsub.f32 %v1803_v58, %v1861_v5  ;;  %v1860_v20 = vadd.f32 %v1859_v18, %v1858_v17  ;;  %v1846_v58 = vld [vmem:[#allocation18] sm:$0x3]  ;;  %v2026_v18 = vrot.slane %v2022_v10, 2  ;;  %v2162_v10 = vld [vmem:[#allocation25 + $0x198] sm:$0xff] }
 0x777   :  { %v1919_v2 = vperm.slane %v1846_v58, 0  ;;  %v1920_v4 = vperm.slane %v1846_v58, 1  ;;  %v2131_v58 = vld [vmem:[#allocation25 + $0xa0] sm:$0xff] }
 0x778   :  { %v1865_v21 = vmul.f32 %v1863_v19, %v1863_v19  ;;  %v1862_v22 = vmul.f32 0.5, %v1860_v20 }
 0x77a   :  { %v1867_v23 = vsel %vm1071_vm2, %v1865_v21, 0.0  ;;  %v1864_v24 = vsub.f32 %v1843_v1, %v1862_v22  ;;  %v2025_v21 = vrot.slane %v2021_v15, 2  ;;  %v2159_v15 = vld [vmem:[#allocation25 + $0x180] sm:$0xff] }
 0x77b   :  { %v1868_v39 = vrot.slane %v1867_v23, 4 }
 0x77c   :  { %v1866_v11 = vmul.f32 %v1864_v24, %v1864_v24 }
 0x77d   :  { %v1869_v54 = vadd.f32 %v1868_v39, %v1867_v23 }
 0x77e   :  { %v1874_v50 = vsel %vm1071_vm2, %v1866_v11, 0.0 }
 0x77f   :  { %v1870_v60 = vrot.slane %v1869_v54, 2  ;;  %v1875_v25 = vrot.slane %v1874_v50, 4 }
 0x781   :  { %v1871_v57 = vadd.f32 %v1870_v60, %v1869_v54  ;;  %v1876_v26 = vadd.f32 %v1875_v25, %v1874_v50 }
 0x783   :  { %v1872_v27 = vrot.slane %v1871_v57, 1  ;;  %v1877_v28 = vrot.slane %v1876_v26, 2 }
 0x785   :  { %v1873_v29 = vadd.f32 %v1872_v27, %v1871_v57  ;;  %v1878_v30 = vadd.f32 %v1877_v28, %v1876_v26  ;;  %v2141_v28 = vld [vmem:[#allocation25 + $0xf0] sm:$0xff] }
 0x786   :  { %2181 = vmatpush.msrb.mxu1 %v2141_v28 }
 0x787   :  { %v1881_v51 = vmul.f32 0.5, %v1873_v29  ;;  %v1879_v31 = vrot.slane %v1878_v30, 1  ;;  %v2173_v29 = vld [vmem:[#allocation25 + $0x1f0] sm:$0xff] }
 0x788   :  { %2201 = vmatpush.msrb.mxu3 %v2173_v29  ;;  %v2119_v29 = vld [vmem:[#allocation25 + $0x40] sm:$0xff] }
 0x789   :  { %v1883_v32 = vadd.f32 1e-05, %v1881_v51  ;;  %v1880_v33 = vadd.f32 %v1879_v31, %v1878_v30  ;;  %v2142_v30 = vld [vmem:[#allocation25 + $0xf8] sm:$0xff] }
 0x78a   :  { %v2174_v31 = vld [vmem:[#allocation25 + $0x1f8] sm:$0xff]  ;;  %2221 = vmatpush.msra.mxu2 %v2142_v30  ;;  %v2151_v30 = vld [vmem:[#allocation25 + $0x140] sm:$0xff] }
 0x78b   :  { %2615 = vrsqrt.f32 %v1883_v32  ;;  %v1882_v3 = vmul.f32 0.5, %v1880_v33  ;;  %vm1891_vm10 = vweird.f32 %v1883_v32  ;;  %v2171_v33 = vld [vmem:[#allocation25 + $0x1e0] sm:$0xff]  ;;  %2241 = vmatpush.msra.mxu0 %v2174_v31  ;;  %v2120_v31 = vld [vmem:[#allocation25 + $0x48] sm:$0xff] }
 0x78c   :  { %2202 = vmatpush.msrb.mxu3 %v2171_v33  ;;  %v2117_v33 = vld [vmem:[#allocation25 + $0x30] sm:$0xff] }
 0x78d   :  { %v1884_v6 = vadd.f32 1e-05, %v1882_v3 }
 0x78f   :  { %2617 = vrsqrt.f32 %v1884_v6  ;;  %vm1901_vm8 = vweird.f32 %v1884_v6 }
 0x791   :  { %v2616_v62 = vpop.eup %2615 }
 0x792   :  { %v1886_v7 = vmul.f32 %v2616_v62, %v1883_v32  ;;  %vm1892_vm7 = vweird.f32 %v2616_v62  ;;  %v2139_v32 = vld [vmem:[#allocation25 + $0xe0] sm:$0xff] }
 0x793   :  { %vm1893_vm11 = vmor %vm1891_vm10, %vm1892_vm7  ;;  %2182 = vmatpush.msrb.mxu1 %v2139_v32  ;;  %v2152_v32 = vld [vmem:[#allocation25 + $0x148] sm:$0xff] }
 0x794   :  { %v1887_v34 = vmul.f32 %v2616_v62, %v1886_v7  ;;  %v2137_v7 = vld [vmem:[#allocation25 + $0xd0] sm:$0xff] }
 0x795   :  { %v2618_v35 = vpop.eup %2617  ;;  %2183 = vmatpush.msrb.mxu1 %v2137_v7  ;;  %v2118_v7 = vld [vmem:[#allocation25 + $0x38] sm:$0xff] }
 0x796   :  { %v1888_v36 = vmul.f32 0.5, %v1887_v34  ;;  %v1896_v37 = vmul.f32 %v2618_v35, %v1884_v6  ;;  %vm1902_vm6 = vweird.f32 %v2618_v35  ;;  %v2140_v6 = vld [vmem:[#allocation25 + $0xe8] sm:$0xff] }
 0x797   :  { %vm1903_vm9 = vmor %vm1901_vm8, %vm1902_vm6  ;;  %2222 = vmatpush.msra.mxu2 %v2140_v6 }
 0x798   :  { %v1897_v38 = vmul.f32 %v2618_v35, %v1896_v37  ;;  %v1889_v42 = vsub.f32 1.5, %v1888_v36  ;;  %v2138_v36 = vld [vmem:[#allocation25 + $0xd8] sm:$0xff] }
 0x799   :  { %v2170_v37 = vld [vmem:[#allocation25 + $0x1d8] sm:$0xff]  ;;  %2223 = vmatpush.msra.mxu2 %v2138_v36  ;;  %v2147_v36 = vld [vmem:[#allocation25 + $0x120] sm:$0xff] }
 0x79a   :  { %v1898_v43 = vmul.f32 0.5, %v1897_v38  ;;  %v1890_v14 = vmul.f32 %v2616_v62, %v1889_v42  ;;  %v2135_v42 = vld [vmem:[#allocation25 + $0xc0] sm:$0xff] }
 0x79b   :  { %2184 = vmatpush.msrb.mxu1 %v2135_v42  ;;  %2224 = vmatpush.msra.mxu2 %v2136_v44  ;;  %v2116_v42 = vld [vmem:[#allocation25 + $0x28] sm:$0xff]  ;;  %v2113_v44 = vld [vmem:[#allocation25 + $0x10] sm:$0xff] }
 0x79c   :  { %v1899_v41 = vsub.f32 1.5, %v1898_v43  ;;  %v1894_v40 = vsel %vm1893_vm11, %v2616_v62, %v1890_v14  ;;  %v2172_v62 = vld [vmem:[#allocation25 + $0x1e8] sm:$0xff]  ;;  %v2167_v43 = vld [vmem:[#allocation25 + $0x1c0] sm:$0xff] }
 0x79d   :  { %2242 = vmatpush.msra.mxu0 %v2172_v62  ;;  %v2168_v14 = vld [vmem:[#allocation25 + $0x1c8] sm:$0xff] }
 0x79e   :  { %v1900_v45 = vmul.f32 %v2618_v35, %v1899_v41 }
 0x79f   :  { %2243 = vmatpush.msra.mxu0 %v2170_v37 }
 0x7a0   :  { %v1904_v48 = vsel %vm1903_vm9, %v2618_v35, %v1900_v45  ;;  %v2169_v35 = vld [vmem:[#allocation25 + $0x1d0] sm:$0xff] }
 0x7a1   :  { %v1907_v56 = vrot.slane %v1904_v48, 7  ;;  %2203 = vmatpush.msrb.mxu3 %v2169_v35  ;;  %v2133_v48 = vld [vmem:[#allocation25 + $0xb0] sm:$0xff]  ;;  %2244 = vmatpush.msra.mxu0 %v2168_v14  ;;  %v2115_v35 = vld [vmem:[#allocation25 + $0x20] sm:$0xff] }
 0x7a2   :  { %2185 = vmatpush.msrb.mxu1 %v2133_v48  ;;  %v2145_v14 = vld [vmem:[#allocation25 + $0x110] sm:$0xff]  ;;  %v2146_v48 = vld [vmem:[#allocation25 + $0x118] sm:$0xff] }
 0x7a3   :  { %v1908_v59 = vsel %vm1069_vm1, %v1894_v40, %v1907_v56  ;;  %2204 = vmatpush.msrb.mxu3 %v2167_v43  ;;  %v2166_v56 = vld [vmem:[#allocation25 + $0x1b8] sm:$0xff]  ;;  %v2148_v43 = vld [vmem:[#allocation25 + $0x128] sm:$0xff] }
 0x7a4   :  { %v1910_v61 = vmul.f32 %v1908_v59, %v1845_v53  ;;  %v2134_v53 = vld [vmem:[#allocation25 + $0xb8] sm:$0xff]  ;;  %v2163_v59 = vld [vmem:[#allocation25 + $0x1a0] sm:$0xff]  ;;  %2245 = vmatpush.msra.mxu0 %v2166_v56  ;;  %2186 = vmatpush.msrb.mxu1 %v2131_v58  ;;  %v2144_v56 = vld [vmem:[#allocation25 + $0x108] sm:$0xff] }
 0x7a5   :  { %2205 = vmatpush.msrb.mxu3 %v2165_v49  ;;  %2225 = vmatpush.msra.mxu2 %v2134_v53  ;;  %v2111_v49 = vld [vmem:[#allocation25] sm:$0xff]  ;;  %v2112_v53 = vld [vmem:[#allocation25 + $0x8] sm:$0xff] }
 0x7a6   :  { %v1912_v0 = vperm.slane %v1910_v61, 0  ;;  %v1913_v1 = vperm.slane %v1910_v61, 1  ;;  %v2294_v58 = vld [vmem:[#allocation28 + $0xf8] sm:$0xff] }
 0x7a7   :  { %2206 = vmatpush.msrb.mxu3 %v2163_v59  ;;  %2226 = vmatpush.msra.mxu2 %v2132_v63 }
 0x7a8   :  { %v1916_v9 = vmul.f32 %v1912_v0, %v1863_v19  ;;  %v1917_v8 = vmul.f32 %v1913_v1, %v1864_v24  ;;  %v2164_v0 = vld [vmem:[#allocation25 + $0x1a8] sm:$0xff] }
 0x7a9   :  { %2246 = vmatpush.msra.mxu0 %v2164_v0 }
 0x7aa   :  { %v1923_v12 = vadd.f32 %v1919_v2, %v1916_v9  ;;  %v1924_v13 = vadd.f32 %v1920_v4, %v1917_v8  ;;  %v2129_v2 = vld [vmem:[#allocation25 + $0x90] sm:$0xff]  ;;  %v2130_v8 = vld [vmem:[#allocation25 + $0x98] sm:$0xff] }
 0x7ab   :  { %v2161_v4 = vld [vmem:[#allocation25 + $0x190] sm:$0xff]  ;;  %2187 = vmatpush.msrb.mxu1 %v2129_v2  ;;  %2227 = vmatpush.msra.mxu2 %v2130_v8 }
 0x7ac   :  { %v1925_v16 = vmax.f32 %v1923_v12, 0.0  ;;  %v1926_v17 = vmax.f32 %v1924_v13, 0.0  ;;  %v2127_v13 = vld [vmem:[#allocation25 + $0x80] sm:$0xff]  ;;  %2207 = vmatpush.msrb.mxu3 %v2161_v4  ;;  %2247 = vmatpush.msra.mxu0 %v2162_v10  ;;  %v2292_v2 = vld [vmem:[#allocation28 + $0xe8] sm:$0xff] }
 0x7ad   :  { %2188 = vmatpush.msrb.mxu1 %v2127_v13  ;;  %v2324_v8 = vld [vmem:[#allocation28 + $0x1e8] sm:$0xff]  ;;  %v2290_v13 = vld [vmem:[#allocation28 + $0xd8] sm:$0xff] }
 0x7ae   :  { %v2020_v5 = vmul.f32 0.6, %v1926_v17  ;;  %v2019_v20 = vmul.f32 0.6, %v1925_v16  ;;  %v2128_v17 = vld [vmem:[#allocation25 + $0x88] sm:$0xff]  ;;  %2208 = vmatpush.msrb.mxu3 %v2159_v15 }
 0x7af   :  { %2228 = vmatpush.msra.mxu2 %v2128_v17  ;;  %v2322_v17 = vld [vmem:[#allocation28 + $0x1d8] sm:$0xff] }
 0x7b0   :  { %v2030_v22 = vadd.f32 %v2026_v18, %v2020_v5  ;;  %v2029_v46 = vadd.f32 %v2025_v21, %v2019_v20  ;;  %v2160_v5 = vld [vmem:[#allocation25 + $0x188] sm:$0xff]  ;;  %v2125_v20 = vld [vmem:[#allocation25 + $0x70] sm:$0xff] }
 0x7b1   :  { %v2157_v21 = vld [vmem:[#allocation25 + $0x170] sm:$0xff]  ;;  %2248 = vmatpush.msra.mxu0 %v2160_v5  ;;  %2189 = vmatpush.msrb.mxu1 %v2125_v20 }
 0x7b2   :  { %v2040_v47 = vsel %vm1071_vm2, %v2030_v22, 0.0  ;;  %v2033_v23 = vsel %vm1071_vm2, %v2029_v46, 0.0  ;;  %2209 = vmatpush.msrb.mxu3 %v2157_v21  ;;  %v2288_v20 = vld [vmem:[#allocation28 + $0xc8] sm:$0xff] }
 0x7b3   :  { %v2041_v39 = vrot.slane %v2040_v47, 4  ;;  %v2034_v11 = vrot.slane %v2033_v23, 4 }
 0x7b5   :  { %v2042_v19 = vadd.f32 %v2041_v39, %v2040_v47  ;;  %v2035_v24 = vadd.f32 %v2034_v11, %v2033_v23  ;;  %v2158_v47 = vld [vmem:[#allocation25 + $0x178] sm:$0xff]  ;;  %v2123_v39 = vld [vmem:[#allocation25 + $0x60] sm:$0xff] }
 0x7b6   :  { %v2155_v11 = vld [vmem:[#allocation25 + $0x160] sm:$0xff]  ;;  %2249 = vmatpush.msra.mxu0 %v2158_v47  ;;  %2190 = vmatpush.msrb.mxu1 %v2123_v39 }
 0x7b7   :  { %v2043_v54 = vrot.slane %v2042_v19, 2  ;;  %v2036_v50 = vrot.slane %v2035_v24, 2  ;;  %2210 = vmatpush.msrb.mxu3 %v2155_v11  ;;  %v2286_v39 = vld [vmem:[#allocation28 + $0xb8] sm:$0xff] }
 0x7b9   :  { %v2044_v60 = vadd.f32 %v2043_v54, %v2042_v19  ;;  %v2037_v25 = vadd.f32 %v2036_v50, %v2035_v24  ;;  %v2124_v24 = vld [vmem:[#allocation25 + $0x68] sm:$0xff] }
 0x7ba   :  { %v2156_v54 = vld [vmem:[#allocation25 + $0x168] sm:$0xff] }
 0x7bb   :  { %v2045_v57 = vrot.slane %v2044_v60, 1  ;;  %v2038_v26 = vrot.slane %v2037_v25, 1  ;;  %2250 = vmatpush.msra.mxu0 %v2156_v54 }
 0x7bd   :  { %v2046_v27 = vadd.f32 %v2045_v57, %v2044_v60  ;;  %v2039_v51 = vadd.f32 %v2038_v26, %v2037_v25  ;;  %v2121_v60 = vld [vmem:[#allocation25 + $0x50] sm:$0xff]  ;;  %v2122_v26 = vld [vmem:[#allocation25 + $0x58] sm:$0xff] }
 0x7be   :  { %v2153_v25 = vld [vmem:[#allocation25 + $0x150] sm:$0xff]  ;;  %2191 = vmatpush.msrb.mxu1 %v2121_v60 }
 0x7bf   :  { %v2048_v3 = vmul.f32 0.5, %v2046_v27  ;;  %v2047_v34 = vmul.f32 0.5, %v2039_v51  ;;  %v2154_v27 = vld [vmem:[#allocation25 + $0x158] sm:$0xff]  ;;  %2211 = vmatpush.msrb.mxu3 %v2153_v25  ;;  %v2284_v60 = vld [vmem:[#allocation28 + $0xa8] sm:$0xff] }
 0x7c0   :  { %2251 = vmatpush.msra.mxu0 %v2154_v27  ;;  %2192 = vmatpush.msrb.mxu1 %v2119_v29  ;;  %v2031_v27 = vld [vmem:[#allocation22] sm:$0x3]  ;;  %v2281_v29 = vld [vmem:[#allocation28 + $0x90] sm:$0xff] }
 0x7c1   :  { %v3657_v38 = vsub.f32 %v2030_v22, %v2048_v3  ;;  %v3659_v41 = vsub.f32 %v2029_v46, %v2047_v34  ;;  %v2126_v46 = vld [vmem:[#allocation25 + $0x78] sm:$0xff]  ;;  %v2149_v3 = vld [vmem:[#allocation25 + $0x130] sm:$0xff]  ;;  %2212 = vmatpush.msrb.mxu3 %v2151_v30 }
 0x7c2   :  { %2229 = vmatpush.msra.mxu2 %v2126_v46  ;;  %v2150_v34 = vld [vmem:[#allocation25 + $0x138] sm:$0xff]  ;;  %2252 = vmatpush.msra.mxu0 %v2152_v32  ;;  %v2320_v46 = vld [vmem:[#allocation28 + $0x1c8] sm:$0xff] }
 0x7c3   :  { %v2052_v45 = vmul.f32 %v3657_v38, %v3657_v38  ;;  %v2051_v52 = vmul.f32 %v3659_v41, %v3659_v41  ;;  %2193 = vmatpush.msrb.mxu1 %v2117_v33  ;;  %2213 = vmatpush.msrb.mxu3 %v2149_v3  ;;  %v2282_v30 = vld [vmem:[#allocation28 + $0x98] sm:$0xff]  ;;  %v2279_v3 = vld [vmem:[#allocation28 + $0x80] sm:$0xff] }
 0x7c4   :  { %2230 = vmatpush.msra.mxu2 %v2124_v24  ;;  %2253 = vmatpush.msra.mxu0 %v2150_v34  ;;  %v2318_v24 = vld [vmem:[#allocation28 + $0x1b8] sm:$0xff]  ;;  %v2311_v34 = vld [vmem:[#allocation28 + $0x180] sm:$0xff] }
 0x7c5   :  { %v2060_v40 = vsel %vm1071_vm2, %v2052_v45, 0.0  ;;  %v2053_v61 = vsel %vm1071_vm2, %v2051_v52, 0.0  ;;  %2194 = vmatpush.msrb.mxu1 %v2115_v35  ;;  %2214 = vmatpush.msrb.mxu3 %v2147_v36  ;;  %v2114_v45 = vld [vmem:[#allocation25 + $0x18] sm:$0xff]  ;;  %v2143_v52 = vld [vmem:[#allocation25 + $0x100] sm:$0xff]  ;;  %v2312_v35 = vld [vmem:[#allocation28 + $0x188] sm:$0xff] }
 0x7c6   :  { %v2061_v55 = vrot.slane %v2060_v40, 4  ;;  %v2054_v1 = vrot.slane %v2053_v61, 4  ;;  %2231 = vmatpush.msra.mxu2 %v2122_v26  ;;  %2254 = vmatpush.msra.mxu0 %v2148_v43  ;;  %v2316_v26 = vld [vmem:[#allocation28 + $0x1a8] sm:$0xff]  ;;  %v2314_v32 = vld [vmem:[#allocation28 + $0x198] sm:$0xff]  ;;  %v2309_v43 = vld [vmem:[#allocation28 + $0x170] sm:$0xff] }
 0x7c7   :  { %2195 = vmatpush.msrb.mxu1 %v2113_v44  ;;  %2215 = vmatpush.msrb.mxu3 %v2145_v14  ;;  %v2310_v44 = vld [vmem:[#allocation28 + $0x178] sm:$0xff] }
 0x7c8   :  { %v2062_v9 = vadd.f32 %v2061_v55, %v2060_v40  ;;  %v2055_v12 = vadd.f32 %v2054_v1, %v2053_v61  ;;  %2232 = vmatpush.msra.mxu2 %v2120_v31  ;;  %2255 = vmatpush.msra.mxu0 %v2146_v48  ;;  %v2293_v40 = vld [vmem:[#allocation28 + $0xf0] sm:$0xff]  ;;  %v2326_v55 = vld [vmem:[#allocation28 + $0x1f8] sm:$0xff]  ;;  %v2291_v1 = vld [vmem:[#allocation28 + $0xe0] sm:$0xff] }
 0x7c9   :  { %2196 = vmatpush.msrb.mxu1 %v2111_v49  ;;  %2216 = vmatpush.msrb.mxu3 %v2143_v52  ;;  %v2325_v61 = vld [vmem:[#allocation28 + $0x1f0] sm:$0xff]  ;;  %v2275_v52 = vld [vmem:[#allocation28 + $0x60] sm:$0xff] }
 0x7ca   :  { %v2063_v16 = vrot.slane %v2062_v9, 2  ;;  %v2056_v18 = vrot.slane %v2055_v12, 2  ;;  %2233 = vmatpush.msra.mxu2 %v2118_v7  ;;  %2256 = vmatpush.msra.mxu0 %v2144_v56  ;;  %v2313_v31 = vld [vmem:[#allocation28 + $0x190] sm:$0xff] }
 0x7cb   :  { %2333 = vmatpush.msra.mxu1 %v2293_v40  ;;  %2353 = vmatpush.msra.mxu3 %v2325_v61  ;;  %v2273_v61 = vld [vmem:[#allocation28 + $0x50] sm:$0xff] }
 0x7cc   :  { %v2064_v22 = vadd.f32 %v2063_v16, %v2062_v9  ;;  %v2057_v23 = vadd.f32 %v2056_v18, %v2055_v12  ;;  %2234 = vmatpush.msra.mxu2 %v2116_v42  ;;  %v2323_v9 = vld [vmem:[#allocation28 + $0x1e0] sm:$0xff]  ;;  %2393 = vmatpush.msrb.mxu0 %v2326_v55  ;;  %v2289_v12 = vld [vmem:[#allocation28 + $0xd0] sm:$0xff]  ;;  %v2278_v42 = vld [vmem:[#allocation28 + $0x78] sm:$0xff] }
 0x7cd   :  { %2334 = vmatpush.msra.mxu1 %v2291_v1  ;;  %v2321_v16 = vld [vmem:[#allocation28 + $0x1d0] sm:$0xff]  ;;  %2354 = vmatpush.msra.mxu3 %v2323_v9  ;;  %v2287_v18 = vld [vmem:[#allocation28 + $0xc0] sm:$0xff] }
 0x7ce   :  { %v2065_v19 = vrot.slane %v2064_v22, 1  ;;  %v2058_v50 = vrot.slane %v2057_v23, 1  ;;  %2235 = vmatpush.msra.mxu2 %v2114_v45  ;;  %2394 = vmatpush.msrb.mxu0 %v2324_v8  ;;  %v2307_v55 = vld [vmem:[#allocation28 + $0x160] sm:$0xff]  ;;  %v2270_v8 = vld [vmem:[#allocation28 + $0x38] sm:$0xff] }
 0x7cf   :  { %2335 = vmatpush.msra.mxu1 %v2289_v12  ;;  %2355 = vmatpush.msra.mxu3 %v2321_v16  ;;  %v2271_v1 = vld [vmem:[#allocation28 + $0x40] sm:$0xff]  ;;  %v2302_v16 = vld [vmem:[#allocation28 + $0x138] sm:$0xff] }
 0x7d0   :  { %v2066_v57 = vadd.f32 %v2065_v19, %v2064_v22  ;;  %v2059_v28 = vadd.f32 %v2058_v50, %v2057_v23  ;;  %2236 = vmatpush.msra.mxu2 %v2112_v53  ;;  %v2319_v22 = vld [vmem:[#allocation28 + $0x1c0] sm:$0xff]  ;;  %2395 = vmatpush.msrb.mxu0 %v2322_v17  ;;  %v2285_v23 = vld [vmem:[#allocation28 + $0xb0] sm:$0xff]  ;;  %v2276_v53 = vld [vmem:[#allocation28 + $0x68] sm:$0xff] }
 0x7d1   :  { %2336 = vmatpush.msra.mxu1 %v2287_v18  ;;  %v2317_v19 = vld [vmem:[#allocation28 + $0x1b0] sm:$0xff]  ;;  %2356 = vmatpush.msra.mxu3 %v2319_v22  ;;  %v2283_v50 = vld [vmem:[#allocation28 + $0xa0] sm:$0xff]  ;;  %v2266_v18 = vld [vmem:[#allocation28 + $0x18] sm:$0xff] }
 0x7d2   :  { %v2068_v51 = vmul.f32 0.5, %v2066_v57  ;;  %v2067_v6 = vmul.f32 0.5, %v2059_v28  ;;  %2373 = vmatpush.msrb.mxu2 %v2294_v58  ;;  %2396 = vmatpush.msrb.mxu0 %v2320_v46  ;;  %v2315_v57 = vld [vmem:[#allocation28 + $0x1a0] sm:$0xff]  ;;  %v2265_v17 = vld [vmem:[#allocation28 + $0x10] sm:$0xff]  ;;  %v2264_v46 = vld [vmem:[#allocation28 + $0x8] sm:$0xff] }
 0x7d3   :  { %2337 = vmatpush.msra.mxu1 %v2285_v23  ;;  %2357 = vmatpush.msra.mxu3 %v2317_v19  ;;  %v2303_v9 = vld [vmem:[#allocation28 + $0x140] sm:$0xff]  ;;  %v2297_v22 = vld [vmem:[#allocation28 + $0x110] sm:$0xff] }
 0x7d4   :  { %v3667_v62 = vadd.f32 1e-05, %v2068_v51  ;;  %v3669_v37 = vadd.f32 1e-05, %v2067_v6  ;;  %2374 = vmatpush.msrb.mxu2 %v2292_v2  ;;  %2397 = vmatpush.msrb.mxu0 %v2318_v24  ;;  %v2280_v6 = vld [vmem:[#allocation28 + $0x88] sm:$0xff]  ;;  %v2306_v2 = vld [vmem:[#allocation28 + $0x158] sm:$0xff] }
 0x7d5   :  { %2338 = vmatpush.msra.mxu1 %v2283_v50  ;;  %2358 = vmatpush.msra.mxu3 %v2315_v57  ;;  %v2267_v12 = vld [vmem:[#allocation28 + $0x20] sm:$0xff] }
 0x7d6   :  { %2619 = vrsqrt.f32 %v3667_v62  ;;  %2375 = vmatpush.msrb.mxu2 %v2290_v13  ;;  %vm2087_vm0 = vweird.f32 %v3667_v62  ;;  %vm2077_vm13 = vweird.f32 %v3669_v37  ;;  %2398 = vmatpush.msrb.mxu0 %v2316_v26  ;;  %v2301_v13 = vld [vmem:[#allocation28 + $0x130] sm:$0xff]  ;;  %v2295_v23 = vld [vmem:[#allocation28 + $0x100] sm:$0xff] }
 0x7d7   :  { %2621 = vrsqrt.f32 %v3669_v37  ;;  %2339 = vmatpush.msra.mxu1 %v2281_v29  ;;  %2359 = vmatpush.msra.mxu3 %v2313_v31 }
 0x7d8   :  { %2376 = vmatpush.msrb.mxu2 %v2288_v20  ;;  %2399 = vmatpush.msrb.mxu0 %v2314_v32  ;;  %v2300_v20 = vld [vmem:[#allocation28 + $0x128] sm:$0xff]  ;;  %v2327_v32 = vld [vmem:[#allocation30] sm:$0x3] }
 0x7d9   :  { %2340 = vmatpush.msra.mxu1 %v2279_v3  ;;  %2360 = vmatpush.msra.mxu3 %v2311_v34  ;;  %v2329_v3 = vperm.slane %v2327_v32, 0 }
 0x7da   :  { %2377 = vmatpush.msrb.mxu2 %v2286_v39  ;;  %2400 = vmatpush.msrb.mxu0 %v2312_v35  ;;  %v2296_v39 = vld [vmem:[#allocation28 + $0x108] sm:$0xff] }
 0x7db   :  { %2361 = vmatpush.msra.mxu3 %v2309_v43 }
 0x7dc   :  { %v3673_v59 = vpop.eup %2619  ;;  %2378 = vmatpush.msrb.mxu2 %v2284_v60  ;;  %2401 = vmatpush.msrb.mxu0 %v2310_v44 }
 0x7dd   :  { %v3675_v63 = vpop.eup %2621  ;;  %v2082_v0 = vmul.f32 %v3673_v59, %v3667_v62  ;;  %vm2088_vm12 = vweird.f32 %v3673_v59  ;;  %v2032_v62 = vld [vmem:[#allocation24] sm:$0x3]  ;;  %2362 = vmatpush.msra.mxu3 %v2307_v55 }
 0x7de   :  { %v2072_v4 = vmul.f32 %v3675_v63, %v3669_v37  ;;  %vm2078_vm4 = vweird.f32 %v3675_v63  ;;  %vm2089_vm5 = vmor %vm2087_vm0, %vm2088_vm12  ;;  %2379 = vmatpush.msrb.mxu2 %v2282_v30  ;;  %v2277_v37 = vld [vmem:[#allocation28 + $0x70] sm:$0xff]  ;;  %v2105_v45 = vperm.slane %v2032_v62, 0  ;;  %v2106_v49 = vperm.slane %v2032_v62, 1 }
 0x7df   :  { %v2083_v10 = vmul.f32 %v3673_v59, %v2082_v0  ;;  %vm2079_vm14 = vmor %vm2077_vm13, %vm2078_vm4  ;;  %2341 = vmatpush.msra.mxu1 %v2277_v37  ;;  %v2308_v0 = vld [vmem:[#allocation28 + $0x168] sm:$0xff] }
 0x7e0   :  { %v2073_v15 = vmul.f32 %v3675_v63, %v2072_v4  ;;  %2380 = vmatpush.msrb.mxu2 %v2280_v6  ;;  %2402 = vmatpush.msrb.mxu0 %v2308_v0  ;;  %v2269_v4 = vld [vmem:[#allocation28 + $0x30] sm:$0xff] }
 0x7e1   :  { %v2084_v5 = vmul.f32 0.5, %v2083_v10  ;;  %2342 = vmatpush.msra.mxu1 %v2275_v52  ;;  %v2304_v10 = vld [vmem:[#allocation28 + $0x148] sm:$0xff] }
 0x7e2   :  { %v2074_v21 = vmul.f32 0.5, %v2073_v15  ;;  %2381 = vmatpush.msrb.mxu2 %v2278_v42  ;;  %2403 = vmatpush.msrb.mxu0 %v2306_v2  ;;  %v2268_v15 = vld [vmem:[#allocation28 + $0x28] sm:$0xff] }
 0x7e3   :  { %v2085_v47 = vsub.f32 1.5, %v2084_v5  ;;  %2343 = vmatpush.msra.mxu1 %v2273_v61  ;;  %v2299_v5 = vld [vmem:[#allocation28 + $0x120] sm:$0xff] }
 0x7e4   :  { %v2075_v11 = vsub.f32 1.5, %v2074_v21  ;;  %2382 = vmatpush.msrb.mxu2 %v2276_v53  ;;  %2404 = vmatpush.msrb.mxu0 %v2304_v10  ;;  %v2263_v21 = vld [vmem:[#allocation28] sm:$0xff] }
 0x7e5   :  { %v2086_v54 = vmul.f32 %v3673_v59, %v2085_v47  ;;  %2344 = vmatpush.msra.mxu1 %v2271_v1  ;;  %v2298_v47 = vld [vmem:[#allocation28 + $0x118] sm:$0xff] }
 0x7e6   :  { %v2076_v25 = vmul.f32 %v3675_v63, %v2075_v11  ;;  %2405 = vmatpush.msrb.mxu0 %v2302_v16  ;;  %v2175_v11 = vld [vmem:[#allocation27] sm:$0x3] }
 0x7e7   :  { %v2090_v28 = vsel %vm2089_vm5, %v3673_v59, %v2086_v54  ;;  %2345 = vmatpush.msra.mxu1 %v2269_v4  ;;  %v2177_v19 = vperm.slane %v2175_v11, 0  ;;  %v2178_v54 = vperm.slane %v2175_v11, 1 }
 0x7e8   :  { %v2093_v51 = vrot.slane %v2090_v28, 7  ;;  %v2080_v33 = vsel %vm2079_vm14, %v3675_v63, %v2076_v25  ;;  %v2274_v63 = vld [vmem:[#allocation28 + $0x58] sm:$0xff]  ;;  %2406 = vmatpush.msrb.mxu0 %v2300_v20 }
 0x7e9   :  { %2383 = vmatpush.msrb.mxu2 %v2274_v63  ;;  %2346 = vmatpush.msra.mxu1 %v2267_v12 }
 0x7ea   :  { %v2094_v7 = vsel %vm1069_vm1, %v2080_v33, %v2093_v51  ;;  %2407 = vmatpush.msrb.mxu0 %v2298_v47  ;;  %v2417_v51 = vld [vmem:[%s3764_s27] sm:$0xf]  ;;  %v2330_v33 = vperm.slane %v2327_v32, 1 }
 0x7eb   :  { %v2096_v36 = vmul.f32 %v2094_v7, %v2031_v27  ;;  %2347 = vmatpush.msra.mxu1 %v2265_v17  ;;  %v2418_v31 = vmul.f32 0.4, %v2417_v51 }
 0x7ec   :  { %2408 = vmatpush.msrb.mxu0 %v2296_v39 }
 0x7ed   :  { %v2098_v14 = vperm.slane %v2096_v36, 0  ;;  %v2099_v48 = vperm.slane %v2096_v36, 1  ;;  %2348 = vmatpush.msra.mxu1 %v2263_v21  ;;  %2420 = vst [vmem:[#allocation1] ss:$4 sm:$0xff] %v2418_v31 }
 0x7ef   :  { %v2102_v56 = vmul.f32 %v2098_v14, %v3659_v41  ;;  %v2103_v40 = vmul.f32 %v2099_v48, %v3657_v38  ;;  %v2305_v41 = vld [vmem:[#allocation28 + $0x150] sm:$0xff]  ;;  %v2272_v38 = vld [vmem:[#allocation28 + $0x48] sm:$0xff] }
 0x7f0   :  { %2363 = vmatpush.msra.mxu3 %v2305_v41  ;;  %2384 = vmatpush.msrb.mxu2 %v2272_v38 }
 0x7f1   :  { %v2109_v58 = vadd.f32 %v2105_v45, %v2102_v56  ;;  %v2110_v59 = vadd.f32 %v2106_v49, %v2103_v40 }
 0x7f2   :  { %2364 = vmatpush.msra.mxu3 %v2303_v9  ;;  %2385 = vmatpush.msrb.mxu2 %v2270_v8 }
 0x7f3   :  { %2197 = vmatmul.f32.vlgmr.msrb.gmra.mxu1 %v2109_v58  ;;  %2217 = vmatmul.f32.vlgmr.msrb.gmra.mxu3 %v2110_v59 }
 0x7f4   :  { %2237 = vmatmul.f32.vlgmr.msra.gmra.mxu2 %v2109_v58  ;;  %2257 = vmatmul.f32.vlgmr.msra.gmra.mxu0 %v2110_v59  ;;  %v2422_v44 = vld.sshfl [vmem:[#allocation1 + $0x8] sm:$0xff pattern:$0x73625140]  ;;  %v2421_v49 = vld.sshfl [vmem:[#allocation1] sm:$0xff pattern:$0x73625140] }
 0x7f5   :  { %2365 = vmatpush.msra.mxu3 %v2301_v13  ;;  %2386 = vmatpush.msrb.mxu2 %v2268_v15 }
 0x7f7   :  { %2366 = vmatpush.msra.mxu3 %v2299_v5  ;;  %2387 = vmatpush.msrb.mxu2 %v2266_v18 }
 0x7f9   :  { %2367 = vmatpush.msra.mxu3 %v2297_v22  ;;  %2388 = vmatpush.msrb.mxu2 %v2264_v46 }
 0x7fb   :  { %2368 = vmatpush.msra.mxu3 %v2295_v23 }
 0x870   :  { %v2198_v24 = vpop.f32.mrf.mxu1 }
 0x871   :  { %v2199_v50 = vadd.f32 %v2198_v24, %v2177_v19  ;;  %v2258_v27 = vpop.f32.mrf.mxu0 }
 0x876   :  { %v2218_v60 = vpop.f32.mrf.mxu3 }
 0x877   :  { %v2219_v25 = vadd.f32 %v2218_v60, %v2199_v50  ;;  %v2238_v57 = vpop.f32.mrf.mxu2 }
 0x878   :  { %v2239_v26 = vadd.f32 %v2238_v57, %v2178_v54 }
 0x879   :  { %v2261_v28 = vmax.f32 %v2219_v25, 0.0 }
 0x87a   :  { %v2259_v29 = vadd.f32 %v2258_v27, %v2239_v26 }
 0x87b   :  { %2349 = vmatmul.f32.vlgmr.msra.gmra.mxu1 %v2261_v28  ;;  %2389 = vmatmul.f32.vlgmr.msrb.gmra.mxu2 %v2261_v28 }
 0x87c   :  { %v2262_v30 = vmax.f32 %v2259_v29, 0.0 }
 0x87e   :  { %2369 = vmatmul.f32.vlgmr.msra.gmra.mxu3 %v2262_v30  ;;  %2409 = vmatmul.f32.vlgmr.msrb.gmra.mxu0 %v2262_v30 }
 0x8f8   :  { %v2350_v6 = vpop.f32.mrf.mxu1 }
 0x8f9   :  { %v2351_v34 = vadd.f32 %v2350_v6, %v2329_v3 }
 0x8fb   :  { %v2410_v35 = vpop.f32.mrf.mxu0 }
 0x8fe   :  { %v2390_v62 = vpop.f32.mrf.mxu2 }
 0x8ff   :  { %v2391_v7 = vadd.f32 %v2390_v62, %v2330_v33 }
 0x901   :  { %v2411_v36 = vadd.f32 %v2410_v35, %v2391_v7  ;;  %v2370_v37 = vpop.f32.mrf.mxu3 }
 0x902   :  { %v2371_v42 = vadd.f32 %v2370_v37, %v2351_v34 }
 0x903   :  { %v2414_v43 = vmax.f32 %v2411_v36, 0.0 }
 0x904   :  { %v2413_v14 = vmax.f32 %v2371_v42, 0.0 }
 0x905   :  { %v2416_v45 = vmul.f32 0.6, %v2414_v43 }
 0x906   :  { %v2415_v48 = vmul.f32 0.6, %v2413_v14 }
 0x907   :  { %v2426_v52 = vadd.f32 %v2422_v44, %v2416_v45 }
 0x908   :  { %v2425_v56 = vadd.f32 %v2421_v49, %v2415_v48 }
 0x909   :  { %v2429_v53 = vrot.slane %v2426_v52, 6 }
 0x90b   :  { %v2430_v40 = vsel %vm1071_vm2, %v2425_v56, %v2429_v53 }
 0x90c   :  { %2432 = vst [vmem:[%s3730_s25] sm:$0xf] %v2430_v40 }
 0x90d   :  { %2437 = vsyncpa [#allocation3], 1 }
 0x90e   :  { %2438 = vsyncpa [#allocation5], 1 }
 0x90f   :  { %2439 = vsyncpa [#allocation8], 1 }
 0x910   :  { %2440 = vsyncpa [#allocation11], 1 }
 0x911   :  { %2441 = vsyncpa [#allocation14], 1 }
 0x912   :  { %2442 = vsyncpa [#allocation17], 1 }
 0x913   :  { %2443 = vsyncpa [#allocation20], 1 }
 0x914   :  { %2444 = vsyncpa [#allocation23], 1 }
 0x915   :  { %2445 = vsyncpa [#allocation26], 1 }
 0x916   :  { %2446 = vsyncpa [#allocation29], 1 }

</bundles_post_ra>
